<compile_context>
chip_gen: v5e
topology: v5e:2x2
jax: 0.10.0
libtpu: 0.0.40
codegen_flags: <defaults>
</compile_context>

<pallas_src>
import functools
import numpy as np
import jax
import jax.numpy as jnp
from jax.experimental import pallas as pl
from jax.experimental.pallas import tpu as pltpu


# ----------------------------------------------------------------------------
# Pallas kernel: one EGNN layer for `batch_tile` systems per grid step.
# ----------------------------------------------------------------------------
def egnn_block_kernel(
    x_ref, h_ref,
    w_i_ref, w_j_ref,         # first layer:  (H, 2H) each, [coord | edge] lanes
    w2_ref,                   # fused second layer: (2H, 2H) = [[wc2,0],[0,we2]]
    wn1h_ref, wn1a_ref,       # node mlp: (H, H), (2H, H) (top H rows zero)
    wn2_ref,                  # node mlp out: (H, H)
    vecs_ref,                 # packed small rows: (8, 2H), layout in wrapper
    x_out_ref, h_out_ref,
    *, mxu_dtype,
):
    f32 = jnp.float32
    x = x_ref[...]                                     # (Bt, P, D)
    h = h_ref[...]                                     # (Bt, P, H)
    Bt, P, H = h.shape
    H2 = 2 * H
    M = Bt * P

    def mm(a, w):                                      # MXU matmul, f32 accumulate
        return jnp.dot(a.astype(mxu_dtype), w.astype(mxu_dtype),
                       preferred_element_type=f32)

    # packed small operands (constants, read once per grid step)
    w_sq_row = vecs_ref[0:1, :]                        # (1, 2H)
    b1_row = vecs_ref[1:2, :]
    b2_row = vecs_ref[2:3, :]
    wc3_row = vecs_ref[3:4, :]                         # [wc3 | 0]
    wa_row = vecs_ref[4:5, :]                          # [0  | wa]
    bn1_row = vecs_ref[5:6, :H]
    bn2_row = vecs_ref[6:7, :H]
    bc3 = vecs_ref[7:8, 0:1]                           # (1, 1)

    # ---- node-space first-layer projections (two lane-aligned matmuls) ------
    hflat = h.reshape(M, H)
    hp_i = mm(hflat, w_i_ref[...]).reshape(Bt, P, H2)  # contribution of node i
    hp_j = mm(hflat, w_j_ref[...]).reshape(Bt, P, H2)  # contribution of node j

    # ---- pairwise squared distances from the Gram matrix (no (P,P,D)) -------
    xn = jnp.sum(x * x, axis=-1)                       # (Bt, P)
    gram = jnp.einsum('bid,bjd->bij', x, x, preferred_element_type=f32)
    sq = jnp.maximum(xn[:, :, None] + xn[:, None, :] - 2.0 * gram, 0.0)  # (Bt,P,P)
    sq4 = sq[:, :, :, None]                            # (Bt, P, P, 1)

    # ---- fused coord/edge MLP over all Bt*P*P pairs --------------------------
    pre = hp_i[:, :, None, :] + hp_j[:, None, :, :] + sq4 * w_sq_row + b1_row
    a1 = jax.nn.silu(pre).reshape(M * P, H2)           # (E, 2H),  E = Bt*P*P
    a2 = jax.nn.silu(mm(a1, w2_ref[...]) + b2_row)     # (E, 2H)  block-diag fused
    a2 = a2.reshape(Bt, P, P, H2)

    # ---- skinny heads: VPU multiply + full-lane reduce (no lane slicing) -----
    e_scalar = jnp.sum(a2 * wc3_row, axis=-1) + bc3    # (Bt, P, P)
    att_logit = jnp.sum(a2 * wa_row, axis=-1)          # (Bt, P, P)

    # ---- coordinate update: dx = S @ x - rowsum(S) * x (self edge cancels) ---
    # TODO(synk): pl.reciprocal(..., approx=True) would move this divide onto
    # the otherwise-idle EUP slot at a slightly looser tolerance vs f32 ref.
    S = e_scalar / (jnp.sqrt(sq) + 1.0)                # (Bt, P, P)
    Sx = jnp.einsum('bij,bjd->bid', S, x, preferred_element_type=f32)
    x_out_ref[...] = x + Sx - jnp.sum(S, axis=2)[:, :, None] * x

    # ---- neighbour aggregation (in-kernel iota not-self mask) + node MLP -----
    ri = jax.lax.broadcasted_iota(jnp.int32, (P, P), 0)
    ci = jax.lax.broadcasted_iota(jnp.int32, (P, P), 1)
    notself = (ri != ci).astype(f32)                   # (P, P)
    gate = (jax.nn.sigmoid(att_logit) * notself)[:, :, :, None]
    agg = jnp.sum(a2 * gate, axis=2).reshape(M, H2)    # (Bt*P, 2H); coord half
                                                       # zeroed by wn1a padding
    n1 = jax.nn.silu(mm(hflat, wn1h_ref[...]) + mm(agg, wn1a_ref[...]) + bn1_row)
    h_new = mm(n1, wn2_ref[...]) + bn2_row             # (Bt*P, H)
    h_out_ref[...] = h_new.reshape(Bt, P, H)


# ----------------------------------------------------------------------------
# Wrapper: parameter packing + pallas_call plumbing (batched over systems)
# ----------------------------------------------------------------------------
def equivariant_block_forward(x, h, params, *, batch_tile=None,
                              mxu_dtype=jnp.float32):
    """x: (B, P, D) f32, h: (B, P, H) f32 -> (x_new, h_new)."""
    B, P, D = x.shape
    H = h.shape[-1]
    H2 = 2 * H
    if batch_tile is None:
        # Batch as much as possible while keeping >= 2 grid steps so both v7x
        # TensorCores get work (single-TC v5e/v6e are indifferent).
        batch_tile = B // 2 if (B >= 2 and B % 2 == 0) else B
    assert B % batch_tile == 0, "batch_tile must divide B"

    zH = jnp.zeros((H, H), jnp.float32)
    z1 = jnp.zeros((1, H), jnp.float32)

    # first layer, h_i and h_j halves (coord branch lanes 0..H-1, edge H..2H-1)
    w_i = jnp.concatenate([params["wc1_hi"], params["we1_hi"]], axis=1)   # (H,2H)
    w_j = jnp.concatenate([params["wc1_hj"], params["we1_hj"]], axis=1)   # (H,2H)
    # block-diagonal fused second layer
    w2 = jnp.concatenate(
        [jnp.concatenate([params["wc2"], zH], axis=1),
         jnp.concatenate([zH, params["we2"]], axis=1)], axis=0)           # (2H,2H)
    # node mlp aggregate weight: only the edge half contributes
    wn1a = jnp.concatenate([zH, params["wn1_a"]], axis=0)                 # (2H,H)

    # packed (8, 2H) operand with all biases / head rows
    vecs = jnp.concatenate([
        jnp.concatenate([params["wc1_sq"], params["we1_sq"]], axis=1),    # row 0
        jnp.concatenate([params["bc1"], params["be1"]], axis=1),          # row 1
        jnp.concatenate([params["bc2"], params["be2"]], axis=1),          # row 2
        jnp.concatenate([params["wc3"].reshape(1, H), z1], axis=1),       # row 3
        jnp.concatenate([z1, params["wa"].reshape(1, H)], axis=1),        # row 4
        jnp.concatenate([params["bn1"], z1], axis=1),                     # row 5
        jnp.concatenate([params["bn2"], z1], axis=1),                     # row 6
        jnp.concatenate([params["bc3"],
                         jnp.zeros((1, H2 - 1), jnp.float32)], axis=1),   # row 7
    ], axis=0)

    def batch_spec(tail):
        nd = len(tail)
        return pl.BlockSpec((batch_tile,) + tail,
                            lambda b, nd=nd: (b,) + (0,) * nd)

    def const_spec(shape):
        nd = len(shape)
        return pl.BlockSpec(shape, lambda b, nd=nd: (0,) * nd)

    weights = (w_i, w_j, w2, params["wn1_h"], wn1a, params["wn2"], vecs)

    x_new, h_new = pl.pallas_call(
        functools.partial(egnn_block_kernel, mxu_dtype=mxu_dtype),
        grid=(B // batch_tile,),
        in_specs=[batch_spec((P, D)), batch_spec((P, H))]
                 + [const_spec(w.shape) for w in weights],
        out_specs=(batch_spec((P, D)), batch_spec((P, H))),
        out_shape=(jax.ShapeDtypeStruct((B, P, D), jnp.float32),
                   jax.ShapeDtypeStruct((B, P, H), jnp.float32)),
        # TODO(synk): for large P, tile the neighbour (j) axis with an inner
        # pipeline so the O(P^2*2H) intermediates stay inside v7x's 64 MiB
        # VMEM; at demo sizes total VMEM use is <1 MiB so no limit is set.
        compiler_params=pltpu.CompilerParams(
            dimension_semantics=("parallel",)),
    )(x, h, *weights)
    return x_new, h_new


# ----------------------------------------------------------------------------
# Plain-JAX reference (faithful mirror of the PyTorch forward, last=False)
# ----------------------------------------------------------------------------
def make_edge_indices(P):
    pairs = [(i, j) for i in range(P) for j in range(P) if j != i]   # i-major
    src = np.array([p[0] for p in pairs], dtype=np.int32)
    dst = np.array([p[1] for p in pairs], dtype=np.int32)
    return src, dst


def reference_forward_single(x, h, params, P):
    src, dst = make_edge_indices(P)
    xi, xj, hi, hj = x[src], x[dst], h[src], h[dst]
    coord_diff = xj - xi
    sq = jnp.sum(coord_diff ** 2, axis=-1, keepdims=True)

    def first_layer(w_hi, w_hj, w_sq, b):
        return hi @ w_hi + hj @ w_hj + sq * w_sq + b

    c = jax.nn.silu(first_layer(params["wc1_hi"], params["wc1_hj"],
                                params["wc1_sq"], params["bc1"]))
    c = jax.nn.silu(c @ params["wc2"] + params["bc2"])
    e_scalar = c @ params["wc3"] + params["bc3"]
    w = coord_diff / (jnp.sqrt(sq) + 1.0)
    x_new = x + jnp.sum((w * e_scalar).reshape(P, P - 1, -1), axis=1)

    m = jax.nn.silu(first_layer(params["we1_hi"], params["we1_hj"],
                                params["we1_sq"], params["be1"]))
    m = jax.nn.silu(m @ params["we2"] + params["be2"])
    m = m * jax.nn.sigmoid(m @ params["wa"])
    agg = jnp.sum(m.reshape(P, P - 1, -1), axis=1)
    n = jax.nn.silu(h @ params["wn1_h"] + agg @ params["wn1_a"] + params["bn1"])
    h_new = n @ params["wn2"] + params["bn2"]
    return x_new, h_new


def init_params(key, H):
    ks = jax.random.split(key, 20)
    s = 0.1

    def w(k, shape):
        return (s * jax.random.normal(k, shape)).astype(jnp.float32)

    return {
        # coord_mlp
        "wc1_hi": w(ks[0], (H, H)), "wc1_hj": w(ks[1], (H, H)),
        "wc1_sq": w(ks[2], (1, H)), "bc1": w(ks[3], (1, H)),
        "wc2": w(ks[4], (H, H)),    "bc2": w(ks[5], (1, H)),
        "wc3": w(ks[6], (H, 1)),    "bc3": w(ks[7], (1, 1)),
        # edge_mlp + attention
        "we1_hi": w(ks[8], (H, H)), "we1_hj": w(ks[9], (H, H)),
        "we1_sq": w(ks[10], (1, H)), "be1": w(ks[11], (1, H)),
        "we2": w(ks[12], (H, H)),   "be2": w(ks[13], (1, H)),
        "wa": w(ks[14], (H, 1)),
        # node_mlp
        "wn1_h": w(ks[15], (H, H)), "wn1_a": w(ks[16], (H, H)),
        "bn1": w(ks[17], (1, H)),
        "wn2": w(ks[18], (H, H)),   "bn2": w(ks[19], (1, H)),
    }


if __name__ == "__main__":
    B, P, D, H = 4, 8, 3, 32      # systems, n_particles, n_dim, hidden_nf
    key = jax.random.PRNGKey(0)
    kx, kh, kp = jax.random.split(key, 3)
    x = jax.random.normal(kx, (B, P, D), dtype=jnp.float32)
    h = jax.random.normal(kh, (B, P, H), dtype=jnp.float32)
    params = init_params(kp, H)

    # exact-f32 variant: checked tightly against the plain-JAX reference
    x_new, h_new = equivariant_block_forward(x, h, params)
    jax.block_until_ready((x_new, h_new))

    ref_fn = jax.vmap(lambda xs, hs: reference_forward_single(xs, hs, params, P))
    x_ref, h_ref = ref_fn(x, h)
    assert jnp.allclose(x_new, x_ref, atol=3e-4, rtol=3e-4), "x mismatch"
    assert jnp.allclose(h_new, h_ref, atol=3e-4, rtol=3e-4), "h mismatch"

    # bf16-MXU variant (v5e/v6e/v7x throughput mode): smoke test only — the
    # reference is f32, so only finiteness is asserted here.
    x_bf, h_bf = equivariant_block_forward(x, h, params, mxu_dtype=jnp.bfloat16)
    jax.block_until_ready((x_bf, h_bf))
    assert bool(jnp.all(jnp.isfinite(x_bf))) and bool(jnp.all(jnp.isfinite(h_bf)))

    print("KERNEL_OK")
</pallas_src>

<mosaic_0001>
module attributes {stable_mosaic.version = 11 : i64} {
  func.func @egnn_block_kernel(%arg0: i32, %arg1: memref<2x8x3xf32, #tpu.memory_space<vmem>>, %arg2: memref<2x8x32xf32, #tpu.memory_space<vmem>>, %arg3: memref<32x64xf32, #tpu.memory_space<vmem>>, %arg4: memref<32x64xf32, #tpu.memory_space<vmem>>, %arg5: memref<64x64xf32, #tpu.memory_space<vmem>>, %arg6: memref<32x32xf32, #tpu.memory_space<vmem>>, %arg7: memref<64x32xf32, #tpu.memory_space<vmem>>, %arg8: memref<32x32xf32, #tpu.memory_space<vmem>>, %arg9: memref<8x64xf32, #tpu.memory_space<vmem>>, %arg10: memref<2x8x3xf32, #tpu.memory_space<vmem>>, %arg11: memref<2x8x32xf32, #tpu.memory_space<vmem>>) attributes {dimension_semantics = [#tpu.dimension_semantics<parallel>], iteration_bounds = array<i64: 2>, scalar_prefetch = 0 : i64, scratch_operands = 0 : i64, tpu.core_type = #tpu.core_type<tc>, window_params = [{transform_indices = @transform_0, window_bounds = array<i64: 2, 8, 3>}, {transform_indices = @transform_1, window_bounds = array<i64: 2, 8, 32>}, {pipeline_mode = #tpu.pipeline_mode<synchronous>, transform_indices = @transform_2, window_bounds = array<i64: 32, 64>}, {pipeline_mode = #tpu.pipeline_mode<synchronous>, transform_indices = @transform_3, window_bounds = array<i64: 32, 64>}, {pipeline_mode = #tpu.pipeline_mode<synchronous>, transform_indices = @transform_4, window_bounds = array<i64: 64, 64>}, {pipeline_mode = #tpu.pipeline_mode<synchronous>, transform_indices = @transform_5, window_bounds = array<i64: 32, 32>}, {pipeline_mode = #tpu.pipeline_mode<synchronous>, transform_indices = @transform_6, window_bounds = array<i64: 64, 32>}, {pipeline_mode = #tpu.pipeline_mode<synchronous>, transform_indices = @transform_7, window_bounds = array<i64: 32, 32>}, {pipeline_mode = #tpu.pipeline_mode<synchronous>, transform_indices = @transform_8, window_bounds = array<i64: 8, 64>}, {transform_indices = @transform_9, window_bounds = array<i64: 2, 8, 3>}, {transform_indices = @transform_10, window_bounds = array<i64: 2, 8, 32>}]} {
    %c0 = arith.constant 0 : index
    %c0_0 = arith.constant 0 : index
    %c0_1 = arith.constant 0 : index
    %0 = vector.load %arg1[%c0, %c0_0, %c0_1] : memref<2x8x3xf32, #tpu.memory_space<vmem>>, vector<2x8x3xf32>
    %c0_2 = arith.constant 0 : index
    %c0_3 = arith.constant 0 : index
    %c0_4 = arith.constant 0 : index
    %1 = vector.load %arg2[%c0_2, %c0_3, %c0_4] : memref<2x8x32xf32, #tpu.memory_space<vmem>>, vector<2x8x32xf32>
    %c0_5 = arith.constant 0 : index
    %c0_6 = arith.constant 0 : index
    %2 = vector.load %arg9[%c0_5, %c0_6] : memref<8x64xf32, #tpu.memory_space<vmem>>, vector<1x64xf32>
    %c1 = arith.constant 1 : index
    %c0_7 = arith.constant 0 : index
    %3 = vector.load %arg9[%c1, %c0_7] : memref<8x64xf32, #tpu.memory_space<vmem>>, vector<1x64xf32>
    %c2 = arith.constant 2 : index
    %c0_8 = arith.constant 0 : index
    %4 = vector.load %arg9[%c2, %c0_8] : memref<8x64xf32, #tpu.memory_space<vmem>>, vector<1x64xf32>
    %c3 = arith.constant 3 : index
    %c0_9 = arith.constant 0 : index
    %5 = vector.load %arg9[%c3, %c0_9] : memref<8x64xf32, #tpu.memory_space<vmem>>, vector<1x64xf32>
    %c4 = arith.constant 4 : index
    %c0_10 = arith.constant 0 : index
    %6 = vector.load %arg9[%c4, %c0_10] : memref<8x64xf32, #tpu.memory_space<vmem>>, vector<1x64xf32>
    %c5 = arith.constant 5 : index
    %c0_11 = arith.constant 0 : index
    %7 = vector.load %arg9[%c5, %c0_11] : memref<8x64xf32, #tpu.memory_space<vmem>>, vector<1x32xf32>
    %c6 = arith.constant 6 : index
    %c0_12 = arith.constant 0 : index
    %8 = vector.load %arg9[%c6, %c0_12] : memref<8x64xf32, #tpu.memory_space<vmem>>, vector<1x32xf32>
    %c7 = arith.constant 7 : index
    %c0_13 = arith.constant 0 : index
    %9 = vector.load %arg9[%c7, %c0_13] : memref<8x64xf32, #tpu.memory_space<vmem>>, vector<1x1xf32>
    %10 = vector.shape_cast %1 : vector<2x8x32xf32> to vector<16x32xf32>
    %c0_14 = arith.constant 0 : index
    %c0_15 = arith.constant 0 : index
    %11 = vector.load %arg3[%c0_14, %c0_15] : memref<32x64xf32, #tpu.memory_space<vmem>>, vector<32x64xf32>
    %cst = arith.constant dense<0.000000e+00> : vector<16x64xf32>
    %12 = tpu.matmul %10, %11, %cst {dimension_numbers = #tpu.dot_dimension_numbers<[1], [0], [0], [1], [0, 0, 1, 1], [], []>} : vector<16x32xf32>, vector<32x64xf32>, vector<16x64xf32> -> vector<16x64xf32>
    %13 = vector.shape_cast %12 : vector<16x64xf32> to vector<2x8x64xf32>
    %c0_16 = arith.constant 0 : index
    %c0_17 = arith.constant 0 : index
    %14 = vector.load %arg4[%c0_16, %c0_17] : memref<32x64xf32, #tpu.memory_space<vmem>>, vector<32x64xf32>
    %cst_18 = arith.constant dense<0.000000e+00> : vector<16x64xf32>
    %15 = tpu.matmul %10, %14, %cst_18 {dimension_numbers = #tpu.dot_dimension_numbers<[1], [0], [0], [1], [0, 0, 1, 1], [], []>} : vector<16x32xf32>, vector<32x64xf32>, vector<16x64xf32> -> vector<16x64xf32>
    %16 = vector.shape_cast %15 : vector<16x64xf32> to vector<2x8x64xf32>
    %17 = arith.mulf %0, %0 : vector<2x8x3xf32>
    %cst_19 = arith.constant dense<0.000000e+00> : vector<2x8xf32>
    %18 = vector.multi_reduction <add>, %17, %cst_19 [2] : vector<2x8x3xf32> to vector<2x8xf32>
    "tpu.trace_start"() <{level = 10 : i32, message = "bid,bjd->bij"}> : () -> ()
    %cst_20 = arith.constant dense<0.000000e+00> : vector<2x8x8xf32>
    %19 = tpu.matmul %0, %0, %cst_20 {dimension_numbers = #tpu.dot_dimension_numbers<[2], [2], [1], [1], [0, 0, 0, 1, 1, 1], [0], [0]>} : vector<2x8x3xf32>, vector<2x8x3xf32>, vector<2x8x8xf32> -> vector<2x8x8xf32>
    "tpu.trace_stop"() : () -> ()
    %20 = vector.shape_cast %18 : vector<2x8xf32> to vector<2x8x1xf32>
    %21 = vector.shape_cast %18 : vector<2x8xf32> to vector<2x1x8xf32>
    %22 = vector.broadcast %20 : vector<2x8x1xf32> to vector<2x8x8xf32>
    %23 = vector.broadcast %21 : vector<2x1x8xf32> to vector<2x8x8xf32>
    %24 = arith.addf %22, %23 : vector<2x8x8xf32>
    %cst_21 = arith.constant 2.000000e+00 : f32
    %25 = vector.broadcast %cst_21 : f32 to vector<2x8x8xf32>
    %26 = arith.mulf %25, %19 : vector<2x8x8xf32>
    %27 = arith.subf %24, %26 : vector<2x8x8xf32>
    %cst_22 = arith.constant 0.000000e+00 : f32
    %28 = vector.broadcast %cst_22 : f32 to vector<2x8x8xf32>
    %29 = arith.maximumf %27, %28 : vector<2x8x8xf32>
    %30 = vector.shape_cast %29 : vector<2x8x8xf32> to vector<2x8x8x1xf32>
    %31 = vector.shape_cast %13 : vector<2x8x64xf32> to vector<2x8x1x64xf32>
    %32 = vector.shape_cast %16 : vector<2x8x64xf32> to vector<2x1x8x64xf32>
    %33 = vector.broadcast %31 : vector<2x8x1x64xf32> to vector<2x8x8x64xf32>
    %34 = vector.broadcast %32 : vector<2x1x8x64xf32> to vector<2x8x8x64xf32>
    %35 = arith.addf %33, %34 : vector<2x8x8x64xf32>
    %36 = vector.shape_cast %2 : vector<1x64xf32> to vector<1x1x1x64xf32>
    %37 = vector.broadcast %30 : vector<2x8x8x1xf32> to vector<2x8x8x64xf32>
    %38 = vector.broadcast %36 : vector<1x1x1x64xf32> to vector<2x8x8x64xf32>
    %39 = arith.mulf %37, %38 : vector<2x8x8x64xf32>
    %40 = arith.addf %35, %39 : vector<2x8x8x64xf32>
    %41 = vector.shape_cast %3 : vector<1x64xf32> to vector<1x1x1x64xf32>
    %42 = vector.broadcast %41 : vector<1x1x1x64xf32> to vector<2x8x8x64xf32>
    %43 = arith.addf %40, %42 : vector<2x8x8x64xf32>
    %44 = arith.negf %43 : vector<2x8x8x64xf32>
    %45 = math.exp %44 : vector<2x8x8x64xf32>
    %cst_23 = arith.constant 1.000000e+00 : f32
    %46 = vector.broadcast %cst_23 : f32 to vector<2x8x8x64xf32>
    %47 = arith.addf %46, %45 : vector<2x8x8x64xf32>
    %48 = arith.divf %46, %47 : vector<2x8x8x64xf32>
    %49 = arith.mulf %43, %48 : vector<2x8x8x64xf32>
    %50 = vector.shape_cast %49 : vector<2x8x8x64xf32> to vector<128x64xf32>
    %c0_24 = arith.constant 0 : index
    %c0_25 = arith.constant 0 : index
    %51 = vector.load %arg5[%c0_24, %c0_25] : memref<64x64xf32, #tpu.memory_space<vmem>>, vector<64x64xf32>
    %cst_26 = arith.constant dense<0.000000e+00> : vector<128x64xf32>
    %52 = tpu.matmul %50, %51, %cst_26 {dimension_numbers = #tpu.dot_dimension_numbers<[1], [0], [0], [1], [0, 0, 1, 1], [], []>} : vector<128x64xf32>, vector<64x64xf32>, vector<128x64xf32> -> vector<128x64xf32>
    %53 = vector.broadcast %4 : vector<1x64xf32> to vector<128x64xf32>
    %54 = arith.addf %52, %53 : vector<128x64xf32>
    %55 = arith.negf %54 : vector<128x64xf32>
    %56 = math.exp %55 : vector<128x64xf32>
    %cst_27 = arith.constant 1.000000e+00 : f32
    %57 = vector.broadcast %cst_27 : f32 to vector<128x64xf32>
    %58 = arith.addf %57, %56 : vector<128x64xf32>
    %59 = arith.divf %57, %58 : vector<128x64xf32>
    %60 = arith.mulf %54, %59 : vector<128x64xf32>
    %61 = vector.shape_cast %60 : vector<128x64xf32> to vector<2x8x8x64xf32>
    %62 = vector.shape_cast %5 : vector<1x64xf32> to vector<1x1x1x64xf32>
    %63 = vector.broadcast %62 : vector<1x1x1x64xf32> to vector<2x8x8x64xf32>
    %64 = arith.mulf %61, %63 : vector<2x8x8x64xf32>
    %cst_28 = arith.constant dense<0.000000e+00> : vector<2x8x8xf32>
    %65 = vector.multi_reduction <add>, %64, %cst_28 [3] : vector<2x8x8x64xf32> to vector<2x8x8xf32>
    %66 = vector.shape_cast %9 : vector<1x1xf32> to vector<1x1x1xf32>
    %67 = vector.broadcast %66 : vector<1x1x1xf32> to vector<2x8x8xf32>
    %68 = arith.addf %65, %67 : vector<2x8x8xf32>
    %69 = vector.shape_cast %6 : vector<1x64xf32> to vector<1x1x1x64xf32>
    %70 = vector.broadcast %69 : vector<1x1x1x64xf32> to vector<2x8x8x64xf32>
    %71 = arith.mulf %61, %70 : vector<2x8x8x64xf32>
    %cst_29 = arith.constant dense<0.000000e+00> : vector<2x8x8xf32>
    %72 = vector.multi_reduction <add>, %71, %cst_29 [3] : vector<2x8x8x64xf32> to vector<2x8x8xf32>
    %73 = math.sqrt %29 : vector<2x8x8xf32>
    %cst_30 = arith.constant 1.000000e+00 : f32
    %74 = vector.broadcast %cst_30 : f32 to vector<2x8x8xf32>
    %75 = arith.addf %73, %74 : vector<2x8x8xf32>
    %76 = arith.divf %68, %75 : vector<2x8x8xf32>
    "tpu.trace_start"() <{level = 10 : i32, message = "bij,bjd->bid"}> : () -> ()
    %cst_31 = arith.constant dense<0.000000e+00> : vector<2x8x3xf32>
    %77 = tpu.matmul %76, %0, %cst_31 {dimension_numbers = #tpu.dot_dimension_numbers<[2], [1], [1], [2], [0, 0, 0, 1, 1, 2], [0], [0]>} : vector<2x8x8xf32>, vector<2x8x3xf32>, vector<2x8x3xf32> -> vector<2x8x3xf32>
    "tpu.trace_stop"() : () -> ()
    %78 = arith.addf %0, %77 : vector<2x8x3xf32>
    %cst_32 = arith.constant dense<0.000000e+00> : vector<2x8xf32>
    %79 = vector.multi_reduction <add>, %76, %cst_32 [2] : vector<2x8x8xf32> to vector<2x8xf32>
    %80 = vector.shape_cast %79 : vector<2x8xf32> to vector<2x8x1xf32>
    %81 = vector.broadcast %80 : vector<2x8x1xf32> to vector<2x8x3xf32>
    %82 = arith.mulf %81, %0 : vector<2x8x3xf32>
    %83 = arith.subf %78, %82 : vector<2x8x3xf32>
    %c0_33 = arith.constant 0 : index
    %c0_34 = arith.constant 0 : index
    %c0_35 = arith.constant 0 : index
    %84 = vector.load %arg10[%c0_33, %c0_34, %c0_35] : memref<2x8x3xf32, #tpu.memory_space<vmem>>, vector<2x8x3xf32>
    tpu.vector_store %arg10[%c0_33, %c0_34, %c0_35], %83 {strides = array<i32>} : memref<2x8x3xf32, #tpu.memory_space<vmem>>, vector<2x8x3xf32>,
    %85 = tpu.iota {dimensions = array<i32: 0>} : vector<8x8xi32>
    %86 = tpu.iota {dimensions = array<i32: 1>} : vector<8x8xi32>
    %87 = arith.cmpi ne, %85, %86 : vector<8x8xi32>
    %88 = arith.extui %87 : vector<8x8xi1> to vector<8x8xi32>
    %89 = arith.sitofp %88 : vector<8x8xi32> to vector<8x8xf32>
    %90 = arith.negf %72 : vector<2x8x8xf32>
    %91 = math.exp %90 : vector<2x8x8xf32>
    %cst_36 = arith.constant 1.000000e+00 : f32
    %92 = vector.broadcast %cst_36 : f32 to vector<2x8x8xf32>
    %93 = arith.addf %92, %91 : vector<2x8x8xf32>
    %94 = arith.divf %92, %93 : vector<2x8x8xf32>
    %95 = vector.shape_cast %89 : vector<8x8xf32> to vector<1x8x8xf32>
    %96 = vector.broadcast %95 : vector<1x8x8xf32> to vector<2x8x8xf32>
    %97 = arith.mulf %94, %96 : vector<2x8x8xf32>
    %98 = vector.shape_cast %97 : vector<2x8x8xf32> to vector<2x8x8x1xf32>
    %99 = vector.broadcast %98 : vector<2x8x8x1xf32> to vector<2x8x8x64xf32>
    %100 = arith.mulf %61, %99 : vector<2x8x8x64xf32>
    %cst_37 = arith.constant dense<0.000000e+00> : vector<2x8x64xf32>
    %101 = vector.multi_reduction <add>, %100, %cst_37 [2] : vector<2x8x8x64xf32> to vector<2x8x64xf32>
    %102 = vector.shape_cast %101 : vector<2x8x64xf32> to vector<16x64xf32>
    %c0_38 = arith.constant 0 : index
    %c0_39 = arith.constant 0 : index
    %103 = vector.load %arg6[%c0_38, %c0_39] : memref<32x32xf32, #tpu.memory_space<vmem>>, vector<32x32xf32>
    %cst_40 = arith.constant dense<0.000000e+00> : vector<16x32xf32>
    %104 = tpu.matmul %10, %103, %cst_40 {dimension_numbers = #tpu.dot_dimension_numbers<[1], [0], [0], [1], [0, 0, 1, 1], [], []>} : vector<16x32xf32>, vector<32x32xf32>, vector<16x32xf32> -> vector<16x32xf32>
    %c0_41 = arith.constant 0 : index
    %c0_42 = arith.constant 0 : index
    %105 = vector.load %arg7[%c0_41, %c0_42] : memref<64x32xf32, #tpu.memory_space<vmem>>, vector<64x32xf32>
    %cst_43 = arith.constant dense<0.000000e+00> : vector<16x32xf32>
    %106 = tpu.matmul %102, %105, %cst_43 {dimension_numbers = #tpu.dot_dimension_numbers<[1], [0], [0], [1], [0, 0, 1, 1], [], []>} : vector<16x64xf32>, vector<64x32xf32>, vector<16x32xf32> -> vector<16x32xf32>
    %107 = arith.addf %104, %106 : vector<16x32xf32>
    %108 = vector.broadcast %7 : vector<1x32xf32> to vector<16x32xf32>
    %109 = arith.addf %107, %108 : vector<16x32xf32>
    %110 = arith.negf %109 : vector<16x32xf32>
    %111 = math.exp %110 : vector<16x32xf32>
    %cst_44 = arith.constant 1.000000e+00 : f32
    %112 = vector.broadcast %cst_44 : f32 to vector<16x32xf32>
    %113 = arith.addf %112, %111 : vector<16x32xf32>
    %114 = arith.divf %112, %113 : vector<16x32xf32>
    %115 = arith.mulf %109, %114 : vector<16x32xf32>
    %c0_45 = arith.constant 0 : index
    %c0_46 = arith.constant 0 : index
    %116 = vector.load %arg8[%c0_45, %c0_46] : memref<32x32xf32, #tpu.memory_space<vmem>>, vector<32x32xf32>
    %cst_47 = arith.constant dense<0.000000e+00> : vector<16x32xf32>
    %117 = tpu.matmul %115, %116, %cst_47 {dimension_numbers = #tpu.dot_dimension_numbers<[1], [0], [0], [1], [0, 0, 1, 1], [], []>} : vector<16x32xf32>, vector<32x32xf32>, vector<16x32xf32> -> vector<16x32xf32>
    %118 = vector.broadcast %8 : vector<1x32xf32> to vector<16x32xf32>
    %119 = arith.addf %117, %118 : vector<16x32xf32>
    %120 = vector.shape_cast %119 : vector<16x32xf32> to vector<2x8x32xf32>
    %c0_48 = arith.constant 0 : index
    %c0_49 = arith.constant 0 : index
    %c0_50 = arith.constant 0 : index
    %121 = vector.load %arg11[%c0_48, %c0_49, %c0_50] : memref<2x8x32xf32, #tpu.memory_space<vmem>>, vector<2x8x32xf32>
    tpu.vector_store %arg11[%c0_48, %c0_49, %c0_50], %120 {strides = array<i32>} : memref<2x8x32xf32, #tpu.memory_space<vmem>>, vector<2x8x32xf32>,
    return
  }
  func.func @transform_0(%arg0: i32) -> (i32, i32, i32) {
    %c0_i32 = arith.constant 0 : i32
    %c0_i32_0 = arith.constant 0 : i32
    %c0_i32_1 = arith.constant 0 : i32
    return %arg0, %c0_i32, %c0_i32_0 : i32, i32, i32
  }
  func.func @transform_1(%arg0: i32) -> (i32, i32, i32) {
    %c0_i32 = arith.constant 0 : i32
    %c0_i32_0 = arith.constant 0 : i32
    %c0_i32_1 = arith.constant 0 : i32
    return %arg0, %c0_i32, %c0_i32_0 : i32, i32, i32
  }
  func.func @transform_2(%arg0: i32) -> (i32, i32) {
    %c0_i32 = arith.constant 0 : i32
    %c0_i32_0 = arith.constant 0 : i32
    %c0_i32_1 = arith.constant 0 : i32
    return %c0_i32, %c0_i32_0 : i32, i32
  }
  func.func @transform_3(%arg0: i32) -> (i32, i32) {
    %c0_i32 = arith.constant 0 : i32
    %c0_i32_0 = arith.constant 0 : i32
    %c0_i32_1 = arith.constant 0 : i32
    return %c0_i32, %c0_i32_0 : i32, i32
  }
  func.func @transform_4(%arg0: i32) -> (i32, i32) {
    %c0_i32 = arith.constant 0 : i32
    %c0_i32_0 = arith.constant 0 : i32
    %c0_i32_1 = arith.constant 0 : i32
    return %c0_i32, %c0_i32_0 : i32, i32
  }
  func.func @transform_5(%arg0: i32) -> (i32, i32) {
    %c0_i32 = arith.constant 0 : i32
    %c0_i32_0 = arith.constant 0 : i32
    %c0_i32_1 = arith.constant 0 : i32
    return %c0_i32, %c0_i32_0 : i32, i32
  }
  func.func @transform_6(%arg0: i32) -> (i32, i32) {
    %c0_i32 = arith.constant 0 : i32
    %c0_i32_0 = arith.constant 0 : i32
    %c0_i32_1 = arith.constant 0 : i32
    return %c0_i32, %c0_i32_0 : i32, i32
  }
  func.func @transform_7(%arg0: i32) -> (i32, i32) {
    %c0_i32 = arith.constant 0 : i32
    %c0_i32_0 = arith.constant 0 : i32
    %c0_i32_1 = arith.constant 0 : i32
    return %c0_i32, %c0_i32_0 : i32, i32
  }
  func.func @transform_8(%arg0: i32) -> (i32, i32) {
    %c0_i32 = arith.constant 0 : i32
    %c0_i32_0 = arith.constant 0 : i32
    %c0_i32_1 = arith.constant 0 : i32
    return %c0_i32, %c0_i32_0 : i32, i32
  }
  func.func @transform_9(%arg0: i32) -> (i32, i32, i32) {
    %c0_i32 = arith.constant 0 : i32
    %c0_i32_0 = arith.constant 0 : i32
    %c0_i32_1 = arith.constant 0 : i32
    return %arg0, %c0_i32, %c0_i32_0 : i32, i32, i32
  }
  func.func @transform_10(%arg0: i32) -> (i32, i32, i32) {
    %c0_i32 = arith.constant 0 : i32
    %c0_i32_0 = arith.constant 0 : i32
    %c0_i32_1 = arith.constant 0 : i32
    return %arg0, %c0_i32, %c0_i32_0 : i32, i32, i32
  }
}

</mosaic_0001>

<bundles_post_ra>
// kernel: tpu_custom_call.1
= control target key start
LH: loop header
LB: loop body
LE: loop exit
PB: predicated region body
PF: predicated region fallthrough
CT: control target
= control target key end

     0   :  { %s5707_s0 = inlined_call_operand.vmem [shape: f32[4,8,3], index: 0, kind: input, shape index: {}]   ;;  %s5708_s1 = inlined_call_operand.vmem [shape: f32[4,8,32], index: 1, kind: input, shape index: {}]   ;;  %s5709_s2 = inlined_call_operand.hbm [shape: f32[32,64], index: 2, kind: input, shape index: {}]   ;;  %s5710_s3 = inlined_call_operand.hbm [shape: f32[32,64], index: 3, kind: input, shape index: {}]   ;;  %s5711_s4 = inlined_call_operand.vmem [shape: f32[64,64], index: 4, kind: input, shape index: {}]   ;;  %s5712_s5 = inlined_call_operand.hbm [shape: f32[32,32], index: 5, kind: input, shape index: {}]   ;;  %s5713_s6 = inlined_call_operand.vmem [shape: f32[64,32], index: 6, kind: input, shape index: {}]   ;;  %s5714_s7 = inlined_call_operand.hbm [shape: f32[32,32], index: 7, kind: input, shape index: {}]   ;;  %s5715_s8 = inlined_call_operand.vmem [shape: f32[8,64], index: 8, kind: input, shape index: {}]   ;;  %s5716_s9 = inlined_call_operand.vmem [shape: f32[4,8,3], index: 9, kind: output, shape index: {0}]   ;;  %s5717_s10 = inlined_call_operand.hbm [shape: f32[4,8,32], index: 10, kind: output, shape index: {1}]  }
   0x1   :  { %5730 = sst [smem:[#allocation24_spill]] %s5709_s2 }
   0x2   :  { %5731 = sst [smem:[#allocation25_spill]] %s5710_s3 }
   0x3   :  { %16 = vsyncpa [#allocation3], 0 }
   0x4   :  { %17 = vsyncpa [#allocation6], 0 }
   0x5   :  { %18 = vsyncpa [#allocation9], 0 }
   0x6   :  { %19 = vsyncpa [#allocation4], 0 }
   0x7   :  { %21 = vsyncpa [#allocation4 + $0x1], 0  ;;  %s4013_s13 = smov 0   ;;  %s4015_s14 = smov 0  }
   0x8   :  { %s4017_s15 = smov 0   ;;  %s4019_s16 = smov 0  }
   0x9 LB: > { %5732 = sst [smem:[#allocation15_spill]] %s3942_s15  ;;  %s4034_s17 = sadd.s32 4294967295, %s3946_s16   ;;  %s3946_s16 = sphi %s4019_s16, %s5816_s16   ;;  %s3942_s15 = sphi %s4017_s15, %s5818_s15   ;;  %s3938_s14 = sphi %s4015_s14, %s5820_s14   ;;  %s3934_s13 = sphi %s4013_s13, %s5819_s13  }
   0xa   : > { %s3251_s18 = sadd.s32 4294967294, %s3946_s16   ;;  %s4038_s19 = sadd.s32 1, %s3946_s16  }
   0xb   : > { %5733 = sst [smem:[#allocation16_spill]] %s4038_s19  ;;  %s259_s20 = sadd.s32 1, %s3942_s15 }
   0xc   : > { %s256_s21 = ssub.s32 %s3946_s16, %s4038_s19  ;;  %p269_p0 = scmp.ne.s32.totalorder %s3942_s15, %s3938_s14 }
   0xd   : > { %p257_p1 = scmp.eq.s32.totalorder %s256_s21, 0  ;;  %p270_p2 = scmp.eq.s32.totalorder %s4034_s17, 1 }
   0xe   : > { %p275_p3 = scmp.ne.s32.totalorder %s3938_s14, %s3934_s13  ;;  %p276_p4 = scmp.eq.s32.totalorder %s3251_s18, 1 }
   0xf   : > { %s4049_s22 = scalar_select %p257_p1, %s3942_s15, %s259_s20  }
  0x10   : > { %p4051_p5 = por %p270_p2, %p269_p0  ;;  %p4055_p6 = por %p276_p4, %p275_p3 }
  0x11   : > { %5734 = sst [smem:[#allocation17_spill]] %s4049_s22  ;;  %p3252_p7 = scmp.ge.s32.totalorder %s3946_s16, 1 }
  0x12   : > { %s5736_s24 = scalar_select %p4055_p6, 1, 0 }
  0x13   : > { %p283_p8 = scmp.lt.s32.totalorder %s3946_s16, 3  ;;  %p3420_p9 = scmp.eq.s32.totalorder %s4034_s17, 0 }
  0x14   : > { %5737 = sst [smem:[#allocation18_spill]] %s5736_s24  ;;  %s3948_s18 = smov [#allocation5]  }
  0x15   : > { %p4062_p10 = pnand %p3252_p7, %p283_p8  ;;  %s5739_s3 = sld [smem:[#allocation25_spill]] }
  0x16   : > { %s5740_s2 = sld [smem:[#allocation24_spill]]  ;;  %s310_s20 = sshll.u32 %s3948_s18, 4  ;;  %s311_s20 = int_to_ptr.vmem [resolvable:$true] %s310_s20 }
  0x17   : > { %p3403_p11 = pneg %p4062_p10  ;;  %s3949_s21 = smov 128  }
  0x18   : > { %s3950_s26 = smov 8   ;;  %s3951_s27 = smov [#allocation2]  }
  0x19   : > { %p4076_p12 = pnand %p3420_p9, %p3403_p11  ;;  %s296_s29 = sshll.u32 %s3951_s27, 4  ;;  %s297_s29 = int_to_ptr.vmem [resolvable:$true] %s296_s29 }
  0x1a   : > { %s342_s15 = sshll.u32 %s5714_s7, 4  ;;  %s3952_s19 = smov [#allocation7]   ;;  %s343_s15 = int_to_ptr.hbm [resolvable:$true] %s342_s15 }
  0x1b   : > { %s308_s28 = sshll.u32 %s5739_s3, 4  ;;  %s325_s3 = sshll.u32 %s5712_s5, 4  ;;  %s309_s28 = int_to_ptr.hbm [resolvable:$true] %s308_s28  ;;  %s326_s3 = int_to_ptr.hbm [resolvable:$true] %s325_s3 }
  0x1c   : > { %s294_s11 = sshll.u32 %s5740_s2, 4  ;;  %s327_s24 = sshll.u32 %s3952_s19, 4  ;;  %s295_s11 = int_to_ptr.hbm [resolvable:$true] %s294_s11  ;;  %s328_s24 = int_to_ptr.vmem [resolvable:$true] %s327_s24 }
  0x1d   : > { %3409 = dma.hbm_to_vmem [thread:$0]  (!%p4076_p12), %s309_s28, 512, %s311_s20, [#allocation6], %s3949_s21, %s3949_s21, %s3950_s26  }
  0x1e   : > { %3406 = dma.hbm_to_vmem [thread:$0]  (!%p4076_p12), %s295_s11, 512, %s297_s29, [#allocation3], %s3949_s21, %s3949_s21, %s3950_s26  }
  0x1f   : > { %3412 = dma.hbm_to_vmem [thread:$0]  (!%p4076_p12), %s326_s3, 512, %s328_s24, [#allocation6], %s3949_s21, %s3949_s21, %s3950_s26  }
  0x20   : > { %s3953_s28 = smov [#allocation8]   ;;  %381 = sbr.rel (%p4062_p10) target bundleno = 1243 (0x4db), region = 56 }
  0x21   : > { %s344_s20 = sshll.u32 %s3953_s28, 4  ;;  %s345_s20 = int_to_ptr.vmem [resolvable:$true] %s344_s20 }
  0x22   : > { %3415 = dma.hbm_to_vmem [thread:$0]  (!%p4076_p12), %s343_s15, 512, %s345_s20, [#allocation9], %s3949_s21, %s3949_s21, %s3950_s26  }
  0x25   : > { %3917 = dma.done.wait (%p3420_p9), [#allocation3], 512  }
  0x26   : > { %3919 = vsyncadd (%p3420_p9), [#allocation3], 4294966784 }
  0x27   : > { %3921 = dma.done.wait (%p3420_p9), [#allocation6], 1024  }
  0x28   : > { %3923 = vsyncadd (%p3420_p9), [#allocation6], 4294966272 }
  0x29   : > { %3925 = dma.done.wait (%p3420_p9), [#allocation9], 512  }
  0x2a   : > { %3927 = vsyncadd (%p3420_p9), [#allocation9], 4294966784  ;;  %s3264_s2 = sshll.u32 %s4034_s17, 1  ;;  %vm5728_vm0 = vcmask 23552   ;;  %v479_v2 = vld [vmem:[#allocation2 + $0x18] sm:$0xff]  ;;  %v478_v5 = vld [vmem:[#allocation2 + $0x10] sm:$0xff]  ;;  %v594_v16 = vlaneseq }
  0x2b   : > { %p446_p13 = scmp.lt.s32.totalorder %s3264_s2, 3  ;;  %v513_v4 = vld [vmem:[#allocation5 + $0x18] sm:$0xff]  ;;  %499 = vmatpush.msra.mxu0 %v479_v2  ;;  %v477_v6 = vld [vmem:[#allocation2 + $0x8] sm:$0xff]  ;;  %v512_v8 = vld [vmem:[#allocation5 + $0x10] sm:$0xff]  ;;  %vm5729_vm1 = vcmask 261120   ;;  %v3954_v37 = vmov 0.0  }
  0x2c   : > { %526 = vmatpush.msra.mxu1 %v513_v4  ;;  %v511_v9 = vld [vmem:[#allocation5 + $0x8] sm:$0xff]  ;;  %v476_v11 = vld [vmem:[#allocation2] sm:$0xff]  ;;  %v4143_v17 = vshrl.u32 %v594_v16, 7  ;;  %v4148_v19 = vand.u32 127, %v594_v16  ;;  %v1179_v2 = vld [vmem:[%s5711_s4 + $0x30] sm:$0xff]  ;;  %vm1182_vm6 = vcmask 523264  }
  0x2d   : > { %s5822_s2 = smov (!%p446_p13, %s3264_s2), 3  ;;  %500 = vmatpush.msra.mxu0 %v478_v5  ;;  %v510_v13 = vld [vmem:[#allocation5] sm:$0xff]  ;;  %v1175_v16 = vld [vmem:[%s5711_s4 + $0x10] sm:$0xff]  ;;  %s3358_s25 = sshll.u32 %s4034_s17, 4 }
  0x2e   : > { %s4109_s3 = sshll.u32 %s5822_s2, 3  ;;  %527 = vmatpush.msra.mxu1 %v512_v8  ;;  %3473 = vset.pattern.permute.xlu0 %v4143_v17  ;;  %5742 = vst [vmem:[#allocation19_spill] sm:$0xff] %v4148_v19  ;;  %vm2319_vm2 = vcmp.ne.s32.totalorder %v4143_v17, %v4148_v19  ;;  %v4188_v5 = vld [vmem:[%s5715_s8] ss:$0 sm:$0xff]  ;;  %s442_s2 = sand.u32 1, %s3938_s14  }
  0x2f   : > { %s4115_s22 = scalar_lea.vmem %s5707_s0, %s4109_s3  ;;  %s4132_s11 = scalar_lea.vmem %s5708_s1, %s4109_s3  ;;  %501 = vmatpush.msra.mxu0 %v477_v6  ;;  %3472 = vset.pattern.permute.xlu2 %v4143_v17  ;;  %v3328_v38 = vsel %vm2319_vm2, 1.0, %v3954_v37  ;;  %v1178_v6 = vld [vmem:[%s5711_s4 + $0x28] sm:$0xff] }
  0x30   : > { %v4118_v0 = vld [vmem:[%s4115_s22] sm:$0xff]  ;;  %v465_v1 = vld [vmem:[%s4115_s22 + $0x8] sm:$0xff]  ;;  %528 = vmatpush.msra.mxu1 %v511_v9  ;;  %3471 = vset.pattern.permute.xlu1 %v4143_v17  ;;  %v2627_v41 = vperm.slane %v3328_v38, 0  ;;  %v2634_v42 = vperm.slane %v3328_v38, 1  ;;  %v2669_v46 = vperm.slane %v3328_v38, 6  ;;  %v2676_v47 = vperm.slane %v3328_v38, 7  ;;  %s461_s20 = scalar_lea.vmem %s5716_s9, %s4109_s3  ;;  %s3107_s21 = scalar_lea.hbm %s5717_s10, %s3358_s25 }
  0x31   : > { %3274 = vmatpush.xpose.msk.msra.mxu2 %vm5728_vm0, %v4118_v0  ;;  %3276 = vmatpush.xpose.msk.msra.mxu3 %vm5728_vm0, %v465_v1  ;;  %v538_v3 = vmul.f32 %v465_v1, %v465_v1  ;;  %v537_v10 = vmul.f32 %v4118_v0, %v4118_v0  ;;  %v466_v12 = vld [vmem:[%s4132_s11] sm:$0xff]  ;;  %v467_v15 = vld [vmem:[%s4132_s11 + $0x8] sm:$0xff]  ;;  %v2641_v57 = vperm.slane %v3328_v38, 2  ;;  %v2648_v58 = vperm.slane %v3328_v38, 3  ;;  %s3263_s15 = sshll.u32 %s442_s2, 4  ;;  %s3110_s27 = sshll.u32 %s3107_s21, 4  ;;  %s3111_s27 = int_to_ptr.hbm [resolvable:$true] %s3110_s27 }
  0x32   : > { %502 = vmatpush.msra.mxu0 %v476_v11  ;;  %529 = vmatpush.msra.mxu1 %v510_v13  ;;  %v3474_v43 = vpack.i.bf16 %v2634_v42, %v2627_v41  ;;  %v3489_v48 = vpack.i.bf16 %v2676_v47, %v2669_v46  ;;  %v2655_v59 = vperm.slane %v3328_v38, 4  ;;  %v2662_v60 = vperm.slane %v3328_v38, 5  ;;  %v1177_v9 = vld [vmem:[%s5711_s4 + $0x20] sm:$0xff]  ;;  %v1176_v13 = vld [vmem:[%s5711_s4 + $0x18] sm:$0xff]  ;;  %s444_s3 = scalar_lea.vmem [#allocation10], %s3263_s15  ;;  %s3092_s29 = scalar_lea.sflag [#allocation4], %s442_s2 }
  0x33   : > { %v543_v7 = vsel %vm5728_vm0, %v538_v3, 0.0  ;;  %v540_v14 = vsel %vm5728_vm0, %v537_v10, 0.0  ;;  %3270 = vmatmul.msk.f32.vlgmr.msra.gmra.mxu0 %vm5729_vm1, %v466_v12  ;;  %3272 = vmatmul.msk.f32.vlgmr.msra.gmra.mxu1 %vm5729_vm1, %v466_v12  ;;  %v3479_v61 = vpack.i.bf16 %v2648_v58, %v2641_v57  ;;  %v4201_v11 = vld [vmem:[%s5715_s8 + $0x1] ss:$0 sm:$0xff]  ;;  %s3108_s26 = sshll.u32 %s444_s3, 4  ;;  %s3892_s28 = scalar_lea.hbm %s5717_s10, 32  ;;  %s3109_s26 = int_to_ptr.vmem [resolvable:$true] %s3108_s26 }
  0x34   : > { %3275 = vmatmul.msk.f32.vlgmr.msra.gmra.mxu2 %vm5728_vm0, %v4118_v0  ;;  %3277 = vmatmul.msk.f32.vlgmr.msra.gmra.mxu3 %vm5728_vm0, %v465_v1  ;;  %v3484_v62 = vpack.i.bf16 %v2662_v60, %v2655_v59  ;;  %v1180_v1 = vld [vmem:[%s5711_s4 + $0x38] sm:$0xff] }
  0x35   : > { %544 = vadd.xlane.f32.xlu0 %v543_v7  ;;  %1239 = vmatpush.msrb.mxu0 %v1180_v1 }
  0x36   : > { %3359 = vmatpush.msrb.mxu1 %v1180_v1  ;;  %3360 = vmatpush.msrb.mxu2 %v1180_v1 }
  0x37   : > { %3361 = vmatpush.msrb.mxu3 %v1180_v1  ;;  %1240 = vmatpush.msrb.mxu0 %v1179_v2 }
  0x38   : > { %3362 = vmatpush.msrb.mxu1 %v1179_v2  ;;  %3363 = vmatpush.msrb.mxu2 %v1179_v2 }
  0x39   : > { %3364 = vmatpush.msrb.mxu3 %v1179_v2  ;;  %1241 = vmatpush.msrb.mxu0 %v1178_v6 }
  0x3a   : > { %3365 = vmatpush.msrb.mxu1 %v1178_v6  ;;  %3366 = vmatpush.msrb.mxu2 %v1178_v6 }
  0x3b   : > { %3271 = vmatmul.msk.f32.gmra.mxu0 %vm5729_vm1, %v467_v15  ;;  %3273 = vmatmul.msk.f32.gmra.mxu1 %vm5729_vm1, %v467_v15 }
  0x3c   : > { %3367 = vmatpush.msrb.mxu3 %v1178_v6  ;;  %1242 = vmatpush.msrb.mxu0 %v1177_v9 }
  0x3d   : > { %541 = vadd.xlane.f32.xlu0 %v540_v14  ;;  %3368 = vmatpush.msrb.mxu1 %v1177_v9 }
  0x3e   : > { %3369 = vmatpush.msrb.mxu2 %v1177_v9  ;;  %3370 = vmatpush.msrb.mxu3 %v1177_v9 }
  0x3f   : > { %1243 = vmatpush.msrb.mxu0 %v1176_v13  ;;  %3371 = vmatpush.msrb.mxu1 %v1176_v13 }
  0x40   : > { %3372 = vmatpush.msrb.mxu2 %v1176_v13  ;;  %3373 = vmatpush.msrb.mxu3 %v1176_v13 }
  0x41   : > { %1244 = vmatpush.msrb.mxu0 %v1175_v16  ;;  %3374 = vmatpush.msrb.mxu1 %v1175_v16 }
  0x42   : > { %3375 = vmatpush.msrb.mxu2 %v1175_v16  ;;  %3376 = vmatpush.msrb.mxu3 %v1175_v16 }
  0xa8   : > { %v545_v18 = vpop.xlane.xlu0 %544 }
  0xa9   : > { %v597_v22 = vperm.slane %v545_v18, %v4148_v19 }
  0xab   : > { %v620_v26 = vadd.f32 %v597_v22, %v545_v18 }
  0xb0   : > { %v542_v20 = vpop.xlane.xlu0 %541  ;;  %v4174_v63 = vpop.f32.mrf.mxu0 }
  0xb1   : > { %v596_v21 = vperm.slane %v542_v20, %v4148_v19  ;;  %v755_v3 = vperm.slane %v4174_v63, 0  ;;  %v4183_v4 = vpop.f32.mrf.mxu1  ;;  %v744_v8 = vrot.slane %v4174_v63, 4  ;;  %v747_v13 = vrot.slane %v4174_v63, 7 }
  0xb3   : > { %v619_v23 = vadd.f32 %v596_v21, %v542_v20  ;;  %v787_v7 = vadd.f32 %v755_v3, %v4183_v4  ;;  %v759_v15 = vperm.slane %v744_v8, 0  ;;  %v1174_v20 = vld [vmem:[%s5711_s4 + $0x8] sm:$0xff] }
  0xb4   : > { %1245 = vmatpush.msrb.mxu0 %v1174_v20  ;;  %3377 = vmatpush.msrb.mxu1 %v1174_v20 }
  0xb5   : > { %v791_v22 = vadd.f32 %v759_v15, %v4183_v4  ;;  %3378 = vmatpush.msrb.mxu2 %v1174_v20  ;;  %3379 = vmatpush.msrb.mxu3 %v1174_v20 }
  0xb7   : > { %v566_v24 = vpop.f32.mrf.mxu2  ;;  %v589_v25 = vpop.f32.mrf.mxu3 }
  0xb8   : > { %v621_v27 = vmul.f32 2.0, %v566_v24  ;;  %v622_v28 = vmul.f32 2.0, %v589_v25  ;;  %v1173_v24 = vld [vmem:[%s5711_s4] sm:$0xff] }
  0xb9   : > { %1246 = vmatpush.msrb.mxu0 %v1173_v24  ;;  %3380 = vmatpush.msrb.mxu1 %v1173_v24  ;;  %v4235_v42 = vpop.f32.mrf.mxu1 }
  0xba   : > { %v623_v29 = vsub.f32 %v619_v23, %v621_v27  ;;  %v624_v30 = vsub.f32 %v620_v26, %v622_v28  ;;  %v745_v23 = vrot.slane %v4174_v63, 5  ;;  %3381 = vmatpush.msrb.mxu2 %v1173_v24  ;;  %3382 = vmatpush.msrb.mxu3 %v1173_v24 }
  0xbc   : > { %v4152_v31 = vmax.f32 %v623_v29, 0.0  ;;  %v4154_v32 = vmax.f32 %v624_v30, 0.0  ;;  %v760_v28 = vperm.slane %v745_v23, 0  ;;  %v4223_v29 = vpop.f32.mrf.mxu0  ;;  %2227 = vmatpush.msra.mxu3 %v4118_v0 }
  0xbd   : > { %v763_v41 = vperm.slane %v4223_v29, 0  ;;  %v754_v47 = vrot.slane %v4223_v29, 7 }
  0xbe   : > { %v683_v33 = vperm.slane %v4154_v32, 0  ;;  %v697_v34 = vperm.slane %v4154_v32, 2  ;;  %v627_v35 = vperm.slane %v4152_v31, 0  ;;  %v655_v36 = vperm.slane %v4152_v31, 4 }
  0xbf   : > { %v690_v39 = vperm.slane %v4154_v32, 1  ;;  %v732_v40 = vperm.slane %v4154_v32, 7  ;;  %v634_v44 = vperm.slane %v4152_v31, 1  ;;  %v662_v45 = vperm.slane %v4152_v31, 5 }
  0xc0   : > { %688 = vperm.xlu1 %3471, %v683_v33   ;;  %702 = vperm.xlu0 %3473, %v697_v34   ;;  %v704_v49 = vperm.slane %v4154_v32, 3  ;;  %v641_v50 = vperm.slane %v4152_v31, 2  ;;  %v669_v51 = vperm.slane %v4152_v31, 6  ;;  %v711_v52 = vperm.slane %v4154_v32, 4 }
  0xc1   : > { %632 = vperm.xlu2 %3472, %v627_v35   ;;  %v725_v53 = vperm.slane %v4154_v32, 6  ;;  %v648_v54 = vperm.slane %v4152_v31, 3  ;;  %v676_v55 = vperm.slane %v4152_v31, 7  ;;  %v718_v56 = vperm.slane %v4154_v32, 5 }
  0xc2   : > { %v742_v33 = vrot.slane %v4174_v63, 2  ;;  %v749_v34 = vrot.slane %v4223_v29, 2  ;;  %v792_v37 = vadd.f32 %v760_v28, %v4183_v4 }
  0xc4   : > { %v757_v0 = vperm.slane %v742_v33, 0 }
  0xc8   : > { %695 = vperm.xlu1 %3471, %v690_v39   ;;  %737 = vperm.xlu0 %3473, %v732_v40  }
  0xc9   : > { %660 = vperm.xlu2 %3472, %v655_v36  }
  0xd0   : > { %639 = vperm.xlu1 %3471, %v634_v44   ;;  %3475 = vperm.xlu0 %3473, %v3474_v43   ;;  %v765_v43 = vperm.slane %v749_v34, 0  ;;  %v748_v44 = vrot.slane %v4223_v29, 1 }
  0xd1   : > { %667 = vperm.xlu2 %3472, %v662_v45   ;;  %v751_v45 = vrot.slane %v4223_v29, 4 }
  0xd8   : > { %709 = vperm.xlu1 %3471, %v704_v49   ;;  %3490 = vperm.xlu0 %3473, %v3489_v48   ;;  %v741_v48 = vrot.slane %v4174_v63, 1  ;;  %v743_v49 = vrot.slane %v4174_v63, 3 }
  0xd9   : > { %646 = vperm.xlu2 %3472, %v641_v50   ;;  %v746_v50 = vrot.slane %v4174_v63, 6 }
  0xda   : > { %v758_v1 = vperm.slane %v743_v49, 0 }
  0xdb   : > { %v761_v9 = vperm.slane %v746_v50, 0 }
  0xe0   : > { %674 = vperm.xlu1 %3471, %v669_v51  }
  0xe1   : > { %716 = vperm.xlu2 %3472, %v711_v52   ;;  %v795_v52 = vadd.f32 %v763_v41, %v4235_v42 }
  0xe8   : > { %730 = vperm.xlu1 %3471, %v725_v53   ;;  %v789_v53 = vadd.f32 %v757_v0, %v4183_v4 }
  0xe9   : > { %653 = vperm.xlu2 %3472, %v648_v54   ;;  %v797_v54 = vadd.f32 %v765_v43, %v4235_v42 }
  0xf0   : > { %681 = vperm.xlu1 %3471, %v676_v55   ;;  %v764_v55 = vperm.slane %v748_v44, 0 }
  0xf1   : > { %723 = vperm.xlu2 %3472, %v718_v56   ;;  %v767_v56 = vperm.slane %v751_v45, 0 }
  0xf3   : > { %v799_v23 = vadd.f32 %v767_v56, %v4235_v42 }
  0xf8   : > { %3480 = vperm.xlu1 %3471, %v3479_v61   ;;  %v770_v61 = vperm.slane %v754_v47, 0 }
  0xf9   : > { %3485 = vperm.xlu2 %3472, %v3484_v62   ;;  %v756_v62 = vperm.slane %v741_v48, 0 }
  0xfa   : > { %v802_v24 = vadd.f32 %v770_v61, %v4235_v42 }
 0x11b   : > { %v633_v10 = vpop.permute.xlu2 %632 }
 0x11c   : > { %v804_v12 = vmul.f32 %v4188_v5, %v633_v10 }
 0x11e   : > { %v820_v14 = vadd.f32 %v804_v12, %v787_v7 }
 0x120   : > { %v4211_v18 = vadd.f32 %v4201_v11, %v820_v14 }
 0x122   : > { %v3278_v21 = vmul.f32 -1.442695, %v4211_v18 }
 0x123   : > { %v661_v25 = vpop.permute.xlu2 %660 }
 0x124   : > { %3510 = vpow2.f32 %v3278_v21  ;;  %v808_v26 = vmul.f32 %v4188_v5, %v661_v25  ;;  %v4261_v25 = vadd.f32 %v756_v62, %v4183_v4 }
 0x126   : > { %v824_v27 = vadd.f32 %v808_v26, %v791_v22  ;;  %v796_v22 = vadd.f32 %v764_v55, %v4235_v42 }
 0x128   : > { %v4227_v30 = vadd.f32 %v4201_v11, %v824_v27 }
 0x12a   : > { %v3511_v35 = vpop.eup %3510  ;;  %v3282_v36 = vmul.f32 -1.442695, %v4227_v30 }
 0x12b   : > { %v901_v38 = vadd.f32 1.0, %v3511_v35  ;;  %v668_v39 = vpop.permute.xlu2 %667 }
 0x12c   : > { %3512 = vpow2.f32 %v3282_v36  ;;  %v809_v40 = vmul.f32 %v4188_v5, %v668_v39  ;;  %v4275_v36 = vadd.f32 %v758_v1, %v4183_v4  ;;  %v4300_v1 = vadd.f32 %v761_v9, %v4183_v4 }
 0x12d   : > { %3514 = vrcp.f32 %v901_v38  ;;  %vm922_vm3 = vweird.f32 %v901_v38  ;;  %v926_v14 = vand.u32 2147483647, %v901_v38  ;;  %v928_v15 = vand.u32 2147483648, %v901_v38 }
 0x12e   : > { %v825_v46 = vadd.f32 %v809_v40, %v792_v37  ;;  %v750_v37 = vrot.slane %v4223_v29, 3 }
 0x12f   : > { %v929_v35 = vor.u32 1.1754944e-38, %v928_v15  ;;  %vm927_vm7 = vcmp.eq.f32.partialorder %v926_v14, 8.507059e+37 }
 0x130   : > { %v4244_v51 = vadd.f32 %v4201_v11, %v825_v46 }
 0x132   : > { %v3513_v57 = vpop.eup %3512  ;;  %v3283_v58 = vmul.f32 -1.442695, %v4244_v51  ;;  %v689_v59 = vpop.permute.xlu1 %688 }
 0x133   : > { %v703_v60 = vpop.permute.xlu0 %702  ;;  %v3515_v2 = vpop.eup %3514  ;;  %v4250_v3 = vadd.f32 1.0, %v3513_v57  ;;  %v812_v6 = vmul.f32 %v4188_v5, %v689_v59 }
 0x134   : > { %v647_v7 = vpop.permute.xlu2 %646  ;;  %v814_v8 = vmul.f32 %v4188_v5, %v703_v60  ;;  %v918_v10 = vmul.f32 %v3515_v2, %v901_v38  ;;  %3516 = vpow2.f32 %v3283_v58  ;;  %vm923_vm4 = vweird.f32 %v3515_v2 }
 0x135   : > { %v806_v12 = vmul.f32 %v4188_v5, %v647_v7  ;;  %3518 = vrcp.f32 %v4250_v3  ;;  %v828_v20 = vadd.f32 %v812_v6, %v795_v52  ;;  %vm4270_vm5 = vmor %vm922_vm3, %vm923_vm4  ;;  %v752_v38 = vrot.slane %v4223_v29, 5 }
 0x136   : > { %v919_v16 = vsub.f32 1.0, %v918_v10  ;;  %v830_v21 = vadd.f32 %v814_v8, %v797_v54  ;;  %v986_v59 = vand.u32 2147483647, %v4250_v3  ;;  %v988_v61 = vand.u32 2147483648, %v4250_v3 }
 0x137   : > { %v4264_v27 = vadd.f32 %v4201_v11, %v828_v20  ;;  %v822_v28 = vadd.f32 %v806_v12, %v789_v53  ;;  %vm982_vm8 = vweird.f32 %v4250_v3  ;;  %v766_v8 = vperm.slane %v750_v37, 0 }
 0x138   : > { %v920_v26 = vmul.f32 %v3515_v2, %v919_v16  ;;  %v4267_v33 = vadd.f32 %v4201_v11, %v830_v21  ;;  %v753_v10 = vrot.slane %v4223_v29, 6  ;;  %vm4307_vm10 = vcmp.eq.f32.partialorder %v986_v59, 8.507059e+37 }
 0x139   : > { %v3286_v41 = vmul.f32 -1.442695, %v4264_v27  ;;  %v4289_v53 = vadd.f32 %v4201_v11, %v822_v28  ;;  %v768_v20 = vperm.slane %v752_v38, 0 }
 0x13a   : > { %v3517_v39 = vpop.eup %3516  ;;  %v921_v40 = vadd.f32 %v3515_v2, %v920_v26  ;;  %v696_v0 = vpop.permute.xlu1 %695  ;;  %v3288_v46 = vmul.f32 -1.442695, %v4267_v33 }
 0x13b   : > { %v738_v43 = vpop.permute.xlu0 %737  ;;  %v3519_v44 = vpop.eup %3518  ;;  %v4280_v45 = vadd.f32 1.0, %v3517_v39  ;;  %v813_v47 = vmul.f32 %v4188_v5, %v696_v0  ;;  %3520 = vpow2.f32 %v3286_v41  ;;  %v3280_v6 = vmul.f32 -1.442695, %v4289_v53 }
 0x13c   : > { %v717_v48 = vpop.permute.xlu2 %716  ;;  %v819_v49 = vmul.f32 %v4188_v5, %v738_v43  ;;  %v925_v50 = vsel %vm4270_vm5, %v3515_v2, %v921_v40  ;;  %v978_v52 = vmul.f32 %v3519_v44, %v4250_v3  ;;  %vm983_vm9 = vweird.f32 %v3519_v44 }
 0x13d   : > { %v930_v54 = vsel %vm927_vm7, %v929_v35, %v925_v50  ;;  %3522 = vrcp.f32 %v4280_v45  ;;  %v829_v55 = vadd.f32 %v813_v47, %v796_v22  ;;  %v816_v56 = vmul.f32 %v4188_v5, %v717_v48  ;;  %vm984_vm11 = vmor %vm982_vm8, %vm983_vm9 }
 0x13e   : > { %v1157_v57 = vmul.f32 %v930_v54, %v4211_v18  ;;  %v979_v58 = vsub.f32 1.0, %v978_v52  ;;  %v835_v60 = vadd.f32 %v819_v49, %v802_v24  ;;  %3524 = vpow2.f32 %v3288_v46 }
 0x13f   : > { %v4297_v62 = vadd.f32 %v4201_v11, %v829_v55  ;;  %v832_v7 = vadd.f32 %v816_v56, %v799_v23  ;;  %v989_v22 = vor.u32 1.1754944e-38, %v988_v61  ;;  %v1003_v39 = vand.u32 2147483648, %v4280_v45 }
 0x140   : > { %v980_v2 = vmul.f32 %v3519_v44, %v979_v58  ;;  %3294 = vmatmul.msk.f32.vlgmr.msrb.gmra.mxu0 %vm1182_vm6, %v1157_v57  ;;  %v4312_v9 = vadd.f32 %v4201_v11, %v835_v60  ;;  %v4333_v0 = vperm.slane %v753_v10, 0  ;;  %v4337_v43 = vperm.slane %v747_v13, 0 }
 0x141   : > { %v3287_v18 = vmul.f32 -1.442695, %v4297_v62  ;;  %v3521_v12 = vpop.eup %3520  ;;  %v4328_v3 = vadd.f32 %v4201_v11, %v832_v7  ;;  %v798_v47 = vadd.f32 %v766_v8, %v4235_v42  ;;  %vm997_vm12 = vweird.f32 %v4280_v45 }
 0x142   : > { %v981_v14 = vadd.f32 %v3519_v44, %v980_v2  ;;  %v640_v16 = vpop.permute.xlu1 %639  ;;  %v4318_v23 = vadd.f32 1.0, %v3521_v12  ;;  %v3293_v41 = vmul.f32 -1.442695, %v4312_v9  ;;  %v1001_v49 = vand.u32 2147483647, %v4280_v45 }
 0x143   : > { %v4314_v21 = vpop.eup %3522  ;;  %3526 = vpow2.f32 %v3287_v18  ;;  %v805_v29 = vmul.f32 %v4188_v5, %v640_v16  ;;  %v3290_v13 = vmul.f32 -1.442695, %v4328_v3 }
 0x144   : > { %v654_v24 = vpop.permute.xlu2 %653  ;;  %v985_v26 = vsel %vm984_vm11, %v3519_v44, %v981_v14  ;;  %3528 = vpow2.f32 %v3280_v6  ;;  %v993_v34 = vmul.f32 %v4314_v21, %v4280_v45  ;;  %v3525_v35 = vpop.eup %3524  ;;  %vm998_vm13 = vweird.f32 %v4314_v21 }
 0x145   : > { %v807_v28 = vmul.f32 %v4188_v5, %v654_v24  ;;  %v990_v37 = vsel %vm4307_vm10, %v989_v22, %v985_v26  ;;  %3530 = vrcp.f32 %v4318_v23  ;;  %v4339_v38 = vadd.f32 1.0, %v3525_v35  ;;  %vm999_vm14 = vmor %vm997_vm12, %vm998_vm13 }
 0x146   : > { %v1161_v40 = vmul.f32 %v990_v37, %v4227_v30  ;;  %v821_v44 = vadd.f32 %v805_v29, %v4261_v25  ;;  %v800_v30 = vadd.f32 %v768_v20, %v4235_v42  ;;  %v994_v48 = vsub.f32 1.0, %v993_v34 }
 0x147   : > { %v823_v46 = vadd.f32 %v807_v28, %v4275_v36  ;;  %v1004_v36 = vor.u32 1.1754944e-38, %v1003_v39  ;;  %3532 = vpow2.f32 %v3293_v41  ;;  %v1046_v6 = vand.u32 2147483647, %v4318_v23 }
 0x148   : > { %3298 = vmatmul.msk.f32.vlgmr.msrb.gmra.mxu1 %vm1182_vm6, %v1161_v40  ;;  %v4350_v50 = vadd.f32 %v4201_v11, %v821_v44  ;;  %v995_v56 = vmul.f32 %v4314_v21, %v994_v48  ;;  %3534 = vrcp.f32 %v4339_v38  ;;  %v1048_v7 = vand.u32 2147483648, %v4318_v23 }
 0x149   : > { %v3527_v63 = vpop.eup %3526  ;;  %v4353_v25 = vadd.f32 %v4201_v11, %v823_v46  ;;  %vm1002_vm15 = vcmp.eq.f32.partialorder %v1001_v49, 8.507059e+37  ;;  %vm1042_vm3 = vweird.f32 %v4318_v23  ;;  %vm4387_vm4 = vcmp.eq.f32.partialorder %v1046_v6, 8.507059e+37 }
 0x14a   : > { %v3529_v52 = vpop.eup %3528  ;;  %v4355_v54 = vadd.f32 1.0, %v3527_v63  ;;  %v710_v55 = vpop.permute.xlu1 %709  ;;  %v3279_v58 = vmul.f32 -1.442695, %v4350_v50  ;;  %v996_v10 = vadd.f32 %v4314_v21, %v995_v56  ;;  %v1049_v39 = vor.u32 1.1754944e-38, %v1048_v7 }
 0x14b   : > { %v3531_v57 = vpop.eup %3530  ;;  %v3281_v59 = vmul.f32 -1.442695, %v4353_v25  ;;  %v815_v60 = vmul.f32 %v4188_v5, %v710_v55  ;;  %v4369_v14 = vadd.f32 1.0, %v3529_v52  ;;  %v1076_v45 = vand.u32 2147483647, %v4339_v38 }
 0x14c   : > { %v724_v61 = vpop.permute.xlu2 %723  ;;  %v1038_v2 = vmul.f32 %v3531_v57, %v4318_v23  ;;  %3536 = vrcp.f32 %v4355_v54  ;;  %v1000_v20 = vsel %vm999_vm14, %v4314_v21, %v996_v10  ;;  %vm1043_vm2 = vweird.f32 %v3531_v57 }
 0x14d   : > { %v817_v18 = vmul.f32 %v4188_v5, %v724_v61  ;;  %3538 = vpow2.f32 %v3290_v13  ;;  %v831_v8 = vadd.f32 %v815_v60, %v798_v47  ;;  %v4379_v22 = vpop.eup %3532  ;;  %v1005_v26 = vsel %vm1002_vm15, %v1004_v36, %v1000_v20  ;;  %vm1044_vm5 = vmor %vm1042_vm3, %vm1043_vm2 }
 0x14e   : > { %v1039_v12 = vsub.f32 1.0, %v1038_v2  ;;  %3540 = vpow2.f32 %v3279_v58  ;;  %v4384_v28 = vpop.eup %3534  ;;  %v1162_v21 = vmul.f32 %v1005_v26, %v4244_v51  ;;  %v1061_v51 = vand.u32 2147483647, %v4355_v54 }
 0x14f   : > { %v833_v15 = vadd.f32 %v817_v18, %v800_v30  ;;  %3542 = vpow2.f32 %v3281_v59  ;;  %v4376_v16 = vadd.f32 %v4201_v11, %v831_v8  ;;  %v1063_v48 = vand.u32 2147483648, %v4355_v54 }
 0x150   : > { %v1040_v29 = vmul.f32 %v3531_v57, %v1039_v12  ;;  %3544 = vrcp.f32 %v4369_v14  ;;  %3299 = vmatmul.msk.f32.gmra.mxu1 %vm1182_vm6, %v1162_v21  ;;  %v1068_v49 = vmul.f32 %v4384_v28, %v4339_v38  ;;  %v4415_v59 = vadd.f32 %v4337_v43, %v4183_v4 }
 0x151   : > { %v4382_v24 = vadd.f32 %v4201_v11, %v833_v15  ;;  %v3289_v34 = vmul.f32 -1.442695, %v4376_v16  ;;  %vm1057_vm8 = vweird.f32 %v4355_v54  ;;  %vm4427_vm9 = vcmp.eq.f32.partialorder %v1061_v51, 8.507059e+37 }
 0x152   : > { %v3537_v35 = vpop.eup %3536  ;;  %v1041_v37 = vadd.f32 %v3531_v57, %v1040_v29  ;;  %v675_v41 = vpop.permute.xlu1 %674  ;;  %v1069_v4 = vsub.f32 1.0, %v1068_v49  ;;  %v1064_v6 = vor.u32 1.1754944e-38, %v1063_v48  ;;  %vm1073_vm11 = vweird.f32 %v4384_v28 }
 0x153   : > { %v3291_v40 = vmul.f32 -1.442695, %v4382_v24  ;;  %v3539_v44 = vpop.eup %3538  ;;  %3546 = vpow2.f32 %v3289_v34  ;;  %v810_v23 = vmul.f32 %v4188_v5, %v675_v41  ;;  %v1053_v46 = vmul.f32 %v3537_v35, %v4355_v54 }
 0x154   : > { %v3541_v47 = vpop.eup %3540  ;;  %v1045_v30 = vsel %vm1044_vm5, %v3531_v57, %v1041_v37  ;;  %v801_v57 = vadd.f32 %v4333_v0, %v4235_v42  ;;  %vm1058_vm7 = vweird.f32 %v3537_v35  ;;  %v4423_v2 = vadd.f32 1.0, %v3539_v44 }
 0x155   : > { %3548 = vpow2.f32 %v3291_v40  ;;  %v3543_v63 = vpop.eup %3542  ;;  %v1050_v13 = vsel %vm4387_vm4, %v1049_v39, %v1045_v30  ;;  %v4405_v36 = vadd.f32 1.0, %v3541_v47  ;;  %v826_v52 = vadd.f32 %v810_v23, %v4300_v1  ;;  %vm1059_vm10 = vmor %vm1057_vm8, %vm1058_vm7 }
 0x156   : > { %v1054_v55 = vsub.f32 1.0, %v1053_v46  ;;  %v1165_v56 = vmul.f32 %v1050_v13, %v4264_v27  ;;  %v4409_v58 = vadd.f32 1.0, %v3543_v63  ;;  %v4421_v1 = vpop.eup %3544  ;;  %v1070_v12 = vmul.f32 %v4384_v28, %v1069_v4 }
 0x157   : > { %3550 = vrcp.f32 %v4405_v36  ;;  %v4419_v60 = vadd.f32 %v4201_v11, %v826_v52  ;;  %v941_v54 = vand.u32 2147483647, %v4405_v36  ;;  %v943_v10 = vand.u32 2147483648, %v4405_v36 }
 0x158   : > { %v1055_v61 = vmul.f32 %v3537_v35, %v1054_v55  ;;  %3302 = vmatmul.msk.f32.vlgmr.msrb.gmra.mxu2 %vm1182_vm6, %v1165_v56  ;;  %3552 = vrcp.f32 %v4409_v58  ;;  %v1071_v26 = vadd.f32 %v4384_v28, %v1070_v12  ;;  %v1078_v40 = vand.u32 2147483648, %v4339_v38 }
 0x159   : > { %v3547_v27 = vpop.eup %3546  ;;  %v3284_v0 = vmul.f32 -1.442695, %v4419_v60  ;;  %vm1072_vm12 = vweird.f32 %v4339_v38  ;;  %v948_v44 = vmul.f32 %v4421_v1, %v4369_v14  ;;  %vm937_vm13 = vweird.f32 %v4405_v36 }
 0x15a   : > { %v1056_v43 = vadd.f32 %v3537_v35, %v1055_v61  ;;  %v4433_v7 = vadd.f32 1.0, %v3547_v27  ;;  %v731_v8 = vpop.permute.xlu1 %730  ;;  %vm4464_vm14 = vcmp.eq.f32.partialorder %v941_v54, 8.507059e+37  ;;  %vm4470_vm15 = vmor %vm1072_vm12, %vm1073_vm11  ;;  %v944_v51 = vor.u32 1.1754944e-38, %v943_v10 }
 0x15b   : > { %v3549_v18 = vpop.eup %3548  ;;  %3554 = vpow2.f32 %v3284_v0  ;;  %v818_v15 = vmul.f32 %v4188_v5, %v731_v8  ;;  %v1075_v47 = vsel %vm4470_vm15, %v4384_v28, %v1071_v26  ;;  %v949_v30 = vsub.f32 1.0, %v948_v44 }
 0x15c   : > { %v1060_v20 = vsel %vm1059_vm10, %v3537_v35, %v1056_v43  ;;  %3556 = vrcp.f32 %v4433_v7  ;;  %v4446_v21 = vadd.f32 1.0, %v3549_v18  ;;  %v4451_v35 = vadd.f32 1.0, %v4379_v22 }
 0x15d   : > { %v1065_v29 = vsel %vm4427_vm9, %v1064_v6, %v1060_v20  ;;  %v3551_v34 = vpop.eup %3550  ;;  %v834_v37 = vadd.f32 %v818_v15, %v801_v57  ;;  %3558 = vrcp.f32 %v4423_v2  ;;  %vm1077_vm2 = vcmp.eq.f32.partialorder %v1076_v45, 8.507059e+37 }
 0x15e   : > { %v1166_v39 = vmul.f32 %v1065_v29, %v4297_v62  ;;  %v933_v41 = vmul.f32 %v3551_v34, %v4405_v36  ;;  %v4457_v23 = vpop.eup %3552  ;;  %3560 = vrcp.f32 %v4446_v21  ;;  %v1079_v63 = vor.u32 1.1754944e-38, %v1078_v40 }
 0x15f   : > { %v4461_v46 = vadd.f32 %v4201_v11, %v834_v37  ;;  %vm938_vm3 = vweird.f32 %v3551_v34  ;;  %v950_v57 = vmul.f32 %v4421_v1, %v949_v30  ;;  %vm953_vm4 = vweird.f32 %v4421_v1 }
 0x160   : > { %3303 = vmatmul.msk.f32.gmra.mxu2 %vm1182_vm6, %v1166_v39  ;;  %v934_v22 = vsub.f32 1.0, %v933_v41  ;;  %v1080_v61 = vsel %vm1077_vm2, %v1079_v63, %v1075_v47  ;;  %vm939_vm5 = vmor %vm937_vm13, %vm938_vm3  ;;  %vm952_vm7 = vweird.f32 %v4369_v14  ;;  %v958_v6 = vand.u32 2147483648, %v4369_v14 }
 0x161   : > { %v3555_v48 = vpop.eup %3554  ;;  %v3292_v49 = vmul.f32 -1.442695, %v4461_v46  ;;  %v951_v4 = vadd.f32 %v4421_v1, %v950_v57  ;;  %v1167_v8 = vmul.f32 %v1080_v61, %v4267_v33  ;;  %v963_v10 = vmul.f32 %v4457_v23, %v4409_v58  ;;  %vm4511_vm8 = vmor %vm952_vm7, %vm953_vm4 }
 0x162   : > { %v4480_v13 = vpop.eup %3556  ;;  %v4482_v52 = vadd.f32 1.0, %v3555_v48  ;;  %v682_v55 = vpop.permute.xlu1 %681  ;;  %v935_v56 = vmul.f32 %v3551_v34, %v934_v22  ;;  %v1091_v33 = vand.u32 2147483647, %v4433_v7  ;;  %v959_v37 = vor.u32 1.1754944e-38, %v958_v6 }
 0x163   : > { %3562 = vpow2.f32 %v3292_v49  ;;  %v811_v28 = vmul.f32 %v4188_v5, %v682_v55  ;;  %v1083_v27 = vmul.f32 %v4480_v13, %v4433_v7  ;;  %v4491_v0 = vpop.eup %3558  ;;  %v956_v5 = vand.u32 2147483647, %v4369_v14 }
 0x164   : > { %3564 = vrcp.f32 %v4482_v52  ;;  %v936_v42 = vadd.f32 %v3551_v34, %v935_v56  ;;  %v4502_v12 = vpop.eup %3560  ;;  %v1093_v14 = vand.u32 2147483648, %v4433_v7  ;;  %v964_v26 = vsub.f32 1.0, %v963_v10 }
 0x165   : > { %v827_v43 = vadd.f32 %v811_v28, %v4415_v59  ;;  %v1084_v54 = vsub.f32 1.0, %v1083_v27  ;;  %vm957_vm9 = vcmp.eq.f32.partialorder %v956_v5, 8.507059e+37  ;;  %vm1088_vm10 = vweird.f32 %v4480_v13 }
 0x166   : > { %v940_v18 = vsel %vm939_vm5, %v3551_v34, %v936_v42  ;;  %v965_v41 = vmul.f32 %v4457_v23, %v964_v26  ;;  %vm1087_vm11 = vweird.f32 %v4433_v7  ;;  %vm968_vm12 = vweird.f32 %v4457_v23 }
 0x167   : > { %v4505_v59 = vadd.f32 %v4201_v11, %v827_v43  ;;  %v945_v36 = vsel %vm4464_vm14, %v944_v51, %v940_v18  ;;  %v955_v11 = vsel %vm4511_vm8, %v4421_v1, %v951_v4  ;;  %v1085_v29 = vmul.f32 %v4480_v13, %v1084_v54  ;;  %vm1089_vm13 = vmor %vm1087_vm11, %vm1088_vm10 }
 0x168   : > { %v1158_v20 = vmul.f32 %v945_v36, %v4350_v50  ;;  %3304 = vmatmul.msk.f32.gmra.mxu2 %vm1182_vm6, %v1167_v8  ;;  %v971_v1 = vand.u32 2147483647, %v4409_v58  ;;  %v960_v44 = vsel %vm957_vm9, %v959_v37, %v955_v11  ;;  %vm1092_vm14 = vcmp.eq.f32.partialorder %v1091_v33, 8.507059e+37 }
 0x169   : > { %v3563_v45 = vpop.eup %3562  ;;  %v3285_v34 = vmul.f32 -1.442695, %v4505_v59  ;;  %v1086_v50 = vadd.f32 %v4480_v13, %v1085_v29  ;;  %v1094_v62 = vor.u32 1.1754944e-38, %v1093_v14  ;;  %v973_v38 = vand.u32 2147483648, %v4409_v58 }
 0x16a   : > { %v3565_v39 = vpop.eup %3564  ;;  %v4525_v40 = vadd.f32 1.0, %v3563_v45  ;;  %3295 = vmatmul.msk.f32.gmra.mxu0 %vm1182_vm6, %v1158_v20  ;;  %v966_v51 = vadd.f32 %v4457_v23, %v965_v41  ;;  %vm967_vm15 = vweird.f32 %v4409_v58  ;;  %v1159_v7 = vmul.f32 %v960_v44, %v4289_v53 }
 0x16b   : > { %3566 = vpow2.f32 %v3285_v34  ;;  %v1090_v22 = vsel %vm1089_vm13, %v4480_v13, %v1086_v50  ;;  %v1008_v47 = vmul.f32 %v3565_v39, %v4482_v52  ;;  %vm4541_vm2 = vmor %vm967_vm15, %vm968_vm12  ;;  %vm4545_vm3 = vcmp.eq.f32.partialorder %v971_v1, 8.507059e+37 }
 0x16c   : > { %3568 = vrcp.f32 %v4525_v40  ;;  %v1095_v30 = vsel %vm1092_vm14, %v1094_v62, %v1090_v22  ;;  %v1136_v63 = vand.u32 2147483647, %v4525_v40  ;;  %v970_v58 = vsel %vm4541_vm2, %v4457_v23, %v966_v51 }
 0x16d   : > { %3570 = vrcp.f32 %v4451_v35  ;;  %v1168_v13 = vmul.f32 %v1095_v30, %v4376_v16  ;;  %v1009_v55 = vsub.f32 1.0, %v1008_v47  ;;  %v1138_v53 = vand.u32 2147483648, %v4525_v40 }
 0x16e   : > { %v974_v56 = vor.u32 1.1754944e-38, %v973_v38  ;;  %v1018_v57 = vand.u32 2147483648, %v4482_v52  ;;  %v1098_v28 = vmul.f32 %v4491_v0, %v4423_v2  ;;  %vm1132_vm4 = vweird.f32 %v4525_v40 }
 0x16f   : > { %v1010_v42 = vmul.f32 %v3565_v39, %v1009_v55  ;;  %vm1012_vm5 = vweird.f32 %v4482_v52  ;;  %vm1013_vm7 = vweird.f32 %v3565_v39  ;;  %v1016_v16 = vand.u32 2147483647, %v4482_v52 }
 0x170   : > { %3305 = vmatmul.msk.f32.gmra.mxu2 %vm1182_vm6, %v1168_v13  ;;  %v975_v27 = vsel %vm4545_vm3, %v974_v56, %v970_v58  ;;  %v1099_v43 = vsub.f32 1.0, %v1098_v28  ;;  %vm1103_vm8 = vweird.f32 %v4491_v0  ;;  %v1019_v18 = vor.u32 1.1754944e-38, %v1018_v57  ;;  %vm1014_vm9 = vmor %vm1012_vm5, %vm1013_vm7  ;;  %v3746_v58 = vld [vmem:[%s4115_s22 + $0x8] sm:$0xff] }
 0x171   : > { %v3567_v61 = vpop.eup %3566  ;;  %v1011_v6 = vadd.f32 %v3565_v39, %v1010_v42  ;;  %v1106_v8 = vand.u32 2147483647, %v4423_v2  ;;  %v1108_v36 = vand.u32 2147483648, %v4423_v2  ;;  %v1113_v15 = vmul.f32 %v4502_v12, %v4446_v21 }
 0x172   : > { %v3569_v23 = vpop.eup %3568  ;;  %v4562_v4 = vadd.f32 1.0, %v3567_v61  ;;  %3296 = vmatmul.msk.f32.gmra.mxu0 %vm1182_vm6, %v1159_v7  ;;  %v1100_v10 = vmul.f32 %v4491_v0, %v1099_v43  ;;  %v1160_v14 = vmul.f32 %v975_v27, %v4353_v25  ;;  %vm1017_vm10 = vcmp.eq.f32.partialorder %v1016_v16, 8.507059e+37 }
 0x173   : > { %v1128_v5 = vmul.f32 %v3569_v23, %v4525_v40  ;;  %v4570_v54 = vpop.eup %3570  ;;  %v1015_v20 = vsel %vm1014_vm9, %v3565_v39, %v1011_v6  ;;  %vm1102_vm11 = vweird.f32 %v4423_v2  ;;  %v1114_v26 = vsub.f32 1.0, %v1113_v15 }
 0x174   : > { %3572 = vrcp.f32 %v4562_v4  ;;  %v1020_v11 = vsel %vm1017_vm10, %v1019_v18, %v1015_v20  ;;  %v1101_v29 = vadd.f32 %v4491_v0, %v1100_v10  ;;  %vm1133_vm12 = vweird.f32 %v3569_v23  ;;  %vm1104_vm13 = vmor %vm1102_vm11, %vm1103_vm8 }
 0x175   : > { %v1129_v33 = vsub.f32 1.0, %v1128_v5  ;;  %v1163_v45 = vmul.f32 %v1020_v11, %v4419_v60  ;;  %v1109_v34 = vor.u32 1.1754944e-38, %v1108_v36  ;;  %vm1107_vm14 = vcmp.eq.f32.partialorder %v1106_v8, 8.507059e+37  ;;  %vm1134_vm2 = vmor %vm1132_vm4, %vm1133_vm12 }
 0x176   : > { %v1105_v37 = vsel %vm1104_vm13, %v4491_v0, %v1101_v29  ;;  %v1115_v25 = vmul.f32 %v4502_v12, %v1114_v26  ;;  %vm1118_vm15 = vweird.f32 %v4502_v12  ;;  %v1139_v50 = vor.u32 1.1754944e-38, %v1138_v53 }
 0x177   : > { %v1130_v52 = vmul.f32 %v3569_v23, %v1129_v33  ;;  %3300 = vmatmul.msk.f32.gmra.mxu1 %vm1182_vm6, %v1163_v45  ;;  %v1110_v2 = vsel %vm1107_vm14, %v1109_v34, %v1105_v37  ;;  %v1123_v41 = vand.u32 2147483648, %v4446_v21  ;;  %vm1117_vm3 = vweird.f32 %v4446_v21  ;;  %v4633_v37 = vld [vmem:[%s5715_s8 + $0x4] ss:$0 sm:$0xff] }
 0x178   : > { %v1169_v60 = vmul.f32 %v1110_v2, %v4328_v3  ;;  %v1116_v0 = vadd.f32 %v4502_v12, %v1115_v25  ;;  %v1121_v44 = vand.u32 2147483647, %v4446_v21  ;;  %vm1137_vm5 = vcmp.eq.f32.partialorder %v1136_v63, 8.507059e+37  ;;  %vm1119_vm7 = vmor %vm1117_vm3, %vm1118_vm15  ;;  %v4638_v25 = vld [vmem:[%s5715_s8 + $0x3] ss:$0 sm:$0xff] }
 0x179   : > { %v1131_v39 = vadd.f32 %v3569_v23, %v1130_v52  ;;  %v1143_v3 = vmul.f32 %v4570_v54, %v4451_v35  ;;  %v1124_v47 = vor.u32 1.1754944e-38, %v1123_v41  ;;  %v1031_v7 = vand.u32 2147483647, %v4562_v4 }
 0x17a   : > { %v3573_v1 = vpop.eup %3572  ;;  %3297 = vmatmul.msk.f32.gmra.mxu0 %vm1182_vm6, %v1160_v14  ;;  %3306 = vmatmul.msk.f32.gmra.mxu2 %vm1182_vm6, %v1169_v60  ;;  %v1120_v40 = vsel %vm1119_vm7, %v4502_v12, %v1116_v0  ;;  %vm1122_vm4 = vcmp.eq.f32.partialorder %v1121_v44, 8.507059e+37  ;;  %v1033_v30 = vand.u32 2147483648, %v4562_v4  ;;  %v1153_v12 = vand.u32 2147483648, %v4451_v35 }
 0x17b   : > { %v1135_v62 = vsel %vm1134_vm2, %v3569_v23, %v1131_v39  ;;  %v1023_v38 = vmul.f32 %v3573_v1, %v4562_v4  ;;  %v1144_v48 = vsub.f32 1.0, %v1143_v3  ;;  %v1125_v49 = vsel %vm1122_vm4, %v1124_v47, %v1120_v40 }
 0x17c   : > { %v1140_v22 = vsel %vm1137_vm5, %v1139_v50, %v1135_v62  ;;  %vm1028_vm8 = vweird.f32 %v3573_v1  ;;  %vm1148_vm9 = vweird.f32 %v4570_v54  ;;  %vm1027_vm10 = vweird.f32 %v4562_v4 }
 0x17d   : > { %v1171_v51 = vmul.f32 %v1140_v22, %v4461_v46  ;;  %v1024_v21 = vsub.f32 1.0, %v1023_v38  ;;  %v1145_v13 = vmul.f32 %v4570_v54, %v1144_v48  ;;  %v1151_v46 = vand.u32 2147483647, %v4451_v35  ;;  %vm1029_vm11 = vmor %vm1027_vm10, %vm1028_vm8 }
 0x17e   : > { %v1170_v53 = vmul.f32 %v1125_v49, %v4382_v24  ;;  %v1034_v56 = vor.u32 1.1754944e-38, %v1033_v30  ;;  %vm1147_vm12 = vweird.f32 %v4451_v35  ;;  %vm1032_vm13 = vcmp.eq.f32.partialorder %v1031_v7, 8.507059e+37  ;;  %v4626_v35 = vld [vmem:[%s5715_s8 + $0x2] ss:$0 sm:$0xff] }
 0x17f   : > { %3308 = vmatmul.msk.f32.vlgmr.msrb.gmra.mxu3 %vm1182_vm6, %v1171_v51  ;;  %v1025_v63 = vmul.f32 %v3573_v1, %v1024_v21  ;;  %v1146_v57 = vadd.f32 %v4570_v54, %v1145_v13  ;;  %vm1149_vm14 = vmor %vm1147_vm12, %vm1148_vm9  ;;  %v1154_v61 = vor.u32 1.1754944e-38, %v1153_v12  ;;  %vm1152_vm15 = vcmp.eq.f32.partialorder %v1151_v46, 8.507059e+37 }
 0x180   : > { %2296 = vmatpush.msrb.mxu3 %v3746_v58 }
 0x181   : > { %v1026_v55 = vadd.f32 %v3573_v1, %v1025_v63  ;;  %v1150_v16 = vsel %vm1149_vm14, %v4570_v54, %v1146_v57 }
 0x182   : > { %3307 = vmatmul.msk.f32.gmra.mxu2 %vm1182_vm6, %v1170_v53  ;;  %v1155_v4 = vsel %vm1152_vm15, %v1154_v61, %v1150_v16 }
 0x183   : > { %v1030_v28 = vsel %vm1029_vm11, %v3573_v1, %v1026_v55  ;;  %v1172_v24 = vmul.f32 %v1155_v4, %v4312_v9 }
 0x184   : > { %v1035_v42 = vsel %vm1032_vm13, %v1034_v56, %v1030_v28 }
 0x185   : > { %v1164_v23 = vmul.f32 %v1035_v42, %v4505_v59 }
 0x187   : > { %3301 = vmatmul.msk.f32.gmra.mxu1 %vm1182_vm6, %v1164_v23  ;;  %3309 = vmatmul.msk.f32.gmra.mxu3 %vm1182_vm6, %v1172_v24 }
 0x1bd   : > { %v1248_v27 = vpop.f32.mrf.mxu0 }
 0x1be   : > { %v1249_v43 = vadd.f32 %v4626_v35, %v1248_v27 }
 0x1c0   : > { %v3310_v5 = vmul.f32 -1.442695, %v1249_v43 }
 0x1c2   : > { %3574 = vpow2.f32 %v3310_v5 }
 0x1c5   : > { %v1260_v6 = vpop.f32.mrf.mxu1 }
 0x1c6   : > { %v1261_v59 = vadd.f32 %v4626_v35, %v1260_v6 }
 0x1c8   : > { %v3575_v18 = vpop.eup %3574  ;;  %v3314_v8 = vmul.f32 -1.442695, %v1261_v59 }
 0x1c9   : > { %v1344_v9 = vadd.f32 1.0, %v3575_v18 }
 0x1ca   : > { %3576 = vpow2.f32 %v3314_v8 }
 0x1cb   : > { %3578 = vrcp.f32 %v1344_v9  ;;  %v1371_v14 = vand.u32 2147483648, %v1344_v9  ;;  %v1369_v11 = vand.u32 2147483647, %v1344_v9  ;;  %vm1365_vm3 = vweird.f32 %v1344_v9 }
 0x1cd   : > { %v1372_v52 = vor.u32 1.1754944e-38, %v1371_v14  ;;  %vm1370_vm7 = vcmp.eq.f32.partialorder %v1369_v11, 8.507059e+37  ;;  %v1263_v40 = vpop.f32.mrf.mxu1 }
 0x1ce   : > { %v4653_v30 = vadd.f32 %v4626_v35, %v1263_v40 }
 0x1d0   : > { %v3577_v54 = vpop.eup %3576  ;;  %v3315_v46 = vmul.f32 -1.442695, %v4653_v30 }
 0x1d1   : > { %v3579_v10 = vpop.eup %3578  ;;  %v1348_v36 = vadd.f32 1.0, %v3577_v54 }
 0x1d2   : > { %v1361_v15 = vmul.f32 %v3579_v10, %v1344_v9  ;;  %vm1366_vm2 = vweird.f32 %v3579_v10 }
 0x1d3   : > { %3580 = vrcp.f32 %v1348_v36  ;;  %vm1367_vm5 = vmor %vm1365_vm3, %vm1366_vm2  ;;  %v1429_v60 = vand.u32 2147483647, %v1348_v36  ;;  %v1431_v0 = vand.u32 2147483648, %v1348_v36  ;;  %vm1425_vm8 = vweird.f32 %v1348_v36 }
 0x1d4   : > { %v1362_v33 = vsub.f32 1.0, %v1361_v15 }
 0x1d5   : > { %v1432_v21 = vor.u32 1.1754944e-38, %v1431_v0  ;;  %vm1430_vm10 = vcmp.eq.f32.partialorder %v1429_v60, 8.507059e+37 }
 0x1d6   : > { %v1363_v20 = vmul.f32 %v3579_v10, %v1362_v33 }
 0x1d8   : > { %v1364_v29 = vadd.f32 %v3579_v10, %v1363_v20 }
 0x1d9   : > { %v3581_v26 = vpop.eup %3580 }
 0x1da   : > { %v1368_v45 = vsel %vm1367_vm5, %v3579_v10, %v1364_v29  ;;  %v1421_v34 = vmul.f32 %v3581_v26, %v1348_v36  ;;  %vm1426_vm4 = vweird.f32 %v3581_v26 }
 0x1db   : > { %v1373_v39 = vsel %vm1370_vm7, %v1372_v52, %v1368_v45  ;;  %v1272_v50 = vpop.f32.mrf.mxu2  ;;  %vm1427_vm9 = vmor %vm1425_vm8, %vm1426_vm4 }
 0x1dc   : > { %v4640_v2 = vmul.f32 %v1373_v39, %v1249_v43  ;;  %v1422_v41 = vsub.f32 1.0, %v1421_v34  ;;  %v4643_v1 = vadd.f32 %v4626_v35, %v1272_v50 }
 0x1de   : > { %v1423_v44 = vmul.f32 %v3581_v26, %v1422_v41  ;;  %v3318_v62 = vmul.f32 -1.442695, %v4643_v1  ;;  %v1702_v38 = vmul.f32 %v4633_v37, %v4640_v2  ;;  %v1617_v22 = vmul.f32 %v4638_v25, %v4640_v2 }
 0x1e0   : > { %v1424_v3 = vadd.f32 %v3581_v26, %v1423_v44  ;;  %3582 = vpow2.f32 %v3318_v62  ;;  %v1718_v51 = vsel %vm1182_vm6, %v1702_v38, 0.0  ;;  %v1633_v47 = vsel %vm1182_vm6, %v1617_v22, 0.0 }
 0x1e1   : > { %1719 = vadd.xlane.f32.xlu2 %v1718_v51  ;;  %1634 = vadd.xlane.f32.xlu1 %v1633_v47 }
 0x1e2   : > { %v1428_v7 = vsel %vm1427_vm9, %v3581_v26, %v1424_v3 }
 0x1e3   : > { %v1433_v48 = vsel %vm1430_vm10, %v1432_v21, %v1428_v7  ;;  %v1275_v49 = vpop.f32.mrf.mxu2 }
 0x1e4   : > { %v4655_v63 = vmul.f32 %v1433_v48, %v1261_v59  ;;  %v4658_v12 = vadd.f32 %v4626_v35, %v1275_v49 }
 0x1e6   : > { %v3583_v13 = vpop.eup %3582  ;;  %v1706_v58 = vmul.f32 %v4633_v37, %v4655_v63  ;;  %v3319_v53 = vmul.f32 -1.442695, %v4658_v12  ;;  %v1621_v57 = vmul.f32 %v4638_v25, %v4655_v63 }
 0x1e7   : > { %v1352_v55 = vadd.f32 1.0, %v3583_v13  ;;  %v1251_v56 = vpop.f32.mrf.mxu0 }
 0x1e8   : > { %v4667_v28 = vadd.f32 %v4626_v35, %v1251_v56  ;;  %v1730_v61 = vsel %vm1182_vm6, %v1706_v58, 0.0  ;;  %v1645_v16 = vsel %vm1182_vm6, %v1621_v57, 0.0 }
 0x1e9   : > { %3584 = vrcp.f32 %v1352_v55  ;;  %1731 = vadd.xlane.f32.xlu0 %v1730_v61  ;;  %1646 = vadd.xlane.f32.xlu1 %v1645_v16  ;;  %v1491_v14 = vand.u32 2147483648, %v1352_v55  ;;  %vm1485_vm12 = vweird.f32 %v1352_v55  ;;  %v1489_v20 = vand.u32 2147483647, %v1352_v55 }
 0x1ea   : > { %3586 = vpow2.f32 %v3315_v46  ;;  %v3311_v42 = vmul.f32 -1.442695, %v4667_v28 }
 0x1eb   : > { %3588 = vpow2.f32 %v3319_v53  ;;  %v1278_v23 = vpop.f32.mrf.mxu2  ;;  %v1492_v45 = vor.u32 1.1754944e-38, %v1491_v14  ;;  %vm1490_vm14 = vcmp.eq.f32.partialorder %v1489_v20, 8.507059e+37 }
 0x1ec   : > { %3590 = vpow2.f32 %v3311_v42  ;;  %v4688_v11 = vadd.f32 %v4626_v35, %v1278_v23 }
 0x1ee   : > { %v3320_v44 = vmul.f32 -1.442695, %v4688_v11 }
 0x1ef   : > { %v3585_v4 = vpop.eup %3584  ;;  %v1254_v24 = vpop.f32.mrf.mxu0 }
 0x1f0   : > { %v3587_v27 = vpop.eup %3586  ;;  %v1481_v43 = vmul.f32 %v3585_v4, %v1352_v55  ;;  %v4673_v18 = vadd.f32 %v4626_v35, %v1254_v24  ;;  %vm1486_vm11 = vweird.f32 %v3585_v4 }
 0x1f1   : > { %v3589_v5 = vpop.eup %3588  ;;  %v4675_v8 = vadd.f32 1.0, %v3587_v27  ;;  %vm1487_vm13 = vmor %vm1485_vm12, %vm1486_vm11 }
 0x1f2   : > { %v3591_v6 = vpop.eup %3590  ;;  %v1482_v59 = vsub.f32 1.0, %v1481_v43  ;;  %v4679_v10 = vadd.f32 1.0, %v3589_v5  ;;  %v3312_v36 = vmul.f32 -1.442695, %v4673_v18 }
 0x1f3   : > { %v4677_v9 = vadd.f32 1.0, %v3591_v6  ;;  %v4684_v33 = vpop.f32.mrf.mxu2  ;;  %vm1440_vm3 = vweird.f32 %v4675_v8  ;;  %v1444_v27 = vand.u32 2147483647, %v4675_v8 }
 0x1f4   : > { %v1483_v54 = vmul.f32 %v3585_v4, %v1482_v59  ;;  %v1266_v41 = vpop.f32.mrf.mxu1  ;;  %vm1500_vm10 = vweird.f32 %v4679_v10 }
 0x1f5   : > { %3592 = vrcp.f32 %v4677_v9  ;;  %v4705_v22 = vadd.f32 %v4626_v35, %v1266_v41  ;;  %vm1380_vm2 = vweird.f32 %v4677_v9  ;;  %v1386_v56 = vand.u32 2147483648, %v4677_v9 }
 0x1f6   : > { %3594 = vpow2.f32 %v3312_v36  ;;  %v1484_v15 = vadd.f32 %v3585_v4, %v1483_v54  ;;  %v1384_v61 = vand.u32 2147483647, %v4677_v9  ;;  %vm1445_vm12 = vcmp.eq.f32.partialorder %v1444_v27, 8.507059e+37 }
 0x1f7   : > { %3596 = vrcp.f32 %v4675_v8  ;;  %v3316_v7 = vmul.f32 -1.442695, %v4705_v22 }
 0x1f8   : > { %3598 = vrcp.f32 %v4679_v10  ;;  %v1488_v26 = vsel %vm1487_vm13, %v3585_v4, %v1484_v15  ;;  %v1446_v4 = vand.u32 2147483648, %v4675_v8  ;;  %vm1385_vm8 = vcmp.eq.f32.partialorder %v1384_v61, 8.507059e+37 }
 0x1f9   : > { %v1493_v0 = vsel %vm1490_vm14, %v1492_v45, %v1488_v26 }
 0x1fa   : > { %v4708_v40 = vmul.f32 %v1493_v0, %v4643_v1  ;;  %v1447_v26 = vor.u32 1.1754944e-38, %v1446_v4 }
 0x1fb   : > { %v4690_v29 = vpop.eup %3592 }
 0x1fc   : > { %v3595_v52 = vpop.eup %3594  ;;  %v1376_v34 = vmul.f32 %v4690_v29, %v4677_v9  ;;  %v1625_v49 = vmul.f32 %v4638_v25, %v4708_v40  ;;  %vm1381_vm15 = vweird.f32 %v4690_v29  ;;  %v1710_v58 = vmul.f32 %v4633_v37, %v4708_v40 }
 0x1fd   : > { %v4694_v39 = vpop.eup %3596  ;;  %v4696_v50 = vadd.f32 1.0, %v3595_v52  ;;  %v4712_v51 = vpop.f32.mrf.mxu2  ;;  %vm4737_vm5 = vmor %vm1380_vm2, %vm1381_vm15  ;;  %v1387_v9 = vor.u32 1.1754944e-38, %v1386_v56  ;;  %v1506_v52 = vand.u32 2147483648, %v4679_v10 }
 0x1fe   : > { %v4698_v60 = vpop.eup %3598  ;;  %v1377_v62 = vsub.f32 1.0, %v1376_v34  ;;  %v1436_v38 = vmul.f32 %v4694_v39, %v4675_v8  ;;  %v1657_v46 = vsel %vm1182_vm6, %v1625_v49, 0.0  ;;  %v1742_v16 = vsel %vm1182_vm6, %v1710_v58, 0.0 }
 0x1ff   : > { %3600 = vrcp.f32 %v4696_v50  ;;  %v1496_v3 = vmul.f32 %v4698_v60, %v4679_v10  ;;  %1658 = vadd.xlane.f32.xlu2 %v1657_v46  ;;  %1743 = vadd.xlane.f32.xlu1 %v1742_v16  ;;  %vm1441_vm7 = vweird.f32 %v4694_v39  ;;  %vm1501_vm4 = vweird.f32 %v4698_v60 }
 0x200   : > { %3602 = vpow2.f32 %v3320_v44  ;;  %v1378_v47 = vmul.f32 %v4690_v29, %v1377_v62  ;;  %v1437_v21 = vsub.f32 1.0, %v1436_v38  ;;  %vm4764_vm9 = vmor %vm1440_vm3, %vm1441_vm7  ;;  %v1504_v44 = vand.u32 2147483647, %v4679_v10 }
 0x201   : > { %v1497_v48 = vsub.f32 1.0, %v1496_v3  ;;  %3604 = vpow2.f32 %v3316_v7  ;;  %vm1502_vm11 = vmor %vm1500_vm10, %vm1501_vm4  ;;  %vm1395_vm15 = vweird.f32 %v4696_v50  ;;  %v1401_v61 = vand.u32 2147483648, %v4696_v50 }
 0x202   : > { %v1379_v1 = vadd.f32 %v4690_v29, %v1378_v47  ;;  %v1438_v53 = vmul.f32 %v4694_v39, %v1437_v21  ;;  %v1290_v6 = vpop.f32.mrf.mxu3  ;;  %vm1505_vm13 = vcmp.eq.f32.partialorder %v1504_v44, 8.507059e+37  ;;  %v1399_v16 = vand.u32 2147483647, %v4696_v50 }
 0x203   : > { %v1498_v57 = vmul.f32 %v4698_v60, %v1497_v48  ;;  %v4753_v36 = vadd.f32 %v4626_v35, %v1290_v6 }
 0x204   : > { %v1383_v43 = vsel %vm4737_vm5, %v4690_v29, %v1379_v1  ;;  %v1439_v59 = vadd.f32 %v4694_v39, %v1438_v53  ;;  %v1257_v29 = vpop.f32.mrf.mxu0  ;;  %v1269_v41 = vpop.f32.mrf.mxu1  ;;  %vm1400_vm3 = vcmp.eq.f32.partialorder %v1399_v16, 8.507059e+37 }
 0x205   : > { %v4718_v13 = vpop.eup %3600  ;;  %v1287_v23 = vpop.f32.mrf.mxu2  ;;  %v1499_v14 = vadd.f32 %v4698_v60, %v1498_v57  ;;  %v1388_v45 = vsel %vm1385_vm8, %v1387_v9, %v1383_v43  ;;  %v3324_v62 = vmul.f32 -1.442695, %v4753_v36  ;;  %v4778_v8 = vadd.f32 %v4626_v35, %v1257_v29 }
 0x206   : > { %v3603_v55 = vpop.eup %3602  ;;  %v1391_v42 = vmul.f32 %v4718_v13, %v4696_v50  ;;  %v4750_v54 = vadd.f32 %v4626_v35, %v1287_v23  ;;  %v1443_v38 = vsel %vm4764_vm9, %v4694_v39, %v1439_v59  ;;  %v4784_v47 = vmul.f32 %v1388_v45, %v4667_v28 }
 0x207   : > { %v4746_v5 = vadd.f32 1.0, %v3603_v55  ;;  %v3605_v15 = vpop.eup %3604  ;;  %v1503_v10 = vsel %vm1502_vm11, %v4698_v60, %v1499_v14  ;;  %v4788_v7 = vadd.f32 %v4626_v35, %v1269_v41  ;;  %v1507_v39 = vor.u32 1.1754944e-38, %v1506_v52  ;;  %v475_v14 = vld [vmem:[%s5715_s8 + $0x7] sm:$0x1] }
 0x208   : > { %v1392_v20 = vsub.f32 1.0, %v1391_v42  ;;  %v4758_v34 = vadd.f32 1.0, %v3605_v15  ;;  %v3323_v3 = vmul.f32 -1.442695, %v4750_v54  ;;  %v1448_v48 = vsel %vm1445_vm12, %v1447_v26, %v1443_v38  ;;  %3383 = vpush %v475_v14 }
 0x209   : > { %3606 = vrcp.f32 %v4746_v5  ;;  %v1508_v49 = vsel %vm1505_vm13, %v1507_v39, %v1503_v10  ;;  %vm1396_vm14 = vweird.f32 %v4718_v13  ;;  %v3313_v1 = vmul.f32 -1.442695, %v4778_v8 }
 0x20a   : > { %3608 = vrcp.f32 %v4758_v34  ;;  %v1393_v21 = vmul.f32 %v4718_v13, %v1392_v20  ;;  %v1293_v60 = vpop.f32.mrf.mxu3  ;;  %v3317_v58 = vmul.f32 -1.442695, %v4788_v7  ;;  %v1618_v55 = vmul.f32 %v4638_v25, %v4784_v47  ;;  %vm4822_vm2 = vmor %vm1395_vm15, %vm1396_vm14 }
 0x20b   : > { %3610 = vpow2.f32 %v3324_v62  ;;  %v1703_v53 = vmul.f32 %v4633_v37, %v4784_v47  ;;  %v4803_v57 = vmul.f32 %v1448_v48, %v4653_v30  ;;  %v4809_v42 = vadd.f32 %v4626_v35, %v4684_v33 }
 0x20c   : > { %3612 = vpow2.f32 %v3323_v3  ;;  %v1394_v28 = vadd.f32 %v4718_v13, %v1393_v21  ;;  %v4815_v4 = vadd.f32 %v4626_v35, %v1293_v60  ;;  %v4818_v30 = vmul.f32 %v1508_v49, %v4658_v12 }
 0x20d   : > { %3614 = vpow2.f32 %v3317_v58  ;;  %v1636_v33 = vsel %vm1182_vm6, %v1618_v55, 0.0  ;;  %v1721_v50 = vsel %vm1182_vm6, %v1703_v53, 0.0  ;;  %v1402_v15 = vor.u32 1.1754944e-38, %v1401_v61 }
 0x20e   : > { %3616 = vpow2.f32 %v3313_v1  ;;  %v1398_v6 = vsel %vm4822_vm2, %v4718_v13, %v1394_v28  ;;  %1637 = vadd.xlane.f32.xlu2 %v1636_v33  ;;  %1722 = vadd.xlane.f32.xlu0 %v1721_v50  ;;  %v3325_v29 = vmul.f32 -1.442695, %v4815_v4  ;;  %v1622_v26 = vmul.f32 %v4638_v25, %v4803_v57 }
 0x20f   : > { %v4792_v46 = vpop.eup %3606  ;;  %v1403_v13 = vsel %vm1400_vm3, %v1402_v15, %v1398_v6  ;;  %v1626_v52 = vmul.f32 %v4638_v25, %v4818_v30  ;;  %v3321_v0 = vmul.f32 -1.442695, %v4809_v42  ;;  %v4852_v3 = vadd.f32 %v4626_v35, %v4712_v51 }
 0x210   : > { %v4800_v56 = vpop.eup %3608  ;;  %v1511_v43 = vmul.f32 %v4792_v46, %v4746_v5  ;;  %v4857_v21 = vmul.f32 %v1403_v13, %v4673_v18  ;;  %v1461_v39 = vand.u32 2147483648, %v4758_v34  ;;  %v1648_v48 = vsel %vm1182_vm6, %v1622_v26, 0.0 }
 0x211   : > { %v1451_v23 = vmul.f32 %v4800_v56, %v4758_v34  ;;  %v3611_v24 = vpop.eup %3610  ;;  %vm1456_vm5 = vweird.f32 %v4800_v56  ;;  %vm1455_vm7 = vweird.f32 %v4758_v34  ;;  %v1459_v49 = vand.u32 2147483647, %v4758_v34 }
 0x212   : > { %v4833_v59 = vadd.f32 1.0, %v3611_v24  ;;  %v3613_v9 = vpop.eup %3612  ;;  %v1512_v41 = vsub.f32 1.0, %v1511_v43  ;;  %v1660_v1 = vsel %vm1182_vm6, %v1626_v52, 0.0  ;;  %vm4867_vm4 = vmor %vm1455_vm7, %vm1456_vm5  ;;  %vm1515_vm8 = vweird.f32 %v4746_v5 }
 0x213   : > { %v1452_v12 = vsub.f32 1.0, %v1451_v23  ;;  %v3615_v45 = vpop.eup %3614  ;;  %v4846_v44 = vadd.f32 1.0, %v3613_v9  ;;  %v3322_v28 = vmul.f32 -1.442695, %v4852_v3  ;;  %v1519_v58 = vand.u32 2147483647, %v4746_v5 }
 0x214   : > { %3618 = vrcp.f32 %v4833_v59  ;;  %v3617_v62 = vpop.eup %3616  ;;  %v4854_v10 = vadd.f32 1.0, %v3615_v45  ;;  %v1513_v60 = vmul.f32 %v4792_v46, %v1512_v41  ;;  %v1521_v55 = vand.u32 2147483648, %v4746_v5 }
 0x215   : > { %v1453_v20 = vmul.f32 %v4800_v56, %v1452_v12  ;;  %3620 = vpow2.f32 %v3325_v29  ;;  %v4865_v35 = vadd.f32 1.0, %v3617_v62  ;;  %v1462_v53 = vor.u32 1.1754944e-38, %v1461_v39 }
 0x216   : > { %3622 = vrcp.f32 %v4854_v10  ;;  %1661 = vadd.xlane.f32.xlu0 %v1660_v1  ;;  %1649 = vadd.xlane.f32.xlu2 %v1648_v48  ;;  %vm1460_vm9 = vcmp.eq.f32.partialorder %v1459_v49, 8.507059e+37  ;;  %v1711_v16 = vmul.f32 %v4633_v37, %v4818_v30  ;;  %v1619_v23 = vmul.f32 %v4638_v25, %v4857_v21 }
 0x217   : > { %v1454_v38 = vadd.f32 %v4800_v56, %v1453_v20  ;;  %3624 = vrcp.f32 %v4846_v44  ;;  %vm1516_vm10 = vweird.f32 %v4792_v46  ;;  %v1514_v50 = vadd.f32 %v4792_v46, %v1513_v60 }
 0x218   : > { %3626 = vpow2.f32 %v3321_v0  ;;  %v1581_v43 = vand.u32 2147483648, %v4833_v59  ;;  %v1579_v15 = vand.u32 2147483647, %v4833_v59  ;;  %v1745_v29 = vsel %vm1182_vm6, %v1711_v16, 0.0  ;;  %vm4908_vm12 = vmor %vm1515_vm8, %vm1516_vm10 }
 0x219   : > { %v1458_v34 = vsel %vm4867_vm4, %v4800_v56, %v1454_v38  ;;  %3628 = vrcp.f32 %v4865_v35  ;;  %v1639_v26 = vsel %vm1182_vm6, %v1619_v23, 0.0  ;;  %vm1575_vm13 = vweird.f32 %v4833_v59 }
 0x21a   : > { %v3619_v18 = vpop.eup %3618  ;;  %v1463_v56 = vsel %vm1460_vm9, %v1462_v53, %v1458_v34  ;;  %3630 = vpow2.f32 %v3322_v28  ;;  %v1518_v41 = vsel %vm4908_vm12, %v4792_v46, %v1514_v50  ;;  %v1582_v5 = vor.u32 1.1754944e-38, %v1581_v43 }
 0x21b   : > { %v1571_v61 = vmul.f32 %v3619_v18, %v4833_v59  ;;  %v3621_v24 = vpop.eup %3620  ;;  %vm1576_vm11 = vweird.f32 %v3619_v18  ;;  %v4899_v20 = vmul.f32 %v1463_v56, %v4705_v22  ;;  %v1522_v38 = vor.u32 1.1754944e-38, %v1521_v55 }
 0x21c   : > { %v4887_v33 = vpop.eup %3622  ;;  %v4891_v6 = vadd.f32 1.0, %v3621_v24  ;;  %vm1577_vm14 = vmor %vm1575_vm13, %vm1576_vm11  ;;  %vm1580_vm15 = vcmp.eq.f32.partialorder %v1579_v15, 8.507059e+37  ;;  %vm1520_vm2 = vcmp.eq.f32.partialorder %v1519_v58, 8.507059e+37  ;;  %v1476_v58 = vand.u32 2147483648, %v4854_v10 }
 0x21d   : > { %v1572_v27 = vsub.f32 1.0, %v1571_v61  ;;  %v4893_v12 = vpop.eup %3624  ;;  %v1466_v14 = vmul.f32 %v4887_v33, %v4854_v10  ;;  %v1623_v1 = vmul.f32 %v4638_v25, %v4899_v20  ;;  %v1523_v46 = vsel %vm1520_vm2, %v1522_v38, %v1518_v41 }
 0x21e   : > { %3632 = vrcp.f32 %v4891_v6  ;;  %1746 = vadd.xlane.f32.xlu2 %v1745_v29  ;;  %1640 = vadd.xlane.f32.xlu0 %v1639_v26  ;;  %v3627_v22 = vpop.eup %3626  ;;  %v1556_v0 = vmul.f32 %v4893_v12, %v4846_v44  ;;  %vm1471_vm3 = vweird.f32 %v4887_v33  ;;  %v4938_v16 = vmul.f32 %v1523_v46, %v4688_v11 }
 0x21f   : > { %v1573_v9 = vmul.f32 %v3619_v18, %v1572_v27  ;;  %v1467_v45 = vsub.f32 1.0, %v1466_v14  ;;  %v4919_v62 = vpop.eup %3628  ;;  %v4924_v51 = vadd.f32 1.0, %v3627_v22  ;;  %vm1470_vm5 = vweird.f32 %v4854_v10 }
 0x220   : > { %v3631_v48 = vpop.eup %3630  ;;  %v1406_v28 = vmul.f32 %v4919_v62, %v4865_v35  ;;  %v1651_v23 = vsel %vm1182_vm6, %v1623_v1, 0.0  ;;  %vm4946_vm7 = vmor %vm1470_vm5, %vm1471_vm3  ;;  %v1477_v15 = vor.u32 1.1754944e-38, %v1476_v58  ;;  %v1594_v29 = vand.u32 2147483647, %v4891_v6 }
 0x221   : > { %v1574_v52 = vadd.f32 %v3619_v18, %v1573_v9  ;;  %v1468_v59 = vmul.f32 %v4887_v33, %v1467_v45  ;;  %3634 = vrcp.f32 %v4924_v51  ;;  %v4944_v24 = vadd.f32 1.0, %v3631_v48 }
 0x222   : > { %v1407_v11 = vsub.f32 1.0, %v1406_v28  ;;  %v1596_v9 = vand.u32 2147483648, %v4891_v6  ;;  %v1712_v26 = vmul.f32 %v4633_v37, %v4938_v16  ;;  %v1707_v13 = vmul.f32 %v4633_v37, %v4803_v57 }
 0x223   : > { %v1578_v39 = vsel %vm1577_vm14, %v3619_v18, %v1574_v52  ;;  %v1557_v18 = vsub.f32 1.0, %v1556_v0  ;;  %v1469_v55 = vadd.f32 %v4887_v33, %v1468_v59  ;;  %3636 = vrcp.f32 %v4944_v24 }
 0x224   : > { %v1583_v49 = vsel %vm1580_vm15, %v1582_v5, %v1578_v39  ;;  %v3633_v34 = vpop.eup %3632  ;;  %vm1590_vm9 = vweird.f32 %v4891_v6  ;;  %vm1561_vm10 = vweird.f32 %v4893_v12  ;;  %v1597_v41 = vor.u32 1.1754944e-38, %v1596_v9 }
 0x225   : > { %v4927_v60 = vmul.f32 %v1583_v49, %v4753_v36  ;;  %v1586_v53 = vmul.f32 %v3633_v34, %v4891_v6  ;;  %v1474_v36 = vand.u32 2147483647, %v4854_v10  ;;  %v1558_v43 = vmul.f32 %v4893_v12, %v1557_v18 }
 0x226   : > { %1652 = vadd.xlane.f32.xlu0 %v1651_v23  ;;  %v1473_v10 = vsel %vm4946_vm7, %v4887_v33, %v1469_v55  ;;  %vm1591_vm4 = vweird.f32 %v3633_v34  ;;  %v1408_v33 = vmul.f32 %v4919_v62, %v1407_v11  ;;  %vm1560_vm12 = vweird.f32 %v4846_v44 }
 0x227   : > { %v1716_v61 = vmul.f32 %v4633_v37, %v4927_v60  ;;  %v1587_v27 = vsub.f32 1.0, %v1586_v53  ;;  %vm1475_vm8 = vcmp.eq.f32.partialorder %v1474_v36, 8.507059e+37  ;;  %v1559_v22 = vadd.f32 %v4893_v12, %v1558_v43  ;;  %vm1592_vm11 = vmor %vm1590_vm9, %vm1591_vm4  ;;  %v4966_v0 = vpop.eup %3634 }
 0x228   : > { %v1478_v52 = vsel %vm1475_vm8, %v1477_v15, %v1473_v10  ;;  %v1566_v5 = vand.u32 2147483648, %v4846_v44  ;;  %vm1595_vm13 = vcmp.eq.f32.partialorder %v1594_v29, 8.507059e+37  ;;  %v1564_v39 = vand.u32 2147483647, %v4846_v44  ;;  %vm4975_vm14 = vmor %vm1560_vm12, %vm1561_vm10 }
 0x229   : > { %v1760_v50 = vsel %vm1182_vm6, %v1716_v61, 0.0  ;;  %v1588_v14 = vmul.f32 %v3633_v34, %v1587_v27  ;;  %v4972_v6 = vmul.f32 %v1478_v52, %v4788_v7  ;;  %v1748_v48 = vsel %vm1182_vm6, %v1712_v26, 0.0  ;;  %v4988_v44 = vpop.eup %3636 }
 0x22a   : > { %1761 = vadd.xlane.f32.xlu1 %v1760_v50  ;;  %v1733_v46 = vsel %vm1182_vm6, %v1707_v13, 0.0  ;;  %v1563_v7 = vsel %vm4975_vm14, %v4893_v12, %v1559_v22  ;;  %v1409_v28 = vadd.f32 %v4919_v62, %v1408_v33  ;;  %vm1411_vm15 = vweird.f32 %v4919_v62 }
 0x22b   : > { %v1589_v45 = vadd.f32 %v3633_v34, %v1588_v14  ;;  %v1567_v18 = vor.u32 1.1754944e-38, %v1566_v5  ;;  %vm1410_vm2 = vweird.f32 %v4865_v35  ;;  %v1416_v55 = vand.u32 2147483648, %v4865_v35  ;;  %v5031_v5 = vpop.permute.xlu0 %3475 }
 0x22c   : > { %vm1565_vm3 = vcmp.eq.f32.partialorder %v1564_v39, 8.507059e+37  ;;  %v1709_v58 = vmul.f32 %v4633_v37, %v4972_v6  ;;  %v1414_v12 = vand.u32 2147483647, %v4865_v35  ;;  %v1704_v36 = vmul.f32 %v4633_v37, %v4857_v21  ;;  %vm1412_vm5 = vmor %vm1410_vm2, %vm1411_vm15 }
 0x22d   : > { %v1593_v38 = vsel %vm1592_vm11, %v3633_v34, %v1589_v45  ;;  %v1526_v34 = vmul.f32 %v4966_v0, %v4924_v51  ;;  %v1568_v53 = vsel %vm1565_vm3, %v1567_v18, %v1563_v7  ;;  %v1413_v56 = vsel %vm1412_vm5, %v4919_v62, %v1409_v28 }
 0x22e   : > { %v1598_v59 = vsel %vm1595_vm13, %v1597_v41, %v1593_v38  ;;  %1749 = vadd.xlane.f32.xlu0 %v1748_v48  ;;  %v1541_v27 = vmul.f32 %v4988_v44, %v4944_v24  ;;  %v1417_v50 = vor.u32 1.1754944e-38, %v1416_v55  ;;  %v5006_v11 = vmul.f32 %v1568_v53, %v4750_v54 }
 0x22f   : > { %v4980_v1 = vmul.f32 %v1598_v59, %v4815_v4  ;;  %v1527_v23 = vsub.f32 1.0, %v1526_v34  ;;  %v1739_v35 = vsel %vm1182_vm6, %v1709_v58, 0.0  ;;  %vm1415_vm7 = vcmp.eq.f32.partialorder %v1414_v12, 8.507059e+37  ;;  %v5036_v59 = vpop.permute.xlu2 %3485 }
 0x230   : > { %v1724_v43 = vsel %vm1182_vm6, %v1704_v36, 0.0  ;;  %v1708_v10 = vmul.f32 %v4633_v37, %v4899_v20  ;;  %v1418_v9 = vsel %vm1415_vm7, %v1417_v50, %v1413_v56  ;;  %v1542_v15 = vsub.f32 1.0, %v1541_v27 }
 0x231   : > { %v1717_v4 = vmul.f32 %v4633_v37, %v4980_v1  ;;  %v1528_v62 = vmul.f32 %v4966_v0, %v1527_v23  ;;  %v1715_v14 = vmul.f32 %v4633_v37, %v5006_v11  ;;  %v5016_v54 = vmul.f32 %v1418_v9, %v4778_v8 }
 0x232   : > { %1734 = vadd.xlane.f32.xlu1 %v1733_v46  ;;  %v1736_v29 = vsel %vm1182_vm6, %v1708_v10, 0.0  ;;  %v1627_v26 = vmul.f32 %v4638_v25, %v4938_v16  ;;  %vm1531_vm4 = vweird.f32 %v4966_v0  ;;  %v1543_v52 = vmul.f32 %v4988_v44, %v1542_v15 }
 0x233   : > { %v1763_v61 = vsel %vm1182_vm6, %v1717_v4, 0.0  ;;  %v1529_v13 = vadd.f32 %v4966_v0, %v1528_v62  ;;  %v1534_v45 = vand.u32 2147483647, %v4924_v51  ;;  %v1536_v33 = vand.u32 2147483648, %v4924_v51 }
 0x234   : > { %1764 = vadd.xlane.f32.xlu2 %v1763_v61  ;;  %v1757_v22 = vsel %vm1182_vm6, %v1715_v14, 0.0  ;;  %vm1530_vm8 = vweird.f32 %v4924_v51  ;;  %v1663_v8 = vsel %vm1182_vm6, %v1627_v26, 0.0  ;;  %v1620_v41 = vmul.f32 %v4638_v25, %v5016_v54 }
 0x235   : > { %vm1532_vm9 = vmor %vm1530_vm8, %vm1531_vm4  ;;  %v1544_v39 = vadd.f32 %v4988_v44, %v1543_v52  ;;  %vm1546_vm10 = vweird.f32 %v4988_v44  ;;  %vm1535_vm11 = vcmp.eq.f32.partialorder %v1534_v45, 8.507059e+37  ;;  %v1537_v51 = vor.u32 1.1754944e-38, %v1536_v33 }
 0x236   : > { %1740 = vadd.xlane.f32.xlu0 %v1739_v35  ;;  %v1533_v38 = vsel %vm1532_vm9, %v4966_v0, %v1529_v13  ;;  %v1551_v48 = vand.u32 2147483648, %v4944_v24  ;;  %vm1545_vm12 = vweird.f32 %v4944_v24  ;;  %v1549_v49 = vand.u32 2147483647, %v4944_v24 }
 0x237   : > { %v1642_v46 = vsel %vm1182_vm6, %v1620_v41, 0.0  ;;  %v1624_v34 = vmul.f32 %v4638_v25, %v4972_v6  ;;  %v1538_v0 = vsel %vm1535_vm11, %v1537_v51, %v1533_v38  ;;  %vm1547_vm13 = vmor %vm1545_vm12, %vm1546_vm10  ;;  %v5722_v18 = vmov 0  }
 0x238   : > { %v1548_v7 = vsel %vm1547_vm13, %v4988_v44, %v1544_v39  ;;  %v1552_v28 = vor.u32 1.1754944e-38, %v1551_v48  ;;  %3494 = vset.pattern.permute.xlu1 %v5722_v18  ;;  %3495 = vset.pattern.permute.xlu2 %v5722_v18  ;;  %v5048_v4 = vmul.f32 %v1538_v0, %v4809_v42  ;;  %vm1550_vm14 = vcmp.eq.f32.partialorder %v1549_v49, 8.507059e+37  ;;  %v5054_v44 = vpop.permute.xlu0 %3490 }
 0x239   : > { %v1654_v24 = vsel %vm1182_vm6, %v1624_v34, 0.0  ;;  %v1705_v25 = vmul.f32 %v4633_v37, %v5016_v54  ;;  %3496 = vset.pattern.permute.xlu0 %v5722_v18  ;;  %v3477_v49 = vunpack.i.l.bf16 %v5031_v5  ;;  %v5724_v0 = vunpack.i.l.bf16 %v5036_v59  ;;  %s3384_s12 = spop %3383 }
 0x23a   : > { %1725 = vadd.xlane.f32.xlu1 %v1724_v43  ;;  %v1553_v55 = vsel %vm1550_vm14, %v1552_v28, %v1548_v7  ;;  %v1713_v42 = vmul.f32 %v4633_v37, %v5048_v4  ;;  %v5066_v43 = vpop.permute.xlu1 %3480 }
 0x23b   : > { %v5057_v12 = vmul.f32 %v1553_v55, %v4852_v3  ;;  %v1727_v53 = vsel %vm1182_vm6, %v1705_v25, 0.0 }
 0x23c   : > { %1737 = vadd.xlane.f32.xlu2 %v1736_v29  ;;  %v1751_v36 = vsel %vm1182_vm6, %v1713_v42, 0.0 }
 0x23d   : > { %v1714_v23 = vmul.f32 %v4633_v37, %v5057_v12 }
 0x23e   : > { %1758 = vadd.xlane.f32.xlu0 %v1757_v22 }
 0x23f   : > { %v1754_v50 = vsel %vm1182_vm6, %v1714_v23, 0.0 }
 0x242   : > { %1664 = vadd.xlane.f32.xlu1 %v1663_v8 }
 0x244   : > { %1643 = vadd.xlane.f32.xlu2 %v1642_v46 }
 0x24a   : > { %1655 = vadd.xlane.f32.xlu1 %v1654_v24 }
 0x24c   : > { %1728 = vadd.xlane.f32.xlu2 %v1727_v53 }
 0x252   : > { %1752 = vadd.xlane.f32.xlu1 %v1751_v36 }
 0x254   : > { %v1720_v58 = vpop.xlane.xlu2 %1719  ;;  %1755 = vadd.xlane.f32.xlu2 %v1754_v50  ;;  %v5068_v15 = vpop.xlane.xlu1 %1634 }
 0x255   : > { %v3329_v61 = vmul.f32 -1.442695, %v1720_v58 }
 0x257   : > { %3638 = vpow2.f32 %v3329_v61 }
 0x25c   : > { %v1732_v56 = vpop.xlane.xlu0 %1731  ;;  %v5070_v39 = vpop.xlane.xlu1 %1646 }
 0x25d   : > { %v3639_v27 = vpop.eup %3638  ;;  %v3333_v3 = vmul.f32 -1.442695, %v1732_v56 }
 0x25e   : > { %v2370_v35 = vadd.f32 1.0, %v3639_v27 }
 0x25f   : > { %3640 = vpow2.f32 %v3333_v3 }
 0x260   : > { %3642 = vrcp.f32 %v2370_v35  ;;  %v2397_v13 = vand.u32 2147483648, %v2370_v35  ;;  %v2395_v33 = vand.u32 2147483647, %v2370_v35  ;;  %vm2391_vm3 = vweird.f32 %v2370_v35 }
 0x262   : > { %v2398_v51 = vor.u32 1.1754944e-38, %v2397_v13  ;;  %vm2396_vm4 = vcmp.eq.f32.partialorder %v2395_v33, 8.507059e+37 }
 0x265   : > { %v3641_v10 = vpop.eup %3640 }
 0x266   : > { %v2374_v9 = vadd.f32 1.0, %v3641_v10  ;;  %v3643_v62 = vpop.eup %3642 }
 0x267   : > { %v2387_v14 = vmul.f32 %v3643_v62, %v2370_v35  ;;  %vm2392_vm15 = vweird.f32 %v3643_v62 }
 0x268   : > { %3644 = vrcp.f32 %v2374_v9  ;;  %v2457_v22 = vand.u32 2147483648, %v2374_v9  ;;  %v2455_v41 = vand.u32 2147483647, %v2374_v9  ;;  %vm2393_vm5 = vmor %vm2391_vm3, %vm2392_vm15  ;;  %vm2451_vm7 = vweird.f32 %v2374_v9 }
 0x269   : > { %v2388_v26 = vsub.f32 1.0, %v2387_v14 }
 0x26a   : > { %v2458_v34 = vor.u32 1.1754944e-38, %v2457_v22  ;;  %vm2456_vm9 = vcmp.eq.f32.partialorder %v2455_v41, 8.507059e+37 }
 0x26b   : > { %v2389_v45 = vmul.f32 %v3643_v62, %v2388_v26 }
 0x26d   : > { %v2390_v38 = vadd.f32 %v3643_v62, %v2389_v45 }
 0x26e   : > { %v3645_v37 = vpop.eup %3644 }
 0x26f   : > { %v2447_v29 = vmul.f32 %v3645_v37, %v2374_v9  ;;  %vm2452_vm2 = vweird.f32 %v3645_v37  ;;  %v2394_v46 = vsel %vm2393_vm5, %v3643_v62, %v2390_v38 }
 0x270   : > { %vm2453_vm8 = vmor %vm2451_vm7, %vm2452_vm2  ;;  %v2399_v7 = vsel %vm2396_vm4, %v2398_v51, %v2394_v46 }
 0x271   : > { %v2448_v52 = vsub.f32 1.0, %v2447_v29  ;;  %v2691_v24 = vmul.f32 %v3477_v49, %v2399_v7 }
 0x272   : > { %v1744_v58 = vpop.xlane.xlu1 %1743  ;;  %v5076_v42 = vpop.xlane.xlu2 %1658 }
 0x273   : > { %v2449_v8 = vmul.f32 %v3645_v37, %v2448_v52  ;;  %2709 = vperm.xlu1 %3494, %v2691_v24   ;;  %v3337_v53 = vmul.f32 -1.442695, %v1744_v58 }
 0x275   : > { %v2450_v48 = vadd.f32 %v3645_v37, %v2449_v8  ;;  %3646 = vpow2.f32 %v3337_v53 }
 0x277   : > { %v2454_v28 = vsel %vm2453_vm8, %v3645_v37, %v2450_v48 }
 0x278   : > { %v2459_v25 = vsel %vm2456_vm9, %v2458_v34, %v2454_v28 }
 0x279   : > { %v2695_v55 = vmul.f32 %v5724_v0, %v2459_v25 }
 0x27b   : > { %2729 = vperm.xlu2 %3495, %v2695_v55   ;;  %v3647_v61 = vpop.eup %3646 }
 0x27c   : > { %v2378_v36 = vadd.f32 1.0, %v3647_v61  ;;  %v3478_v61 = vunpack.i.h.bf16 %v5031_v5 }
 0x27e   : > { %3648 = vrcp.f32 %v2378_v36  ;;  %v2517_v10 = vand.u32 2147483648, %v2378_v36  ;;  %v2515_v37 = vand.u32 2147483647, %v2378_v36  ;;  %vm2511_vm11 = vweird.f32 %v2378_v36 }
 0x280   : > { %v2518_v52 = vor.u32 1.1754944e-38, %v2517_v10  ;;  %vm2516_vm13 = vcmp.eq.f32.partialorder %v2515_v37, 8.507059e+37 }
 0x281   : > { %v5078_v23 = vpop.xlane.xlu2 %1637  ;;  %v1723_v56 = vpop.xlane.xlu0 %1722 }
 0x282   : > { %v3330_v27 = vmul.f32 -1.442695, %v1723_v56 }
 0x284   : > { %v3649_v50 = vpop.eup %3648  ;;  %3650 = vpow2.f32 %v3330_v27 }
 0x285   : > { %v2507_v3 = vmul.f32 %v3649_v50, %v2378_v36  ;;  %vm2512_vm10 = vweird.f32 %v3649_v50 }
 0x286   : > { %vm2513_vm12 = vmor %vm2511_vm11, %vm2512_vm10 }
 0x287   : > { %v2508_v35 = vsub.f32 1.0, %v2507_v3 }
 0x289   : > { %v5080_v9 = vpop.xlane.xlu2 %1649  ;;  %v5082_v62 = vpop.xlane.xlu0 %1661  ;;  %v2509_v14 = vmul.f32 %v3649_v50, %v2508_v35 }
 0x28a   : > { %5775 = vst [vmem:[#allocation20_spill] sm:$0xff] %v5082_v62  ;;  %v3651_v29 = vpop.eup %3650 }
 0x28b   : > { %v2371_v26 = vadd.f32 1.0, %v3651_v29  ;;  %v2510_v13 = vadd.f32 %v3649_v50, %v2509_v14 }
 0x28d   : > { %3652 = vrcp.f32 %v2371_v26  ;;  %v2514_v45 = vsel %vm2513_vm12, %v3649_v50, %v2510_v13  ;;  %v2412_v34 = vand.u32 2147483648, %v2371_v26  ;;  %v2410_v28 = vand.u32 2147483647, %v2371_v26 }
 0x28e   : > { %v2519_v33 = vsel %vm2516_vm13, %v2518_v52, %v2514_v45  ;;  %vm2406_vm15 = vweird.f32 %v2371_v26 }
 0x28f   : > { %v2699_v22 = vmul.f32 %v3477_v49, %v2519_v33  ;;  %v2413_v53 = vor.u32 1.1754944e-38, %v2412_v34  ;;  %vm2411_vm3 = vcmp.eq.f32.partialorder %v2410_v28, 8.507059e+37 }
 0x291   : > { %v1747_v8 = vpop.xlane.xlu2 %1746  ;;  %v5084_v41 = vpop.xlane.xlu0 %1640  ;;  %2749 = vperm.xlu1 %3494, %v2699_v22  }
 0x292   : > { %v3338_v38 = vmul.f32 -1.442695, %v1747_v8 }
 0x293   : > { %v3653_v51 = vpop.eup %3652 }
 0x294   : > { %v2402_v48 = vmul.f32 %v3653_v51, %v2371_v26  ;;  %3654 = vpow2.f32 %v3338_v38  ;;  %vm2407_vm14 = vweird.f32 %v3653_v51 }
 0x295   : > { %vm2408_vm2 = vmor %vm2406_vm15, %vm2407_vm14 }
 0x296   : > { %v2403_v46 = vsub.f32 1.0, %v2402_v48 }
 0x298   : > { %v2404_v7 = vmul.f32 %v3653_v51, %v2403_v46 }
 0x299   : > { %v5086_v24 = vpop.xlane.xlu0 %1652 }
 0x29a   : > { %5776 = vst [vmem:[#allocation21_spill] sm:$0xff] %v5086_v24  ;;  %v3655_v25 = vpop.eup %3654  ;;  %v2405_v58 = vadd.f32 %v3653_v51, %v2404_v7 }
 0x29b   : > { %v2379_v49 = vadd.f32 1.0, %v3655_v25 }
 0x29c   : > { %v2409_v36 = vsel %vm2408_vm2, %v3653_v51, %v2405_v58 }
 0x29d   : > { %v1762_v55 = vpop.xlane.xlu1 %1761  ;;  %3656 = vrcp.f32 %v2379_v49  ;;  %v2414_v56 = vsel %vm2411_vm3, %v2413_v53, %v2409_v36  ;;  %v2530_v13 = vand.u32 2147483647, %v2379_v49  ;;  %v2532_v52 = vand.u32 2147483648, %v2379_v49 }
 0x29e   : > { %v2692_v27 = vmul.f32 %v3478_v61, %v2414_v56  ;;  %vm2526_vm7 = vweird.f32 %v2379_v49  ;;  %v3343_v36 = vmul.f32 -1.442695, %v1762_v55 }
 0x29f   : > { %vm2531_vm8 = vcmp.eq.f32.partialorder %v2530_v13, 8.507059e+37  ;;  %v2533_v46 = vor.u32 1.1754944e-38, %v2532_v52 }
 0x2a0   : > { %2714 = vperm.xlu0 %3496, %v2692_v27  }
 0x2a1   : > { %v1750_v50 = vpop.xlane.xlu0 %1749 }
 0x2a2   : > { %v3339_v3 = vmul.f32 -1.442695, %v1750_v50 }
 0x2a3   : > { %v3657_v10 = vpop.eup %3656 }
 0x2a4   : > { %v2522_v37 = vmul.f32 %v3657_v10, %v2379_v49  ;;  %3658 = vpow2.f32 %v3339_v3  ;;  %vm2527_vm5 = vweird.f32 %v3657_v10 }
 0x2a5   : > { %v1735_v35 = vpop.xlane.xlu1 %1734  ;;  %vm2528_vm4 = vmor %vm2526_vm7, %vm2527_vm5 }
 0x2a6   : > { %v3334_v14 = vmul.f32 -1.442695, %v1735_v35  ;;  %v2523_v26 = vsub.f32 1.0, %v2522_v37 }
 0x2a7   : > { %v1765_v29 = vpop.xlane.xlu2 %1764 }
 0x2a8   : > { %3660 = vpow2.f32 %v3334_v14  ;;  %v2524_v45 = vmul.f32 %v3657_v10, %v2523_v26 }
 0x2a9   : > { %v1741_v5 = vpop.xlane.xlu0 %1740 }
 0x2aa   : > { %v3659_v33 = vpop.eup %3658  ;;  %v3336_v22 = vmul.f32 -1.442695, %v1741_v5  ;;  %v2525_v38 = vadd.f32 %v3657_v10, %v2524_v45 }
 0x2ab   : > { %v5089_v34 = vadd.f32 1.0, %v3659_v33 }
 0x2ac   : > { %3662 = vpow2.f32 %v3336_v22  ;;  %v2529_v28 = vsel %vm2528_vm4, %v3657_v10, %v2525_v38  ;;  %v3344_v10 = vmul.f32 -1.442695, %v1765_v29 }
 0x2ad   : > { %v1726_v8 = vpop.xlane.xlu1 %1725  ;;  %v2534_v25 = vsel %vm2531_vm8, %v2533_v46, %v2529_v28  ;;  %3664 = vrsqrt.f32 %v4152_v31  ;;  %vm2541_vm13 = vweird.f32 %v5089_v34 }
 0x2ae   : > { %v3661_v51 = vpop.eup %3660  ;;  %v3331_v48 = vmul.f32 -1.442695, %v1726_v8  ;;  %v2700_v53 = vmul.f32 %v3478_v61, %v2534_v25 }
 0x2af   : > { %v2375_v7 = vadd.f32 1.0, %v3661_v51  ;;  %v1738_v58 = vpop.xlane.xlu2 %1737 }
 0x2b0   : > { %v3335_v56 = vmul.f32 -1.442695, %v1738_v58  ;;  %2754 = vperm.xlu0 %3496, %v2700_v53  }
 0x2b1   : > { %3666 = vrcp.f32 %v2375_v7  ;;  %v1759_v49 = vpop.xlane.xlu0 %1758  ;;  %v2472_v33 = vand.u32 2147483648, %v2375_v7  ;;  %v2470_v51 = vand.u32 2147483647, %v2375_v7  ;;  %vm2466_vm10 = vweird.f32 %v2375_v7 }
 0x2b2   : > { %3668 = vpow2.f32 %v3331_v48  ;;  %v3663_v27 = vpop.eup %3662  ;;  %v3342_v50 = vmul.f32 -1.442695, %v1759_v49 }
 0x2b3   : > { %3670 = vrcp.f32 %v5089_v34  ;;  %v5095_v35 = vpop.eup %3664  ;;  %v5097_v14 = vadd.f32 1.0, %v3663_v27  ;;  %vm2471_vm12 = vcmp.eq.f32.partialorder %v2470_v51, 8.507059e+37  ;;  %v2545_v51 = vand.u32 2147483647, %v5089_v34 }
 0x2b4   : > { %3672 = vpow2.f32 %v3335_v56  ;;  %v1767_v22 = vmul.f32 %v5095_v35, %v4152_v31  ;;  %v2473_v56 = vor.u32 1.1754944e-38, %v2472_v33 }
 0x2b5   : > { %v5093_v3 = vpop.xlane.xlu1 %1664  ;;  %3674 = vpow2.f32 %v3343_v36 }
 0x2b6   : > { %5777 = vst [vmem:[#allocation22_spill] sm:$0xff] %v5093_v3  ;;  %3676 = vpow2.f32 %v3342_v50  ;;  %v5123_v49 = vmul.f32 %v5095_v35, %v1767_v22  ;;  %v5725_v50 = vunpack.i.h.bf16 %v5036_v59 }
 0x2b7   : > { %v3667_v37 = vpop.eup %3666  ;;  %3678 = vrcp.f32 %v5097_v14  ;;  %v5104_v52 = vpop.xlane.xlu2 %1643 }
 0x2b8   : > { %v3669_v55 = vpop.eup %3668  ;;  %v2462_v61 = vmul.f32 %v3667_v37, %v2375_v7  ;;  %3680 = vpow2.f32 %v3344_v10  ;;  %vm2467_vm9 = vweird.f32 %v3667_v37 }
 0x2b9   : > { %v5100_v26 = vpop.eup %3670  ;;  %v5102_v13 = vadd.f32 1.0, %v3669_v55  ;;  %vm2468_vm11 = vmor %vm2466_vm10, %vm2467_vm9 }
 0x2ba   : > { %v3673_v45 = vpop.eup %3672  ;;  %v2463_v5 = vsub.f32 1.0, %v2462_v61  ;;  %v2537_v46 = vmul.f32 %v5100_v26, %v5089_v34  ;;  %vm2542_vm14 = vweird.f32 %v5100_v26 }
 0x2bb   : > { %3682 = vrcp.f32 %v5102_v13  ;;  %v5107_v29 = vadd.f32 1.0, %v3673_v45  ;;  %v3675_v8 = vpop.eup %3674  ;;  %vm2421_vm2 = vweird.f32 %v5102_v13  ;;  %vm5170_vm10 = vmor %vm2541_vm13, %vm2542_vm14  ;;  %vm2496_vm13 = vweird.f32 %v5097_v14 }
 0x2bc   : > { %v2464_v38 = vmul.f32 %v3667_v37, %v2463_v5  ;;  %v3677_v48 = vpop.eup %3676  ;;  %v5120_v36 = vadd.f32 1.0, %v3675_v8  ;;  %v2538_v8 = vsub.f32 1.0, %v2537_v46 }
 0x2bd   : > { %3684 = vrcp.f32 %v5107_v29  ;;  %v5114_v28 = vpop.xlane.xlu1 %1655  ;;  %v5116_v25 = vpop.eup %3678  ;;  %v5118_v58 = vadd.f32 1.0, %v3677_v48  ;;  %vm2481_vm3 = vweird.f32 %v5107_v29 }
 0x2be   : > { %5778 = vst [vmem:[#allocation23_spill] sm:$0xff] %v5114_v28  ;;  %v2465_v53 = vadd.f32 %v3667_v37, %v2464_v38  ;;  %v3681_v27 = vpop.eup %3680  ;;  %v2492_v45 = vmul.f32 %v5116_v25, %v5097_v14 }
 0x2bf   : > { %3686 = vrcp.f32 %v5118_v58  ;;  %v1729_v7 = vpop.xlane.xlu2 %1728 }
 0x2c0   : > { %v2469_v55 = vsel %vm2468_vm11, %v3667_v37, %v2465_v53  ;;  %v3332_v38 = vmul.f32 -1.442695, %v1729_v7  ;;  %3688 = vrcp.f32 %v5120_v36  ;;  %v5135_v37 = vadd.f32 1.0, %v3681_v27 }
 0x2c1   : > { %v3683_v61 = vpop.eup %3682  ;;  %v2474_v5 = vsel %vm2471_vm12, %v2473_v56, %v2469_v55  ;;  %v2547_v53 = vand.u32 2147483648, %v5089_v34  ;;  %v2425_v7 = vand.u32 2147483647, %v5102_v13  ;;  %v2539_v27 = vmul.f32 %v5100_v26, %v2538_v8 }
 0x2c2   : > { %v2417_v22 = vmul.f32 %v3683_v61, %v5102_v13  ;;  %v2696_v48 = vmul.f32 %v5725_v50, %v2474_v5  ;;  %3690 = vpow2.f32 %v3332_v38  ;;  %v2427_v5 = vand.u32 2147483648, %v5102_v13 }
 0x2c3   : > { %v3685_v18 = vpop.eup %3684  ;;  %v2493_v0 = vsub.f32 1.0, %v2492_v45  ;;  %vm2422_vm15 = vweird.f32 %v3683_v61  ;;  %v2487_v38 = vand.u32 2147483648, %v5107_v29  ;;  %vm2426_vm4 = vcmp.eq.f32.partialorder %v2425_v7, 8.507059e+37 }
 0x2c4   : > { %v2477_v56 = vmul.f32 %v3685_v18, %v5107_v29  ;;  %2734 = vperm.xlu1 %3494, %v2696_v48   ;;  %v2418_v46 = vsub.f32 1.0, %v2417_v22  ;;  %v2485_v22 = vand.u32 2147483647, %v5107_v29  ;;  %vm2482_vm5 = vweird.f32 %v3685_v18  ;;  %vm2423_vm7 = vmor %vm2421_vm2, %vm2422_vm15 }
 0x2c5   : > { %v1753_v55 = vpop.xlane.xlu1 %1752  ;;  %v5145_v19 = vpop.eup %3686  ;;  %v2494_v13 = vmul.f32 %v5116_v25, %v2493_v0  ;;  %vm2483_vm8 = vmor %vm2481_vm3, %vm2482_vm5  ;;  %v2488_v7 = vor.u32 1.1754944e-38, %v2487_v38  ;;  %v5779_v0 = vunpack.i.l.bf16 %v5066_v43  ;;  %vm2497_vm11 = vweird.f32 %v5116_v25 }
 0x2c6   : > { %v3340_v50 = vmul.f32 -1.442695, %v1753_v55  ;;  %v2419_v10 = vmul.f32 %v3683_v61, %v2418_v46  ;;  %v2478_v33 = vsub.f32 1.0, %v2477_v56  ;;  %v5151_v8 = vpop.eup %3688  ;;  %v2428_v56 = vor.u32 1.1754944e-38, %v2427_v5  ;;  %vm2498_vm14 = vmor %vm2496_vm13, %vm2497_vm11 }
 0x2c7   : > { %v1756_v45 = vpop.xlane.xlu2 %1755  ;;  %v2540_v46 = vadd.f32 %v5100_v26, %v2539_v27  ;;  %v2582_v24 = vmul.f32 %v5145_v19, %v5118_v58  ;;  %vm2486_vm9 = vcmp.eq.f32.partialorder %v2485_v22, 8.507059e+37  ;;  %v2495_v22 = vadd.f32 %v5116_v25, %v2494_v13 }
 0x2c8   : > { %3692 = vpow2.f32 %v3340_v50  ;;  %v2420_v48 = vadd.f32 %v3683_v61, %v2419_v10  ;;  %v2479_v62 = vmul.f32 %v3685_v18, %v2478_v33  ;;  %v3691_v55 = vpop.eup %3690  ;;  %v3341_v3 = vmul.f32 -1.442695, %v1756_v45 }
 0x2c9   : > { %3694 = vrcp.f32 %v5135_v37  ;;  %v5158_v10 = vadd.f32 1.0, %v3691_v55  ;;  %v2583_v38 = vsub.f32 1.0, %v2582_v24  ;;  %v2548_v34 = vor.u32 1.1754944e-38, %v2547_v53 }
 0x2ca   : > { %v2424_v28 = vsel %vm2423_vm7, %v3683_v61, %v2420_v48  ;;  %v2480_v50 = vadd.f32 %v3685_v18, %v2479_v62  ;;  %3696 = vpow2.f32 %v3341_v3  ;;  %v5782_v3 = vunpack.i.l.bf16 %v5054_v44 }
 0x2cb   : > { %v2429_v33 = vsel %vm2426_vm4, %v2428_v56, %v2424_v28  ;;  %3698 = vrcp.f32 %v5158_v10  ;;  %v2502_v45 = vand.u32 2147483648, %v5097_v14  ;;  %v1769_v56 = vmul.f32 0.5, %v5123_v49 }
 0x2cc   : > { %v2693_v5 = vmul.f32 %v5779_v0, %v2429_v33  ;;  %v2484_v27 = vsel %vm2483_vm8, %v3685_v18, %v2480_v50  ;;  %v2544_v18 = vsel %vm5170_vm10, %v5100_v26, %v2540_v46  ;;  %vm2546_vm12 = vcmp.eq.f32.partialorder %v2545_v51, 8.507059e+37 }
 0x2cd   : > { %v2489_v61 = vsel %vm2486_vm9, %v2488_v7, %v2484_v27  ;;  %v2500_v55 = vand.u32 2147483647, %v5097_v14  ;;  %v2549_v26 = vsel %vm2546_vm12, %v2548_v34, %v2544_v18  ;;  %v2499_v53 = vsel %vm2498_vm14, %v5116_v25, %v2495_v22 }
 0x2ce   : > { %v3693_v29 = vpop.eup %3692  ;;  %2719 = vperm.xlu2 %3495, %v2693_v5   ;;  %v2697_v28 = vmul.f32 %v5782_v3, %v2489_v61  ;;  %v2584_v46 = vmul.f32 %v5145_v19, %v2583_v38  ;;  %v3493_v51 = vunpack.i.h.bf16 %v5054_v44  ;;  %v2503_v33 = vor.u32 1.1754944e-38, %v2502_v45 }
 0x2cf   : > { %v5181_v48 = vadd.f32 1.0, %v3693_v29  ;;  %v5187_v50 = vpop.eup %3694  ;;  %v1770_v14 = vsub.f32 1.5, %v1769_v56  ;;  %v5783_v5 = vunpack.i.l.bf16 %v5066_v43  ;;  %vm2501_vm15 = vcmp.eq.f32.partialorder %v2500_v55, 8.507059e+37 }
 0x2d0   : > { %2739 = vperm.xlu0 %3496, %v2697_v28   ;;  %v3697_v24 = vpop.eup %3696  ;;  %v2612_v7 = vmul.f32 %v5187_v50, %v5135_v37  ;;  %v2504_v25 = vsel %vm2501_vm15, %v2503_v33, %v2499_v53  ;;  %v2590_v61 = vand.u32 2147483647, %v5118_v58  ;;  %v2592_v62 = vand.u32 2147483648, %v5118_v58 }
 0x2d1   : > { %3700 = vrcp.f32 %v5181_v48  ;;  %v3699_v49 = vpop.eup %3698  ;;  %v5195_v13 = vadd.f32 1.0, %v3697_v24  ;;  %v2701_v27 = vmul.f32 %v5783_v5, %v2549_v26  ;;  %v2440_v3 = vand.u32 2147483647, %v5158_v10 }
 0x2d2   : > { %v2432_v0 = vmul.f32 %v3699_v49, %v5158_v10  ;;  %v2585_v28 = vadd.f32 %v5145_v19, %v2584_v46  ;;  %vm2587_vm2 = vweird.f32 %v5145_v19  ;;  %v3483_v22 = vunpack.i.h.bf16 %v5066_v43 }
 0x2d3   : > { %3702 = vrcp.f32 %v5195_v13  ;;  %v2597_v38 = vmul.f32 %v5151_v8, %v5120_v36  ;;  %v2442_v34 = vand.u32 2147483648, %v5158_v10  ;;  %vm2586_vm3 = vweird.f32 %v5118_v58 }
 0x2d4   : > { %v2433_v29 = vsub.f32 1.0, %v2432_v0  ;;  %v2698_v56 = vmul.f32 %v3493_v51, %v2504_v25  ;;  %vm2437_vm5 = vweird.f32 %v3699_v49  ;;  %vm2436_vm7 = vweird.f32 %v5158_v10  ;;  %vm5217_vm4 = vmor %vm2586_vm3, %vm2587_vm2 }
 0x2d5   : > { %vm5221_vm8 = vcmp.eq.f32.partialorder %v2590_v61, 8.507059e+37  ;;  %v2593_v24 = vor.u32 1.1754944e-38, %v2592_v62  ;;  %v2613_v53 = vsub.f32 1.0, %v2612_v7  ;;  %vm2441_vm9 = vcmp.eq.f32.partialorder %v2440_v3, 8.507059e+37  ;;  %vm2438_vm10 = vmor %vm2436_vm7, %vm2437_vm5 }
 0x2d6   : > { %2759 = vperm.xlu2 %3495, %v2701_v27   ;;  %v2434_v55 = vmul.f32 %v3699_v49, %v2433_v29  ;;  %v2589_v46 = vsel %vm5217_vm4, %v5145_v19, %v2585_v28  ;;  %v2443_v10 = vor.u32 1.1754944e-38, %v2442_v34  ;;  %v2560_v5 = vand.u32 2147483647, %v5181_v48 }
 0x2d7   : > { %v3701_v18 = vpop.eup %3700  ;;  %v2562_v27 = vand.u32 2147483648, %v5181_v48  ;;  %v2598_v25 = vsub.f32 1.0, %v2597_v38  ;;  %v2594_v3 = vsel %vm5221_vm8, %v2593_v24, %v2589_v46  ;;  %v2614_v19 = vmul.f32 %v5187_v50, %v2613_v53 }
 0x2d8   : > { %v2552_v45 = vmul.f32 %v3701_v18, %v5181_v48  ;;  %v2435_v58 = vadd.f32 %v3699_v49, %v2434_v55  ;;  %vm2557_vm11 = vweird.f32 %v3701_v18  ;;  %v1771_v28 = vmul.f32 %v5095_v35, %v1770_v14 }
 0x2d9   : > { %v3703_v0 = vpop.eup %3702  ;;  %vm2556_vm12 = vweird.f32 %v5181_v48  ;;  %v2577_v38 = vand.u32 2147483648, %v5195_v13  ;;  %vm2561_vm14 = vcmp.eq.f32.partialorder %v2560_v5, 8.507059e+37  ;;  %v2599_v26 = vmul.f32 %v5151_v8, %v2598_v25 }
 0x2da   : > { %v2553_v33 = vsub.f32 1.0, %v2552_v45  ;;  %v2567_v61 = vmul.f32 %v3703_v0, %v5195_v13  ;;  %v2439_v29 = vsel %vm2438_vm10, %v3699_v49, %v2435_v58  ;;  %vm2558_vm13 = vmor %vm2556_vm12, %vm2557_vm11  ;;  %v2563_v49 = vor.u32 1.1754944e-38, %v2562_v27 }
 0x2db   : > { %v2444_v7 = vsel %vm2441_vm9, %v2443_v10, %v2439_v29  ;;  %vm2572_vm15 = vweird.f32 %v3703_v0  ;;  %v2575_v24 = vand.u32 2147483647, %v5195_v13  ;;  %3704 = vrsqrt.f32 %v4154_v32 }
 0x2dc   : > { %v2554_v62 = vmul.f32 %v3701_v18, %v2553_v33  ;;  %v2694_v34 = vmul.f32 %v3483_v22, %v2444_v7  ;;  %v2568_v45 = vsub.f32 1.0, %v2567_v61  ;;  %vm2571_vm2 = vweird.f32 %v5195_v13 }
 0x2dd   : > { %vm2602_vm3 = vweird.f32 %v5151_v8  ;;  %v1772_v48 = vmul.f32 %v1771_v28, %v4152_v31  ;;  %vm2573_vm5 = vmor %vm2571_vm2, %vm2572_vm15  ;;  %v2578_v46 = vor.u32 1.1754944e-38, %v2577_v38  ;;  %v2615_v33 = vadd.f32 %v5187_v50, %v2614_v19 }
 0x2de   : > { %2744 = vperm.xlu2 %3495, %v2698_v56   ;;  %v2555_v55 = vadd.f32 %v3701_v18, %v2554_v62  ;;  %2724 = vperm.xlu1 %3494, %v2694_v34   ;;  %v2569_v43 = vmul.f32 %v3703_v0, %v2568_v45  ;;  %v5788_v56 = vunpack.i.h.bf16 %v5036_v59  ;;  %vm2617_vm7 = vweird.f32 %v5187_v50 }
 0x2df   : > { %vm2576_vm4 = vcmp.eq.f32.partialorder %v2575_v24, 8.507059e+37  ;;  %v2600_v5 = vadd.f32 %v5151_v8, %v2599_v26  ;;  %v2622_v13 = vand.u32 2147483648, %v5135_v37  ;;  %vm2601_vm8 = vweird.f32 %v5120_v36 }
 0x2e0   : > { %v2559_v53 = vsel %vm2558_vm13, %v3701_v18, %v2555_v55  ;;  %v2570_v14 = vadd.f32 %v3703_v0, %v2569_v43  ;;  %v2704_v58 = vmul.f32 %v5788_v56, %v2594_v3  ;;  %v2607_v25 = vand.u32 2147483648, %v5120_v36  ;;  %vm5257_vm10 = vmor %vm2601_vm8, %vm2602_vm3 }
 0x2e1   : > { %v2564_v35 = vsel %vm2561_vm14, %v2563_v49, %v2559_v53  ;;  %v5789_v61 = vunpack.i.l.bf16 %v5036_v59  ;;  %vm2616_vm9 = vweird.f32 %v5135_v37  ;;  %v2620_v62 = vand.u32 2147483647, %v5135_v37  ;;  %v3705_v7 = vpop.eup %3704 }
 0x2e2   : > { %v2574_v18 = vsel %vm2573_vm5, %v3703_v0, %v2570_v14  ;;  %v2702_v10 = vmul.f32 %v3483_v22, %v2564_v35  ;;  %v2605_v0 = vand.u32 2147483647, %v5120_v36  ;;  %vm2618_vm11 = vmor %vm2616_vm9, %vm2617_vm7  ;;  %v2604_v37 = vsel %vm5257_vm10, %v5151_v8, %v2600_v5  ;;  %v2730_v22 = vpop.permute.xlu2 %2729 }
 0x2e3   : > { %v2579_v27 = vsel %vm2576_vm4, %v2578_v46, %v2574_v18  ;;  %v2619_v59 = vsel %vm2618_vm11, %v5187_v50, %v2615_v33  ;;  %v2623_v3 = vor.u32 1.1754944e-38, %v2622_v13  ;;  %v2608_v19 = vor.u32 1.1754944e-38, %v2607_v25 }
 0x2e4   : > { %v2703_v29 = vmul.f32 %v5789_v61, %v2579_v27  ;;  %vm1773_vm12 = vcmp.eq.f32.partialorder %v4152_v31, inf  ;;  %vm2621_vm13 = vcmp.eq.f32.partialorder %v2620_v62, 8.507059e+37  ;;  %vm2606_vm14 = vcmp.eq.f32.partialorder %v2605_v0, 8.507059e+37 }
 0x2e5   : > { %v1774_v36 = vsel %vm1773_vm12, %v4152_v31, %v1772_v48  ;;  %v1779_v28 = vmul.f32 %v3705_v7, %v4154_v32  ;;  %v2624_v34 = vsel %vm2621_vm13, %v2623_v3, %v2619_v59  ;;  %v2609_v45 = vsel %vm2606_vm14, %v2608_v19, %v2604_v37  ;;  %v2710_v37 = vpop.permute.xlu1 %2709 }
 0x2e6   : > { %2774 = vperm.xlu2 %3495, %v2704_v58   ;;  %2769 = vperm.xlu0 %3496, %v2703_v29   ;;  %v1776_v55 = vand.u32 2147483648, %v4152_v31  ;;  %vm1775_vm15 = vcmp.eq.f32.partialorder %v4152_v31, 0.0  ;;  %v2706_v8 = vmul.f32 %v3493_v51, %v2624_v34  ;;  %v5792_v38 = vunpack.i.l.bf16 %v5054_v44 }
 0x2e7   : > { %2764 = vperm.xlu1 %3494, %v2702_v10   ;;  %v1780_v26 = vmul.f32 %v3705_v7, %v1779_v28  ;;  %vm1785_vm2 = vcmp.eq.f32.partialorder %v4154_v32, inf  ;;  %v1788_v58 = vand.u32 2147483648, %v4154_v32  ;;  %vm1787_vm3 = vcmp.eq.f32.partialorder %v4154_v32, 0.0 }
 0x2e8   : > { %v1777_v50 = vsel %vm1775_vm15, %v1776_v55, %v1774_v36  ;;  %v2705_v49 = vmul.f32 %v5792_v38, %v2609_v45  ;;  %v5793_v0 = vmov 0   ;;  %v2787_v45 = vmul.f32 %v2710_v37, %v4640_v2 }
 0x2e9   : > { %v1790_v43 = vadd.f32 1.0, %v1777_v50  ;;  %v1781_v24 = vmul.f32 0.5, %v1780_v26  ;;  %v5297_v26 = vld [vmem:[%s5715_s8 + $0x3] ss:$0 sm:$0xff]  ;;  %vm598_vm5 = vcmask 1041409   ;;  %vm599_vm7 = vcmask 1042434  }
 0x2ea   : > { %vm601_vm4 = vcmask 1043459   ;;  %vm603_vm9 = vcmask 1044484   ;;  %vm605_vm10 = vcmask 1045509   ;;  %vm607_vm11 = vcmask 1046534  }
 0x2eb   : > { %v1794_v53 = vperm.slane %v1790_v43, 0  ;;  %v1782_v35 = vsub.f32 1.5, %v1781_v24  ;;  %v1815_v14 = vperm.slane %v1790_v43, 3  ;;  %v1808_v48 = vperm.slane %v1790_v43, 2 }
 0x2ec   : > { %v1801_v51 = vperm.slane %v1790_v43, 1  ;;  %v1829_v46 = vperm.slane %v1790_v43, 5  ;;  %v1822_v18 = vperm.slane %v1790_v43, 4  ;;  %v1836_v13 = vperm.slane %v1790_v43, 6 }
 0x2ed   : > { %v1783_v31 = vmul.f32 %v3705_v7, %v1782_v35  ;;  %vm609_vm13 = vcmask 1047559  }
 0x2ee   : > { %3497 = vset.pattern.permute.xlu2 %v4143_v17  ;;  %2784 = vperm.xlu0 %3496, %v2706_v8  }
 0x2ef   : > { %2779 = vperm.xlu1 %3494, %v2705_v49   ;;  %v1784_v44 = vmul.f32 %v1783_v31, %v4154_v32 }
 0x2f1   : > { %v1786_v56 = vsel %vm1785_vm2, %v4154_v32, %v1784_v44 }
 0x2f2   : > { %v1789_v33 = vsel %vm1787_vm3, %v1788_v58, %v1786_v56 }
 0x2f3   : > { %v1791_v10 = vadd.f32 1.0, %v1789_v33  ;;  %v1629_v33 = vmul.f32 %v5297_v26, %v5057_v12 }
 0x2f5   : > { %v1850_v5 = vperm.slane %v1791_v10, 0  ;;  %v1864_v27 = vperm.slane %v1791_v10, 2  ;;  %v1871_v25 = vperm.slane %v1791_v10, 3  ;;  %v1885_v61 = vperm.slane %v1791_v10, 5 }
 0x2f6   : > { %1799 = vperm.xlu2 %3497, %v1794_v53   ;;  %3499 = vset.pattern.permute.xlu0 %v4143_v17  ;;  %v1857_v29 = vperm.slane %v1791_v10, 1  ;;  %v1892_v32 = vperm.slane %v1791_v10, 6  ;;  %v1878_v62 = vperm.slane %v1791_v10, 4  ;;  %v1899_v7 = vperm.slane %v1791_v10, 7 }
 0x2f7   : > { %3498 = vset.pattern.permute.xlu1 %v4143_v17  ;;  %v1843_v17 = vperm.slane %v1790_v43, 7  ;;  %v1628_v43 = vmul.f32 %v5297_v26, %v5048_v4 }
 0x2fe   : > { %1820 = vperm.xlu2 %3497, %v1815_v14   ;;  %1813 = vperm.xlu0 %3499, %v1808_v48   ;;  %v1666_v48 = vsel %vm1182_vm6, %v1628_v43, 0.0 }
 0x2ff   : > { %1806 = vperm.xlu1 %3498, %v1801_v51  }
 0x303   : > { %v2750_v36 = vpop.permute.xlu1 %2749 }
 0x304   : > { %v2795_v8 = vmul.f32 %v2750_v36, %v4708_v40 }
 0x306   : > { %1834 = vperm.xlu2 %3497, %v1829_v46   ;;  %1848 = vperm.xlu0 %3499, %v1843_v17   ;;  %v2859_v24 = vsel %vm1182_vm6, %v2795_v8, 0.0 }
 0x307   : > { %1827 = vperm.xlu1 %3498, %v1822_v18   ;;  %v2860_v58 = vrot.slane %v2859_v24, 4 }
 0x30e   : > { %1855 = vperm.xlu2 %3497, %v1850_v5   ;;  %1869 = vperm.xlu0 %3499, %v1864_v27  }
 0x30f   : > { %1841 = vperm.xlu1 %3498, %v1836_v13   ;;  %v1631_v13 = vmul.f32 %v5297_v26, %v4927_v60 }
 0x311   : > { %v1675_v36 = vsel %vm1182_vm6, %v1631_v13, 0.0  ;;  %v2920_v13 = vld [vmem:[%s5713_s6 + $0x8] sm:$0xff] }
 0x312   : > { %v2715_v3 = vpop.permute.xlu0 %2714 }
 0x313   : > { %v2788_v34 = vmul.f32 %v2715_v3, %v4784_v47  ;;  %v2791_v47 = vmul.f32 %v2730_v22, %v4655_v63 }
 0x315   : > { %v2810_v38 = vsel %vm1182_vm6, %v2788_v34, 0.0  ;;  %v2831_v63 = vsel %vm1182_vm6, %v2791_v47, 0.0  ;;  %v2923_v34 = vld [vmem:[%s5713_s6 + $0x20] sm:$0xff] }
 0x316   : > { %1876 = vperm.xlu2 %3497, %v1871_v25   ;;  %1890 = vperm.xlu0 %3499, %v1885_v61   ;;  %v2811_v53 = vrot.slane %v2810_v38, 4  ;;  %v2832_v10 = vrot.slane %v2831_v63, 4 }
 0x317   : > { %1862 = vperm.xlu1 %3498, %v1857_v29  }
 0x318   : > { %v2833_v3 = vadd.f32 %v2832_v10, %v2831_v63 }
 0x31e   : > { %1897 = vperm.xlu2 %3497, %v1892_v32   ;;  %3501 = vset.pattern.permute.xlu0 %v5793_v0 }
 0x31f   : > { %1883 = vperm.xlu1 %3498, %v1878_v62   ;;  %v2861_v62 = vadd.f32 %v2860_v58, %v2859_v24 }
 0x321   : > { %v2862_v43 = vrot.slane %v2861_v62, 2 }
 0x322   : > { %v2755_v28 = vpop.permute.xlu0 %2754 }
 0x323   : > { %v2796_v55 = vmul.f32 %v2755_v28, %v4818_v30  ;;  %v2803_v30 = vsel %vm1182_vm6, %v2787_v45, 0.0  ;;  %v2924_v28 = vld [vmem:[%s5713_s6 + $0x28] sm:$0xff] }
 0x324   : > { %v2804_v51 = vrot.slane %v2803_v30, 4 }
 0x326   : > { %3502 = vset.pattern.permute.xlu2 %v5793_v0  ;;  %v2805_v25 = vadd.f32 %v2804_v51, %v2803_v30  ;;  %v2922_v30 = vld [vmem:[%s5713_s6 + $0x18] sm:$0xff] }
 0x327   : > { %1904 = vperm.xlu1 %3498, %v1899_v7  }
 0x328   : > { %v2720_v59 = vpop.permute.xlu2 %2719  ;;  %v2806_v45 = vrot.slane %v2805_v25, 2 }
 0x329   : > { %v2789_v50 = vmul.f32 %v2720_v59, %v4857_v21  ;;  %v2866_v21 = vsel %vm1182_vm6, %v2796_v55, 0.0 }
 0x32a   : > { %v2867_v44 = vrot.slane %v2866_v21, 4 }
 0x32b   : > { %v2817_v40 = vsel %vm1182_vm6, %v2789_v50, 0.0 }
 0x32c   : > { %v2818_v56 = vrot.slane %v2817_v40, 4  ;;  %v2868_v61 = vadd.f32 %v2867_v44, %v2866_v21 }
 0x32e   : > { %v2819_v29 = vadd.f32 %v2818_v56, %v2817_v40  ;;  %v2869_v55 = vrot.slane %v2868_v61, 2  ;;  %v2863_v56 = vadd.f32 %v2862_v43, %v2861_v62 }
 0x32f   : > { %3500 = vset.pattern.permute.xlu1 %v5793_v0 }
 0x330   : > { %v2760_v19 = vpop.permute.xlu2 %2759  ;;  %v2820_v50 = vrot.slane %v2819_v29, 2  ;;  %v2870_v63 = vadd.f32 %v2869_v55, %v2868_v61  ;;  %v2919_v61 = vld [vmem:[%s5713_s6] sm:$0xff] }
 0x331   : > { %v2797_v35 = vmul.f32 %v2760_v19, %v4938_v16  ;;  %v2926_v16 = vld [vmem:[%s5713_s6 + $0x38] sm:$0xff] }
 0x332   : > { %2969 = vmatpush.msra.mxu0 %v2926_v16  ;;  %v2821_v51 = vadd.f32 %v2820_v50, %v2819_v29  ;;  %v5357_v29 = vstv %s3384_s12 }
 0x333   : > { %v2873_v17 = vsel %vm1182_vm6, %v2797_v35, 0.0  ;;  %v5363_v50 = vadd.f32 %v5357_v29, %v5068_v15 }
 0x334   : > { %v2874_v22 = vrot.slane %v2873_v17, 4 }
 0x336   : > { %v2735_v2 = vpop.permute.xlu1 %2734  ;;  %v2875_v47 = vadd.f32 %v2874_v22, %v2873_v17 }
 0x337   : > { %v2792_v14 = vmul.f32 %v2735_v2, %v4803_v57  ;;  %v2925_v57 = vld [vmem:[%s5713_s6 + $0x30] sm:$0xff]  ;;  %v1632_v2 = vmul.f32 %v5297_v26, %v4980_v1 }
 0x338   : > { %v2745_v49 = vpop.permute.xlu2 %2744  ;;  %2970 = vmatpush.msra.mxu0 %v2925_v57  ;;  %v2876_v58 = vrot.slane %v2875_v47, 2 }
 0x339   : > { %v2794_v31 = vmul.f32 %v2745_v49, %v4972_v6  ;;  %v2812_v6 = vadd.f32 %v2811_v53, %v2810_v38  ;;  %v2838_v27 = vsel %vm1182_vm6, %v2792_v14, 0.0  ;;  %v2918_v38 = vld [vmem:[#allocation7 + $0x18] sm:$0xff]  ;;  %v2917_v49 = vld [vmem:[#allocation7 + $0x10] sm:$0xff]  ;;  %v2834_v53 = vrot.slane %v2833_v3, 2 }
 0x33a   : > { %v2839_v37 = vrot.slane %v2838_v27, 4  ;;  %2971 = vmatpush.msra.mxu0 %v2924_v28  ;;  %2996 = vmatpush.msra.mxu1 %v2918_v38  ;;  %v2921_v14 = vld [vmem:[%s5713_s6 + $0x10] sm:$0xff]  ;;  %v2877_v62 = vadd.f32 %v2876_v58, %v2875_v47  ;;  %v3748_v38 = vld [vmem:[%s4132_s11] sm:$0xff] }
 0x33b   : > { %v2852_v5 = vsel %vm1182_vm6, %v2794_v31, 0.0  ;;  %v2813_v7 = vrot.slane %v2812_v6, 2  ;;  %v1630_v31 = vmul.f32 %v5297_v26, %v5006_v11 }
 0x33c   : > { %v2853_v59 = vrot.slane %v2852_v5, 4  ;;  %v2840_v24 = vadd.f32 %v2839_v37, %v2838_v27  ;;  %2972 = vmatpush.msra.mxu0 %v2923_v34  ;;  %2997 = vmatpush.msra.mxu1 %v2917_v49  ;;  %v2822_v27 = vrot.slane %v2821_v51, 1 }
 0x33d   : > { %v2814_v21 = vadd.f32 %v2813_v7, %v2812_v6 }
 0x33e   : > { %v2854_v40 = vadd.f32 %v2853_v59, %v2852_v5  ;;  %2973 = vmatpush.msra.mxu0 %v2922_v30  ;;  %v2841_v57 = vrot.slane %v2840_v24, 2  ;;  %v2871_v5 = vrot.slane %v2870_v63, 1 }
 0x340   : > { %1667 = vadd.xlane.f32.xlu0 %v1666_v48  ;;  %v2775_v0 = vpop.permute.xlu2 %2774  ;;  %v2807_v48 = vadd.f32 %v2806_v45, %v2805_v25  ;;  %v2855_v16 = vrot.slane %v2854_v40, 2  ;;  %2974 = vmatpush.msra.mxu0 %v2921_v14  ;;  %v2916_v25 = vld [vmem:[#allocation7 + $0x8] sm:$0xff]  ;;  %v2842_v59 = vadd.f32 %v2841_v57, %v2840_v24  ;;  %v2872_v34 = vadd.f32 %v2871_v5, %v2870_v63 }
 0x341   : > { %v2800_v8 = vmul.f32 %v2775_v0, %v5006_v11  ;;  %v2835_v11 = vadd.f32 %v2834_v53, %v2833_v3  ;;  %v2915_v0 = vld [vmem:[#allocation7] sm:$0xff]  ;;  %2998 = vmatpush.msra.mxu1 %v2916_v25  ;;  %v2823_v45 = vadd.f32 %v2822_v27, %v2821_v51 }
 0x342   : > { %v2740_v46 = vpop.permute.xlu0 %2739  ;;  %v2808_v10 = vrot.slane %v2807_v48, 1  ;;  %2975 = vmatpush.msra.mxu0 %v2920_v13  ;;  %v2856_v7 = vadd.f32 %v2855_v16, %v2854_v40  ;;  %v2843_v30 = vrot.slane %v2842_v59, 1 }
 0x343   : > { %v2793_v18 = vmul.f32 %v2740_v46, %v4899_v20  ;;  %v1669_v20 = vsel %vm1182_vm6, %v1629_v33, 0.0  ;;  %v2894_v44 = vsel %vm1182_vm6, %v2800_v8, 0.0  ;;  %v1678_v46 = vsel %vm1182_vm6, %v1632_v2, 0.0  ;;  %2999 = vmatpush.msra.mxu1 %v2915_v0 }
 0x344   : > { %v2815_v33 = vrot.slane %v2814_v21, 1  ;;  %v2895_v26 = vrot.slane %v2894_v44, 4  ;;  %v2836_v3 = vrot.slane %v2835_v11, 1  ;;  %2976 = vmatpush.msra.mxu0 %v2919_v61  ;;  %v2809_v28 = vadd.f32 %v2808_v10, %v2807_v48  ;;  %3347 = vmatmul.msk.f32.vlgmr.msra.gmra.mxu1 %vm5729_vm1, %v3748_v38 }
 0x345   : > { %v2845_v32 = vsel %vm1182_vm6, %v2793_v18, 0.0  ;;  %v1672_v18 = vsel %vm1182_vm6, %v1630_v31, 0.0  ;;  %v2878_v8 = vrot.slane %v2877_v62, 1  ;;  %v2857_v2 = vrot.slane %v2856_v7, 1 }
 0x346   : > { %v2846_v19 = vrot.slane %v2845_v32, 4 }
 0x347   : > { %1670 = vadd.xlane.f32.xlu2 %v1669_v20  ;;  %v2816_v20 = vadd.f32 %v2815_v33, %v2814_v21  ;;  %v5379_v48 = vadd.f32 %v2878_v8, %v2877_v62  ;;  %v2858_v58 = vadd.f32 %v2857_v2, %v2856_v7 }
 0x348   : > { %1676 = vadd.xlane.f32.xlu0 %v1675_v36  ;;  %v2847_v35 = vadd.f32 %v2846_v19, %v2845_v32  ;;  %v2864_v32 = vrot.slane %v2863_v56, 1  ;;  %v2896_v19 = vadd.f32 %v2895_v26, %v2894_v44 }
 0x349   : > { %v2943_v47 = vsel %vm598_vm5, %v2816_v20, %v2809_v28 }
 0x34a   : > { %v2848_v6 = vrot.slane %v2847_v35, 2  ;;  %v2865_v43 = vadd.f32 %v2864_v32, %v2863_v56  ;;  %v2897_v21 = vrot.slane %v2896_v19, 2  ;;  %v2944_v14 = vsel %vm599_vm7, %v2823_v45, %v2943_v47 }
 0x34c   : > { %v2849_v36 = vadd.f32 %v2848_v6, %v2847_v35  ;;  %v2837_v35 = vadd.f32 %v2836_v3, %v2835_v11  ;;  %v5375_v31 = vsel %vm598_vm5, %v2872_v34, %v2865_v43  ;;  %v5383_v57 = vadd.f32 %v2897_v21, %v2896_v19 }
 0x34e   : > { %v2850_v40 = vrot.slane %v2849_v36, 1 }
 0x34f   : > { %1679 = vadd.xlane.f32.xlu2 %v1678_v46  ;;  %v2844_v46 = vadd.f32 %v2843_v30, %v2842_v59 }
 0x350   : > { %v5347_v17 = vpop.permute.xlu2 %1799  ;;  %v2725_v22 = vpop.permute.xlu1 %2724  ;;  %v2851_v11 = vadd.f32 %v2850_v40, %v2849_v36 }
 0x351   : > { %3706 = vrcp.f32 %v5347_v17  ;;  %1673 = vadd.xlane.f32.xlu1 %v1672_v18  ;;  %v2790_v37 = vmul.f32 %v2725_v22, %v5016_v54  ;;  %vm1927_vm8 = vweird.f32 %v5347_v17  ;;  %v1933_v18 = vand.u32 2147483648, %v5347_v17 }
 0x352   : > { %v1931_v59 = vand.u32 2147483647, %v5347_v17 }
 0x353   : > { %v2824_v55 = vsel %vm1182_vm6, %v2790_v37, 0.0  ;;  %v1934_v7 = vor.u32 1.1754944e-38, %v1933_v18 }
 0x354   : > { %v2825_v54 = vrot.slane %v2824_v55, 4  ;;  %vm1932_vm15 = vcmp.eq.f32.partialorder %v1931_v59, 8.507059e+37 }
 0x356   : > { %v2826_v15 = vadd.f32 %v2825_v54, %v2824_v55 }
 0x357   : > { %v5367_v49 = vpop.eup %3706 }
 0x358   : > { %v1923_v24 = vmul.f32 %v5367_v49, %v5347_v17  ;;  %v5372_v53 = vpop.permute.xlu2 %1820  ;;  %v2827_v51 = vrot.slane %v2826_v15, 2  ;;  %v2770_v44 = vpop.permute.xlu0 %2769  ;;  %vm1928_vm12 = vweird.f32 %v5367_v49 }
 0x359   : > { %3708 = vrcp.f32 %v5372_v53  ;;  %v2765_v56 = vpop.permute.xlu1 %2764  ;;  %v2799_v33 = vmul.f32 %v2770_v44, %v5057_v12  ;;  %v3749_v12 = vld [vmem:[%s4132_s11 + $0x8] sm:$0xff]  ;;  %vm5407_vm14 = vmor %vm1927_vm8, %vm1928_vm12  ;;  %vm1972_vm3 = vweird.f32 %v5372_v53  ;;  %s3886_s11 = sshra.s32 %s3111_s27, 4  ;;  %s3887_s11 = int_to_ptr.hbm [resolvable:$true] %s3886_s11 }
 0x35a   : > { %v1924_v63 = vsub.f32 1.0, %v1923_v24  ;;  %v2798_v16 = vmul.f32 %v2765_v56, %v5048_v4  ;;  %v2828_v6 = vadd.f32 %v2827_v51, %v2826_v15  ;;  %3348 = vmatmul.msk.f32.gmra.mxu1 %vm5729_vm1, %v3749_v12  ;;  %s3888_s17 = scalar_lea.hbm %s3887_s11, 16  ;;  %p3893_p3 = scmp.lt.s32.totalorder %s3887_s11, %s5717_s10 }
 0x35b   : > { %v2887_v10 = vsel %vm1182_vm6, %v2799_v33, 0.0  ;;  %p3889_p0 = scmp.ne.s32.totalorder %s3887_s11, %s3888_s17  ;;  %p3894_p4 = scmp.lt.s32.totalorder %s3892_s28, %s3888_s17 }
 0x35c   : > { %v1925_v26 = vmul.f32 %v5367_v49, %v1924_v63  ;;  %v2880_v5 = vsel %vm1182_vm6, %v2798_v16, 0.0  ;;  %v2829_v27 = vrot.slane %v2828_v6, 1  ;;  %v2888_v13 = vrot.slane %v2887_v10, 4 }
 0x35d   : > { %v2881_v25 = vrot.slane %v2880_v5, 4  ;;  %p3890_p1 = pnand %p3889_p0, %p4051_p5  ;;  %p3895_p7 = por %p3894_p4, %p3893_p3 }
 0x35e   : > { %v1926_v61 = vadd.f32 %v5367_v49, %v1925_v26  ;;  %v2830_v32 = vadd.f32 %v2829_v27, %v2828_v6  ;;  %v2889_v22 = vadd.f32 %v2888_v13, %v2887_v10  ;;  %v2951_v26 = vsel %vm599_vm7, %v5379_v48, %v5375_v31 }
 0x35f   : > { %v5392_v4 = vpop.eup %3708  ;;  %v2882_v0 = vadd.f32 %v2881_v25, %v2880_v5  ;;  %v2899_v10 = vrot.slane %v5383_v57, 1  ;;  %p3891_p2 = pneg %p3890_p1 }
 0x360   : > { %v1968_v62 = vmul.f32 %v5392_v4, %v5372_v53  ;;  %v5398_v20 = vpop.permute.xlu2 %1834  ;;  %v2945_v37 = vsel %vm601_vm4, %v2830_v32, %v2944_v14  ;;  %v2890_v19 = vrot.slane %v2889_v22, 2  ;;  %v2785_v28 = vpop.permute.xlu0 %2784  ;;  %v1930_v38 = vsel %vm5407_vm14, %v5367_v49, %v1926_v61 }
 0x361   : > { %3710 = vrcp.f32 %v5398_v20  ;;  %v2883_v36 = vrot.slane %v2882_v0, 2  ;;  %v2780_v34 = vpop.permute.xlu1 %2779  ;;  %v2802_v55 = vmul.f32 %v2785_v28, %v4980_v1  ;;  %v2946_v54 = vsel %vm603_vm9, %v2837_v35, %v2945_v37  ;;  %p3896_p8 = pnand %p3895_p7, %p3891_p2 }
 0x362   : > { %v1969_v3 = vsub.f32 1.0, %v1968_v62  ;;  %v2801_v8 = vmul.f32 %v2780_v34, %v4927_v60  ;;  %v2891_v47 = vadd.f32 %v2890_v19, %v2889_v22  ;;  %v2947_v17 = vsel %vm605_vm10, %v2844_v46, %v2946_v54 }
 0x363   : > { %v2884_v2 = vadd.f32 %v2883_v36, %v2882_v0  ;;  %v2908_v30 = vsel %vm1182_vm6, %v2802_v55, 0.0  ;;  %v2948_v1 = vsel %vm607_vm11, %v2851_v11, %v2947_v17  ;;  %v1935_v15 = vsel %vm1932_vm15, %v1934_v7, %v1930_v38 }
 0x364   : > { %v1970_v43 = vmul.f32 %v5392_v4, %v1969_v3  ;;  %v2901_v21 = vsel %vm1182_vm6, %v2801_v8, 0.0  ;;  %v2909_v40 = vrot.slane %v2908_v30, 4  ;;  %v1978_v49 = vand.u32 2147483648, %v5372_v53 }
 0x365   : > { %v2885_v60 = vrot.slane %v2884_v2, 1  ;;  %v2902_v24 = vrot.slane %v2901_v21, 4  ;;  %v2949_v14 = vsel %vm609_vm13, %v2858_v58, %v2948_v1  ;;  %vm1973_vm2 = vweird.f32 %v5392_v4 }
 0x366   : > { %v1971_v63 = vadd.f32 %v5392_v4, %v1970_v43  ;;  %v2892_v51 = vrot.slane %v2891_v47, 1  ;;  %v2910_v56 = vadd.f32 %v2909_v40, %v2908_v30  ;;  %3345 = vmatmul.msk.f32.vlgmr.msra.gmra.mxu0 %vm1182_vm6, %v2949_v14  ;;  %v1936_v11 = vmul.f32 %v1935_v15, %v5363_v50  ;;  %vm1974_vm8 = vmor %vm1972_vm3, %vm1973_vm2 }
 0x367   : > { %v3711_v35 = vpop.eup %3710  ;;  %v2886_v46 = vadd.f32 %v2885_v60, %v2884_v2  ;;  %v2903_v33 = vadd.f32 %v2902_v24, %v2901_v21  ;;  %v1976_v58 = vand.u32 2147483647, %v5372_v53  ;;  %v1979_v5 = vor.u32 1.1754944e-38, %v1978_v49 }
 0x368   : > { %v1998_v44 = vmul.f32 %v3711_v35, %v5398_v20  ;;  %v5429_v16 = vpop.permute.xlu2 %1855  ;;  %v2911_v18 = vrot.slane %v2910_v56, 2  ;;  %v1975_v13 = vsel %vm1974_vm8, %v5392_v4, %v1971_v63  ;;  %v2893_v25 = vadd.f32 %v2892_v51, %v2891_v47 }
 0x369   : > { %v2904_v27 = vrot.slane %v2903_v33, 2  ;;  %3712 = vrcp.f32 %v5429_v16  ;;  %vm1977_vm12 = vcmp.eq.f32.partialorder %v1976_v58, 8.507059e+37  ;;  %v2952_v53 = vsel %vm601_vm4, %v2886_v46, %v2951_v26 }
 0x36a   : > { %v1999_v6 = vsub.f32 1.0, %v1998_v44  ;;  %2171 = vperm.xlu1 %3500, %v1936_v11   ;;  %v2912_v61 = vadd.f32 %v2911_v18, %v2910_v56  ;;  %v1980_v48 = vsel %vm1977_vm12, %v1979_v5, %v1975_v13  ;;  %v1688_v32 = vadd.f32 %v5357_v29, %v5104_v52 }
 0x36b   : > { %v2905_v50 = vadd.f32 %v2904_v27, %v2903_v33  ;;  %vm2003_vm14 = vweird.f32 %v3711_v35  ;;  %v2900_v0 = vadd.f32 %v2899_v10, %v5383_v57  ;;  %vm2002_vm15 = vweird.f32 %v5398_v20 }
 0x36c   : > { %v2000_v12 = vmul.f32 %v3711_v35, %v1999_v6  ;;  %v2913_v31 = vrot.slane %v2912_v61, 1  ;;  %v2008_v4 = vand.u32 2147483648, %v5398_v20  ;;  %v2953_v7 = vsel %vm603_vm9, %v2893_v25, %v2952_v53  ;;  %vm2004_vm2 = vmor %vm2002_vm15, %vm2003_vm14 }
 0x36d   : > { %v2906_v62 = vrot.slane %v2905_v50, 1  ;;  %v1981_v37 = vmul.f32 %v1980_v48, %v1688_v32  ;;  %v2006_v19 = vand.u32 2147483647, %v5398_v20  ;;  %v2954_v57 = vsel %vm605_vm10, %v2900_v0, %v2953_v7 }
 0x36e   : > { %v2001_v22 = vadd.f32 %v3711_v35, %v2000_v12  ;;  %v2914_v3 = vadd.f32 %v2913_v31, %v2912_v61  ;;  %v2009_v45 = vor.u32 1.1754944e-38, %v2008_v4  ;;  %v1690_v38 = vadd.f32 %v5357_v29, %v5080_v9 }
 0x36f   : > { %v2907_v59 = vadd.f32 %v2906_v62, %v2905_v50  ;;  %v5447_v36 = vpop.eup %3712  ;;  %vm2007_vm3 = vcmp.eq.f32.partialorder %v2006_v19, 8.507059e+37  ;;  %v2053_v60 = vand.u32 2147483648, %v5429_v16  ;;  %v5473_v9 = vadd.f32 %v5357_v29, %v5070_v39 }
 0x370   : > { %v5449_v28 = vpop.permute.xlu0 %1813  ;;  %v2005_v34 = vsel %vm2004_vm2, %v3711_v35, %v2001_v22  ;;  %v2043_v20 = vmul.f32 %v5447_v36, %v5429_v16  ;;  %v5478_v15 = vadd.f32 %v5357_v29, %v5076_v42  ;;  %v1686_v35 = vadd.f32 %v5357_v29, %v5078_v23 }
 0x371   : > { %v5451_v52 = vpop.permute.xlu1 %1806  ;;  %3714 = vrcp.f32 %v5449_v28  ;;  %v2955_v55 = vsel %vm607_vm11, %v2907_v59, %v2954_v57  ;;  %v2010_v54 = vsel %vm2007_vm3, %v2009_v45, %v2005_v34  ;;  %v1687_v63 = vadd.f32 %v5357_v29, %v5084_v41 }
 0x372   : > { %2180 = vperm.xlu1 %3500, %v1981_v37   ;;  %3716 = vrcp.f32 %v5451_v52  ;;  %v2956_v8 = vsel %vm609_vm13, %v2914_v3, %v2955_v55  ;;  %v2044_v47 = vsub.f32 1.0, %v2043_v20  ;;  %v2011_v2 = vmul.f32 %v2010_v54, %v1690_v38 }
 0x373   : > { %3346 = vmatmul.msk.f32.gmra.mxu0 %vm1182_vm6, %v2956_v8  ;;  %vm2047_vm6 = vweird.f32 %v5429_v16  ;;  %v2054_v51 = vor.u32 1.1754944e-38, %v2053_v60  ;;  %v1963_v44 = vand.u32 2147483648, %v5449_v28  ;;  %v1948_v42 = vand.u32 2147483648, %v5451_v52 }
 0x374   : > { %v2045_v49 = vmul.f32 %v5447_v36, %v2044_v47  ;;  %vm1957_vm12 = vweird.f32 %v5449_v28  ;;  %v1961_v23 = vand.u32 2147483647, %v5449_v28  ;;  %v1946_v33 = vand.u32 2147483647, %v5451_v52 }
 0x375   : > { %vm1942_vm14 = vweird.f32 %v5451_v52  ;;  %vm2048_vm2 = vweird.f32 %v5447_v36  ;;  %v2051_v26 = vand.u32 2147483647, %v5429_v16  ;;  %v1964_v25 = vor.u32 1.1754944e-38, %v1963_v44 }
 0x376   : > { %v2046_v58 = vadd.f32 %v5447_v36, %v2045_v49  ;;  %v1949_v12 = vor.u32 1.1754944e-38, %v1948_v42  ;;  %vm5516_vm0 = vmor %vm2047_vm6, %vm2048_vm2 }
 0x377   : > { %v3715_v43 = vpop.eup %3714 }
 0x378   : > { %v3717_v17 = vpop.eup %3716  ;;  %v1953_v30 = vmul.f32 %v3715_v43, %v5449_v28  ;;  %v5464_v21 = vpop.permute.xlu0 %1848  ;;  %vm1958_vm8 = vweird.f32 %v3715_v43  ;;  %v2050_v62 = vsel %vm5516_vm0, %v5447_v36, %v2046_v58  ;;  %v5800_v36 = vld [vmem:[#allocation23_spill] sm:$0xff] }
 0x379   : > { %v5466_v1 = vpop.permute.xlu1 %1827  ;;  %v1938_v40 = vmul.f32 %v3717_v17, %v5451_v52  ;;  %3718 = vrcp.f32 %v5464_v21  ;;  %vm5492_vm15 = vmor %vm1957_vm12, %vm1958_vm8  ;;  %vm1943_vm3 = vweird.f32 %v3717_v17  ;;  %vm1962_vm8 = vcmp.eq.f32.partialorder %v1961_v23, 8.507059e+37 }
 0x37a   : > { %2186 = vperm.xlu1 %3500, %v2011_v2   ;;  %v1954_v24 = vsub.f32 1.0, %v1953_v30  ;;  %3720 = vrcp.f32 %v5466_v1  ;;  %vm1947_vm12 = vcmp.eq.f32.partialorder %v1946_v33, 8.507059e+37  ;;  %v2038_v31 = vand.u32 2147483648, %v5464_v21  ;;  %v5803_v33 = vld [vmem:[#allocation22_spill] sm:$0xff] }
 0x37b   : > { %v1939_v14 = vsub.f32 1.0, %v1938_v40  ;;  %v1993_v7 = vand.u32 2147483648, %v5466_v1  ;;  %v2036_v37 = vand.u32 2147483647, %v5464_v21  ;;  %vm2032_vm6 = vweird.f32 %v5464_v21 }
 0x37c   : > { %v1955_v39 = vmul.f32 %v3715_v43, %v1954_v24  ;;  %v1991_v28 = vand.u32 2147483647, %v5466_v1  ;;  %v1692_v57 = vadd.f32 %v5357_v29, %v5800_v36  ;;  %v2039_v20 = vor.u32 1.1754944e-38, %v2038_v31 }
 0x37d   : > { %v1940_v56 = vmul.f32 %v3717_v17, %v1939_v14  ;;  %v1994_v47 = vor.u32 1.1754944e-38, %v1993_v7 }
 0x37e   : > { %v1956_v46 = vadd.f32 %v3715_v43, %v1955_v39 }
 0x37f   : > { %v3719_v11 = vpop.eup %3718  ;;  %v1941_v13 = vadd.f32 %v3717_v17, %v1940_v56 }
 0x380   : > { %v5499_v6 = vpop.eup %3720  ;;  %v2028_v18 = vmul.f32 %v3719_v11, %v5464_v21  ;;  %v5502_v10 = vpop.permute.xlu0 %1869  ;;  %v1960_v27 = vsel %vm5492_vm15, %v3715_v43, %v1956_v46  ;;  %vm1944_vm15 = vmor %vm1942_vm14, %vm1943_vm3  ;;  %vm2033_vm1 = vweird.f32 %v3719_v11  ;;  %vm2052_vm14 = vcmp.eq.f32.partialorder %v2051_v26, 8.507059e+37  ;;  %v5804_v26 = vld [vmem:[#allocation21_spill] sm:$0xff] }
 0x381   : > { %v5504_v5 = vpop.permute.xlu1 %1841  ;;  %v1983_v61 = vmul.f32 %v5499_v6, %v5466_v1  ;;  %3722 = vrcp.f32 %v5502_v10  ;;  %v1965_v32 = vsel %vm1962_vm8, %v1964_v25, %v1960_v27  ;;  %v1945_v4 = vsel %vm1944_vm15, %v3717_v17, %v1941_v13  ;;  %vm5533_vm0 = vmor %vm2032_vm6, %vm2033_vm1  ;;  %v1877_v25 = vpop.permute.xlu2 %1876 }
 0x382   : > { %v2029_v50 = vsub.f32 1.0, %v2028_v18  ;;  %3724 = vrcp.f32 %v5504_v5  ;;  %v1966_v0 = vmul.f32 %v1965_v32, %v1687_v63  ;;  %v1950_v59 = vsel %vm1947_vm12, %v1949_v12, %v1945_v4 }
 0x383   : > { %v1984_v48 = vsub.f32 1.0, %v1983_v61  ;;  %v1951_v3 = vmul.f32 %v1950_v59, %v1686_v35  ;;  %vm1988_vm2 = vweird.f32 %v5499_v6  ;;  %v2055_v43 = vsel %vm2052_vm14, %v2054_v51, %v2050_v62 }
 0x384   : > { %v2030_v22 = vmul.f32 %v3719_v11, %v2029_v50  ;;  %2177 = vperm.xlu2 %3502, %v1966_v0   ;;  %vm1987_vm1 = vweird.f32 %v5466_v1  ;;  %vm2037_vm3 = vcmp.eq.f32.partialorder %v2036_v37, 8.507059e+37  ;;  %vm1992_vm12 = vcmp.eq.f32.partialorder %v1991_v28, 8.507059e+37 }
 0x385   : > { %v1985_v16 = vmul.f32 %v5499_v6, %v1984_v48  ;;  %2174 = vperm.xlu0 %3501, %v1951_v3   ;;  %vm1989_vm8 = vmor %vm1987_vm1, %vm1988_vm2  ;;  %v2083_v21 = vand.u32 2147483648, %v5502_v10  ;;  %v2081_v49 = vand.u32 2147483647, %v5502_v10  ;;  %v2023_v63 = vand.u32 2147483648, %v5504_v5  ;;  %v5805_v48 = vld [vmem:[#allocation20_spill] sm:$0xff] }
 0x386   : > { %v2031_v19 = vadd.f32 %v3719_v11, %v2030_v22  ;;  %v2056_v39 = vmul.f32 %v2055_v43, %v5478_v15  ;;  %vm2077_vm6 = vweird.f32 %v5502_v10  ;;  %v2021_v56 = vand.u32 2147483647, %v5504_v5 }
 0x387   : > { %v3723_v52 = vpop.eup %3722  ;;  %v1986_v45 = vadd.f32 %v5499_v6, %v1985_v16  ;;  %v2084_v42 = vor.u32 1.1754944e-38, %v2083_v21  ;;  %vm2017_vm2 = vweird.f32 %v5504_v5  ;;  %vm2082_vm1 = vcmp.eq.f32.partialorder %v2081_v49, 8.507059e+37 }
 0x388   : > { %v3725_v55 = vpop.eup %3724  ;;  %v2073_v8 = vmul.f32 %v3723_v52, %v5502_v10  ;;  %v2035_v38 = vsel %vm5533_vm0, %v3719_v11, %v2031_v19  ;;  %vm2078_vm15 = vweird.f32 %v3723_v52  ;;  %v1695_v11 = vadd.f32 %v5357_v29, %v5803_v33  ;;  %v5574_v28 = vpop.permute.xlu0 %1890 }
 0x389   : > { %v5540_v54 = vpop.permute.xlu1 %1862  ;;  %v2013_v2 = vmul.f32 %v3725_v55, %v5504_v5  ;;  %v2040_v30 = vsel %vm2037_vm3, %v2039_v20, %v2035_v38  ;;  %v1990_v24 = vsel %vm1989_vm8, %v5499_v6, %v1986_v45  ;;  %vm2018_vm0 = vweird.f32 %v3725_v55  ;;  %vm2079_vm14 = vmor %vm2077_vm6, %vm2078_vm15  ;;  %v5569_v16 = vpop.permute.xlu2 %1897 }
 0x38a   : > { %v2074_v17 = vsub.f32 1.0, %v2073_v8  ;;  %3726 = vrcp.f32 %v5540_v54  ;;  %v2041_v40 = vmul.f32 %v2040_v30, %v1692_v57  ;;  %v1995_v1 = vsel %vm1992_vm12, %v1994_v47, %v1990_v24  ;;  %vm2019_vm3 = vmor %vm2017_vm2, %vm2018_vm0 }
 0x38b   : > { %v2014_v60 = vsub.f32 1.0, %v2013_v2  ;;  %v1996_v51 = vmul.f32 %v1995_v1, %v5473_v9  ;;  %v2024_v9 = vor.u32 1.1754944e-38, %v2023_v63  ;;  %v1691_v6 = vadd.f32 %v5357_v29, %v5804_v26 }
 0x38c   : > { %v2075_v35 = vmul.f32 %v3723_v52, %v2074_v17  ;;  %2192 = vperm.xlu1 %3500, %v2041_v40   ;;  %vm2022_vm8 = vcmp.eq.f32.partialorder %v2021_v56, 8.507059e+37  ;;  %v2068_v5 = vand.u32 2147483648, %v5540_v54  ;;  %v2066_v50 = vand.u32 2147483647, %v5540_v54 }
 0x38d   : > { %v2015_v14 = vmul.f32 %v3725_v55, %v2014_v60  ;;  %2183 = vperm.xlu2 %3502, %v1996_v51   ;;  %2241 = vperm.xlu0 %3501, %v2056_v39   ;;  %vm2062_vm15 = vweird.f32 %v5540_v54  ;;  %v1694_v32 = vadd.f32 %v5357_v29, %v5805_v48  ;;  %3728 = vrcp.f32 %v1877_v25 }
 0x38e   : > { %v2076_v44 = vadd.f32 %v3723_v52, %v2075_v35  ;;  %v2069_v31 = vor.u32 1.1754944e-38, %v2068_v5  ;;  %vm2067_vm0 = vcmp.eq.f32.partialorder %v2066_v50, 8.507059e+37  ;;  %v2098_v47 = vand.u32 2147483648, %v1877_v25 }
 0x38f   : > { %v2016_v46 = vadd.f32 %v3725_v55, %v2015_v14  ;;  %vm2092_vm2 = vweird.f32 %v1877_v25  ;;  %v2096_v2 = vand.u32 2147483647, %v1877_v25 }
 0x390   : > { %v3727_v23 = vpop.eup %3726  ;;  %v2080_v15 = vsel %vm2079_vm14, %v3723_v52, %v2076_v44  ;;  %v2099_v40 = vor.u32 1.1754944e-38, %v2098_v47  ;;  %v3508_v44 = vld [vmem:[%s5715_s8 + $0x5] ss:$0 sm:$0xff] }
 0x391   : > { %v2058_v41 = vmul.f32 %v3727_v23, %v5540_v54  ;;  %v2085_v58 = vsel %vm2082_vm1, %v2084_v42, %v2080_v15  ;;  %v2020_v10 = vsel %vm2019_vm3, %v3725_v55, %v2016_v46  ;;  %vm2063_vm12 = vweird.f32 %v3727_v23  ;;  %v1884_v62 = vpop.permute.xlu1 %1883 }
 0x392   : > { %v2086_v18 = vmul.f32 %v2085_v58, %v1695_v11  ;;  %v2025_v13 = vsel %vm2022_vm8, %v2024_v9, %v2020_v10  ;;  %vm2064_vm6 = vmor %vm2062_vm15, %vm2063_vm12  ;;  %3730 = vrcp.f32 %v1884_v62  ;;  %vm2097_vm8 = vcmp.eq.f32.partialorder %v2096_v2, 8.507059e+37 }
 0x393   : > { %v2059_v27 = vsub.f32 1.0, %v2058_v41  ;;  %v2026_v12 = vmul.f32 %v2025_v13, %v1691_v6  ;;  %v3729_v7 = vpop.eup %3728  ;;  %3732 = vrcp.f32 %v5569_v16  ;;  %v2113_v49 = vand.u32 2147483648, %v1884_v62 }
 0x394   : > { %2247 = vperm.xlu1 %3500, %v2086_v18   ;;  %v2088_v59 = vmul.f32 %v3729_v7, %v1877_v25  ;;  %vm2093_vm14 = vweird.f32 %v3729_v7  ;;  %vm2107_vm12 = vweird.f32 %v1884_v62  ;;  %v2111_v63 = vand.u32 2147483647, %v1884_v62 }
 0x395   : > { %v2060_v61 = vmul.f32 %v3727_v23, %v2059_v27  ;;  %2189 = vperm.xlu2 %3502, %v2026_v12   ;;  %vm2094_vm1 = vmor %vm2092_vm2, %vm2093_vm14  ;;  %v2114_v11 = vor.u32 1.1754944e-38, %v2113_v49  ;;  %v2141_v15 = vand.u32 2147483647, %v5569_v16 }
 0x396   : > { %v2089_v19 = vsub.f32 1.0, %v2088_v59  ;;  %vm2112_vm14 = vcmp.eq.f32.partialorder %v2111_v63, 8.507059e+37 }
 0x397   : > { %v2061_v53 = vadd.f32 %v3727_v23, %v2060_v61 }
 0x398   : > { %v3731_v3 = vpop.eup %3730  ;;  %v2090_v57 = vmul.f32 %v3729_v7, %v2089_v19 }
 0x399   : > { %v2065_v22 = vsel %vm2064_vm6, %v3727_v23, %v2061_v53  ;;  %v5572_v37 = vpop.permute.xlu1 %1904  ;;  %v3733_v52 = vpop.eup %3732  ;;  %v2103_v36 = vmul.f32 %v3731_v3, %v1884_v62  ;;  %vm2108_vm3 = vweird.f32 %v3731_v3  ;;  %v2143_v23 = vand.u32 2147483648, %v5569_v16 }
 0x39a   : > { %v2070_v0 = vsel %vm2067_vm0, %v2069_v31, %v2065_v22  ;;  %3734 = vrcp.f32 %v5572_v37  ;;  %v2133_v34 = vmul.f32 %v3733_v52, %v5569_v16  ;;  %v2091_v8 = vadd.f32 %v3729_v7, %v2090_v57  ;;  %vm5588_vm15 = vmor %vm2107_vm12, %vm2108_vm3 }
 0x39b   : > { %v2071_v4 = vmul.f32 %v2070_v0, %v1694_v32  ;;  %3736 = vrcp.f32 %v5574_v28  ;;  %v2104_v45 = vsub.f32 1.0, %v2103_v36  ;;  %vm2138_vm6 = vweird.f32 %v3733_v52 }
 0x39c   : > { %v2134_v20 = vsub.f32 1.0, %v2133_v34  ;;  %v2095_v21 = vsel %vm2094_vm1, %v3729_v7, %v2091_v8  ;;  %vm2137_vm0 = vweird.f32 %v5569_v16  ;;  %v2144_v18 = vor.u32 1.1754944e-38, %v2143_v23 }
 0x39d   : > { %2244 = vperm.xlu2 %3502, %v2071_v4   ;;  %v2105_v38 = vmul.f32 %v3731_v3, %v2104_v45  ;;  %v2100_v14 = vsel %vm2097_vm8, %v2099_v40, %v2095_v21  ;;  %vm2139_vm2 = vmor %vm2137_vm0, %vm2138_vm6  ;;  %vm2142_vm3 = vcmp.eq.f32.partialorder %v2141_v15, 8.507059e+37  ;;  %v2158_v25 = vand.u32 2147483648, %v5572_v37 }
 0x39e   : > { %v2135_v17 = vmul.f32 %v3733_v52, %v2134_v20  ;;  %vm2152_vm8 = vweird.f32 %v5572_v37  ;;  %v2156_v12 = vand.u32 2147483647, %v5572_v37  ;;  %v2128_v31 = vand.u32 2147483648, %v5574_v28 }
 0x39f   : > { %v2106_v35 = vadd.f32 %v3731_v3, %v2105_v38  ;;  %vm2122_vm6 = vweird.f32 %v5574_v28  ;;  %v2159_v32 = vor.u32 1.1754944e-38, %v2158_v25  ;;  %v2126_v62 = vand.u32 2147483647, %v5574_v28 }
 0x3a0   : > { %v5579_v55 = vpop.eup %3734  ;;  %v2136_v56 = vadd.f32 %v3733_v52, %v2135_v17  ;;  %vm2157_vm0 = vcmp.eq.f32.partialorder %v2156_v12, 8.507059e+37  ;;  %v2129_v7 = vor.u32 1.1754944e-38, %v2128_v31 }
 0x3a1   : > { %v5581_v54 = vpop.eup %3736  ;;  %v2148_v43 = vmul.f32 %v5579_v55, %v5572_v37  ;;  %v2110_v46 = vsel %vm5588_vm15, %v3731_v3, %v2106_v35  ;;  %vm2153_vm1 = vweird.f32 %v5579_v55 }
 0x3a2   : > { %v2118_v30 = vmul.f32 %v5581_v54, %v5574_v28  ;;  %v2115_v58 = vsel %vm2112_vm14, %v2114_v11, %v2110_v46  ;;  %v2140_v26 = vsel %vm2139_vm2, %v3733_v52, %v2136_v56  ;;  %vm2154_vm12 = vmor %vm2152_vm8, %vm2153_vm1  ;;  %vm2123_vm15 = vweird.f32 %v5581_v54 }
 0x3a3   : > { %v2149_v60 = vsub.f32 1.0, %v2148_v43  ;;  %v2145_v5 = vsel %vm2142_vm3, %v2144_v18, %v2140_v26  ;;  %vm2124_vm14 = vmor %vm2122_vm6, %vm2123_vm15  ;;  %vm2127_vm2 = vcmp.eq.f32.partialorder %v2126_v62, 8.507059e+37  ;;  %vm2209_vm1 = vcmask 64512   ;;  %v3051_v26 = vld [vmem:[#allocation8 + $0x8] sm:$0xff]  ;;  %v3050_v18 = vld [vmem:[#allocation8] sm:$0xff] }
 0x3a4   : > { %v2119_v39 = vsub.f32 1.0, %v2118_v30  ;;  %vm5811_vm15 = vcmask 23552  }
 0x3a5   : > { %v2150_v42 = vmul.f32 %v5579_v55, %v2149_v60  ;;  %vm5812_vm6 = vmmov %vm5811_vm15 }
 0x3a6   : > { %v2120_v41 = vmul.f32 %v5581_v54, %v2119_v39 }
 0x3a7   : > { %v2151_v27 = vadd.f32 %v5579_v55, %v2150_v42 }
 0x3a8   : > { %v2121_v50 = vadd.f32 %v5581_v54, %v2120_v41  ;;  %v3053_v41 = vld [vmem:[#allocation8 + $0x18] sm:$0xff] }
 0x3a9   : > { %v2155_v53 = vsel %vm2154_vm12, %v5579_v55, %v2151_v27  ;;  %v5808_v55 = vld [vmem:[#allocation19_spill] sm:$0xff] }
 0x3aa   : > { %v2160_v0 = vsel %vm2157_vm0, %v2159_v32, %v2155_v53  ;;  %v2125_v4 = vsel %vm2124_vm14, %v5581_v54, %v2121_v50 }
 0x3ab   : > { %v2130_v3 = vsel %vm2127_vm2, %v2129_v7, %v2125_v4 }
 0x3b3   : > { %v1668_v24 = vpop.xlane.xlu0 %1667 }
 0x3b4   : > { %v1696_v1 = vadd.f32 %v5357_v29, %v1668_v24 }
 0x3b6   : > { %v2101_v51 = vmul.f32 %v2100_v14, %v1696_v1 }
 0x3b8   : > { %2250 = vperm.xlu0 %3501, %v2101_v51  }
 0x3ba   : > { %v1671_v33 = vpop.xlane.xlu2 %1670 }
 0x3bb   : > { %v1697_v9 = vadd.f32 %v5357_v29, %v1671_v33  ;;  %v1677_v10 = vpop.xlane.xlu0 %1676 }
 0x3bc   : > { %v1699_v13 = vadd.f32 %v5357_v29, %v1677_v10 }
 0x3bd   : > { %v2116_v6 = vmul.f32 %v2115_v58, %v1697_v9  ;;  %v3052_v58 = vld [vmem:[#allocation8 + $0x10] sm:$0xff] }
 0x3be   : > { %v2146_v61 = vmul.f32 %v2145_v5, %v1699_v13 }
 0x3bf   : > { %2253 = vperm.xlu2 %3502, %v2116_v6  }
 0x3c0   : > { %2259 = vperm.xlu0 %3501, %v2146_v61  }
 0x3c1   : > { %v3001_v39 = vpop.f32.mrf.mxu1 }
 0x3c2   : > { %v1680_v48 = vpop.xlane.xlu2 %1679 }
 0x3c3   : > { %v1700_v22 = vadd.f32 %v5357_v29, %v1680_v48 }
 0x3c4   : > { %v1674_v59 = vpop.xlane.xlu1 %1673 }
 0x3c5   : > { %v2161_v16 = vmul.f32 %v2160_v0, %v1700_v22  ;;  %v1698_v37 = vadd.f32 %v5357_v29, %v1674_v59 }
 0x3c7   : > { %2262 = vperm.xlu2 %3502, %v2161_v16   ;;  %v2131_v19 = vmul.f32 %v2130_v3, %v1698_v37 }
 0x3c9   : > { %2256 = vperm.xlu1 %3500, %v2131_v19  }
 0x3d7   : > { %v3004_v46 = vpop.f32.mrf.mxu1 }
 0x3dc   : > { %v2172_v52 = vpop.permute.xlu1 %2171 }
 0x3dd   : > { %v2194_v20 = vperm.slane %v2172_v52, %v5808_v55 }
 0x3de   : > { %v2178_v36 = vpop.permute.xlu2 %2177 }
 0x3df   : > { %v2196_v54 = vperm.slane %v2178_v36, %v5808_v55 }
 0x3e3   : > { %v2978_v63 = vpop.f32.mrf.mxu0 }
 0x3e4   : > { %v2181_v28 = vpop.permute.xlu1 %2180  ;;  %v3002_v51 = vadd.f32 %v3001_v39, %v2978_v63 }
 0x3e5   : > { %v2197_v38 = vperm.slane %v2181_v28, %v5808_v55 }
 0x3e6   : > { %v5635_v56 = vadd.f32 %v3508_v44, %v3002_v51 }
 0x3e7   : > { %v2184_v57 = vpop.permute.xlu2 %2183 }
 0x3e8   : > { %v2198_v47 = vperm.slane %v2184_v57, %v5808_v55  ;;  %v3349_v23 = vmul.f32 -1.442695, %v5635_v56 }
 0x3ea   : > { %3738 = vpow2.f32 %v3349_v23 }
 0x3ec   : > { %v2187_v34 = vpop.permute.xlu1 %2186 }
 0x3ed   : > { %v2199_v17 = vperm.slane %v2187_v34, %v5808_v55 }
 0x3ef   : > { %v2190_v43 = vpop.permute.xlu2 %2189 }
 0x3f0   : > { %v2200_v60 = vperm.slane %v2190_v43, %v5808_v55  ;;  %v2981_v42 = vpop.f32.mrf.mxu0  ;;  %v3739_v9 = vpop.eup %3738 }
 0x3f1   : > { %v3005_v33 = vadd.f32 %v3004_v46, %v2981_v42  ;;  %v3016_v6 = vadd.f32 1.0, %v3739_v9 }
 0x3f3   : > { %v5638_v11 = vadd.f32 %v3508_v44, %v3005_v33  ;;  %v3027_v43 = vand.u32 2147483647, %v3016_v6  ;;  %v3750_v44 = vld [vmem:[%s4115_s22] sm:$0xff] }
 0x3f5   : > { %v3350_v15 = vmul.f32 -1.442695, %v5638_v11 }
 0x3f7   : > { %v2175_v45 = vpop.permute.xlu0 %2174  ;;  %3740 = vpow2.f32 %v3350_v15  ;;  %v2245_v13 = vpop.permute.xlu2 %2244  ;;  %v3751_v15 = vld [vmem:[%s4115_s22 + $0x8] sm:$0xff] }
 0x3f8   : > { %v2195_v8 = vperm.slane %v2175_v45, %v5808_v55  ;;  %3742 = vrcp.f32 %v3016_v6  ;;  %v2265_v22 = vperm.slane %v2245_v13, %v5808_v55 }
 0x3fa   : > { %v2202_v29 = vsel %vm598_vm5, %v2195_v8, %v2194_v20  ;;  %v3029_v8 = vand.u32 2147483648, %v3016_v6 }
 0x3fb   : > { %v2203_v2 = vsel %vm599_vm7, %v2196_v54, %v2202_v29 }
 0x3fc   : > { %v2204_v30 = vsel %vm601_vm4, %v2197_v38, %v2203_v2 }
 0x3fd   : > { %v2205_v40 = vsel %vm603_vm9, %v2198_v47, %v2204_v30  ;;  %v3741_v27 = vpop.eup %3740 }
 0x3fe   : > { %v2193_v21 = vpop.permute.xlu1 %2192  ;;  %v2206_v35 = vsel %vm605_vm10, %v2199_v17, %v2205_v40  ;;  %v3017_v25 = vadd.f32 1.0, %v3741_v27  ;;  %v3743_v5 = vpop.eup %3742 }
 0x3ff   : > { %v2201_v24 = vperm.slane %v2193_v21, %v5808_v55  ;;  %v2207_v1 = vsel %vm607_vm11, %v2200_v60, %v2206_v35  ;;  %v2242_v10 = vpop.permute.xlu0 %2241  ;;  %v3019_v61 = vmul.f32 %v3743_v5, %v3016_v6  ;;  %vm3024_vm3 = vweird.f32 %v3743_v5 }
 0x400   : > { %3744 = vrcp.f32 %v3017_v25  ;;  %v2264_v31 = vperm.slane %v2242_v10, %v5808_v55  ;;  %v3030_v21 = vor.u32 1.1754944e-38, %v3029_v8  ;;  %v3044_v40 = vand.u32 2147483648, %v3017_v25 }
 0x401   : > { %v2208_v49 = vsel %vm609_vm13, %v2201_v24, %v2207_v1  ;;  %v3020_v48 = vsub.f32 1.0, %v3019_v61  ;;  %v3042_v35 = vand.u32 2147483647, %v3017_v25 }
 0x402   : > { %3326 = vmatmul.msk.f32.vlgmr.msra.gmra.mxu3 %vm2209_vm1, %v2208_v49  ;;  %v2305_v14 = vsel %vm2209_vm1, %v2208_v49, 0.0  ;;  %v2272_v4 = vsel %vm598_vm5, %v2265_v22, %v2264_v31  ;;  %vm3023_vm5 = vweird.f32 %v3016_v6  ;;  %v3045_v49 = vor.u32 1.1754944e-38, %v3044_v40 }
 0x403   : > { %2306 = vadd.xlane.f32.xlu1 %v2305_v14  ;;  %3073 = vmatpush.msra.mxu3 %v3053_v41  ;;  %v3021_v16 = vmul.f32 %v3743_v5, %v3020_v48  ;;  %vm3043_vm8 = vcmp.eq.f32.partialorder %v3042_v35, 8.507059e+37 }
 0x405   : > { %3074 = vmatpush.msra.mxu3 %v3052_v58  ;;  %v3022_v57 = vadd.f32 %v3743_v5, %v3021_v16  ;;  %v3509_v58 = vld [vmem:[%s5715_s8 + $0x6] ss:$0 sm:$0xff] }
 0x406   : > { %v2248_v53 = vpop.permute.xlu1 %2247  ;;  %v3745_v62 = vpop.eup %3744 }
 0x407   : > { %3075 = vmatpush.msra.mxu3 %v3051_v26  ;;  %v2266_v32 = vperm.slane %v2248_v53, %v5808_v55  ;;  %v3034_v59 = vmul.f32 %v3745_v62, %v3017_v25 }
 0x409   : > { %3076 = vmatpush.msra.mxu3 %v3050_v18  ;;  %v2273_v7 = vsel %vm599_vm7, %v2266_v32, %v2272_v4  ;;  %v3035_v20 = vsub.f32 1.0, %v3034_v59  ;;  %vm3025_vm7 = vmor %vm3023_vm5, %vm3024_vm3 }
 0x40a   : > { %v3026_v2 = vsel %vm3025_vm7, %v3743_v5, %v3022_v57 }
 0x40b   : > { %v3036_v30 = vmul.f32 %v3745_v62, %v3035_v20 }
 0x419   : > { %v2254_v50 = vpop.permute.xlu2 %2253 }
 0x41a   : > { %v2268_v19 = vperm.slane %v2254_v50, %v5808_v55 }
 0x421   : > { %v2263_v52 = vpop.permute.xlu2 %2262 }
 0x422   : > { %v2271_v54 = vperm.slane %v2263_v52, %v5808_v55 }
 0x42a   : > { %v2251_v12 = vpop.permute.xlu0 %2250 }
 0x42b   : > { %v2267_v0 = vperm.slane %v2251_v12, %v5808_v55 }
 0x42d   : > { %v2274_v37 = vsel %vm601_vm4, %v2267_v0, %v2273_v7  ;;  %vm3028_vm4 = vcmp.eq.f32.partialorder %v3027_v43, 8.507059e+37 }
 0x42e   : > { %v2275_v45 = vsel %vm603_vm9, %v2268_v19, %v2274_v37  ;;  %v3031_v60 = vsel %vm3028_vm4, %v3030_v21, %v3026_v2  ;;  %vm3039_vm9 = vweird.f32 %v3745_v62 }
 0x42f   : > { %v3048_v24 = vmul.f32 %v3031_v60, %v5635_v56 }
 0x432   : > { %v2260_v3 = vpop.permute.xlu0 %2259 }
 0x433   : > { %v2270_v34 = vperm.slane %v2260_v3, %v5808_v55 }
 0x43b   : > { %v2257_v36 = vpop.permute.xlu1 %2256 }
 0x43c   : > { %v2269_v28 = vperm.slane %v2257_v36, %v5808_v55  ;;  %v3037_v55 = vadd.f32 %v3745_v62, %v3036_v30 }
 0x43e   : > { %v2276_v38 = vsel %vm605_vm10, %v2269_v28, %v2275_v45  ;;  %vm3038_vm10 = vweird.f32 %v3017_v25 }
 0x43f   : > { %v2277_v29 = vsel %vm607_vm11, %v2270_v34, %v2276_v38  ;;  %vm3040_vm11 = vmor %vm3038_vm10, %vm3039_vm9 }
 0x440   : > { %v2278_v47 = vsel %vm609_vm13, %v2271_v54, %v2277_v29  ;;  %vm5809_vm13 = vcmask 261120   ;;  %v3041_v1 = vsel %vm3040_vm11, %v3745_v62, %v3037_v55 }
 0x441   : > { %3327 = vmatmul.msk.f32.vlgmr.msrb.gmra.mxu3 %vm2209_vm1, %v2278_v47  ;;  %v2308_v17 = vsel %vm2209_vm1, %v2278_v47, 0.0  ;;  %v3046_v14 = vsel %vm3043_vm8, %v3045_v49, %v3041_v1  ;;  %vm5810_vm12 = vmmov %vm5809_vm13 }
 0x442   : > { %2309 = vadd.xlane.f32.xlu0 %v2308_v17  ;;  %v3049_v63 = vmul.f32 %v3046_v14, %v5638_v11  ;;  %vm5813_vm0 = vmmov %vm5810_vm12 }
 0x443   : > { %vm5814_vm14 = vmmov %vm5813_vm0 }
 0x449   : > { %3351 = vmatmul.msk.f32.vlgmr.msra.gmra.mxu3 %vm5809_vm13, %v3048_v24 }
 0x451   : > { %3352 = vmatmul.msk.f32.gmra.mxu3 %vm5810_vm12, %v3049_v63 }
 0x476   : > { %v2307_v39 = vpop.xlane.xlu1 %2306 }
 0x477   : > { %v2311_v56 = vmul.f32 %v3750_v44, %v2307_v39 }
 0x485   : > { %v2229_v51 = vpop.f32.mrf.mxu3 }
 0x486   : > { %v2301_v42 = vadd.f32 %v3750_v44, %v2229_v51 }
 0x488   : > { %v2313_v46 = vsub.f32 %v2301_v42, %v2311_v56 }
 0x48a   : > { %2315 = vst.msk [vmem:[%s461_s20] sm:$0xff] %vm5811_vm15, %v2313_v46 }
 0x4b5   : > { %v2310_v23 = vpop.xlane.xlu0 %2309 }
 0x4b6   : > { %v2312_v9 = vmul.f32 %v3751_v15, %v2310_v23 }
 0x4c4   : > { %v2298_v33 = vpop.f32.mrf.mxu3 }
 0x4c5   : > { %v2302_v11 = vadd.f32 %v3751_v15, %v2298_v33 }
 0x4c7   : > { %v2314_v41 = vsub.f32 %v2302_v11, %v2312_v9 }
 0x4c9   : > { %2316 = vst.msk [vmem:[%s461_s20 + $0x8] sm:$0xff] %vm5812_vm6, %v2314_v41 }
 0x4cc   : > { %v3078_v26 = vpop.f32.mrf.mxu3 }
 0x4cd   : > { %v3079_v6 = vadd.f32 %v3509_v58, %v3078_v26 }
 0x4cf   : > { %3084 = vst.msk [vmem:[%s444_s3] sm:$0xff] %vm5813_vm0, %v3079_v6 }
 0x4d4   : > { %v3081_v18 = vpop.f32.mrf.mxu3 }
 0x4d5   : > { %v3082_v10 = vadd.f32 %v3509_v58, %v3081_v18 }
 0x4d7   : > { %3085 = vst.msk [vmem:[%s444_s3 + $0x8] sm:$0xff] %vm5814_vm14, %v3082_v10 }
 0x4d8   : > { %3899 = shalt.err (!%p3896_p8)
}
 0x4d9   : > { %s3956_s2 = smov 128   ;;  %s3957_s19 = smov 8  }
 0x4da   : > { %3401 = dma.vmem_to_hbm [thread:$0]  (%p4051_p5), %s3109_s26, 256, %s3111_s27, %s3092_s29, %s3956_s2, %s3956_s2, %s3957_s19  }
 0x4db PF: > { %p3428_p9 = scmp.ge.s32.totalorder %s3946_s16, 2  ;;  %s3133_s25 = sand.u32 1, %s3934_s13  }
 0x4dc   : > { %s3134_s3 = scalar_lea.sflag [#allocation4], %s3133_s25 }
 0x4dd   : > { %p3417_p10 = pnand %p3428_p9, %p4055_p6 }
 0x4df   : > { %p3418_p11 = pneg %p3417_p10 }
 0x4e1   : > { %3929 = dma.done.wait (%p3418_p11), %s3134_s3, 256  }
 0x4e2   : > { %3931 = vsyncadd (%p3418_p11), %s3134_s3, 4294967040  ;;  %s5816_s16 = sld [smem:[#allocation16_spill]]  ;;  %s5819_s13 = smov %s3938_s14 }
 0x4e3   : > { %s5817_s12 = sld [smem:[#allocation15_spill]] }
 0x4e4   : > { %s5818_s15 = sld [smem:[#allocation17_spill]] }
 0x4e8   : > { %p24_p12 = scmp.ge.s32.totalorder %s5816_s16, 4  }
 0x4e9   : > { %s5820_s14 = smov %s5817_s12 }
 0x4ea   :  { %26 = sbr.rel (!%p24_p12) target bundleno = 9 (0x9), region = 123 }
 0x4ef   :  { %3140 = vsyncpa [#allocation3], 1 }
 0x4f0   :  { %3142 = vsyncpa [#allocation3 + $0x1], 1 }
 0x4f1   :  { %3143 = vsyncpa [#allocation6], 1 }
 0x4f2   :  { %3144 = vsyncpa [#allocation9], 1 }
 0x4f3   :  { %3145 = vsyncpa [#allocation4], 1 }
 0x4f4   :  { %3147 = vsyncpa [#allocation4 + $0x1], 1 }

</bundles_post_ra>
